<compile_context>
chip_gen: v5e
topology: v5e:2x2
jax: 0.10.0
libtpu: 0.0.40
codegen_flags: <defaults>
</compile_context>

<pallas_src>
import functools

import jax
import jax.numpy as jnp
from jax.experimental import pallas as pl
from jax.experimental.pallas import tpu as pltpu


LATENT_DIM = 20
IN_DIM = 28 * 28          # 784
HID_DIM = 400
TB_MAX = 256              # batch tile cap


def _round_up(n, m):
    return ((n + m - 1) // m) * m


def _vae_kernel(x_ref, eps_ref,
                w1_ref, b1_ref,
                w2_ref, b2_ref,        # fused fc21||fc22
                w3_ref, b3_ref,
                w4_ref, b4_ref,
                recon_ref, ml_ref):
    # x may arrive as f32 or bf16; cast to bf16 for the MXU inside the kernel.
    x = x_ref[...].astype(jnp.bfloat16)                           # (TB, 784)

    # ---- encode ----
    h1 = jnp.dot(x, w1_ref[...], preferred_element_type=jnp.float32) + b1_ref[...]
    h1 = jnp.maximum(h1, 0.0)                                     # relu, f32 (TB, 400)

    ml = jnp.dot(h1.astype(jnp.bfloat16), w2_ref[...],
                 preferred_element_type=jnp.float32) + b2_ref[...]   # (TB, 2*latent)
    mu = ml[:, :LATENT_DIM]
    logvar = ml[:, LATENT_DIM:]

    # ---- reparameterize: z = mu + eps * exp(0.5 * logvar) ----
    std = jnp.exp(0.5 * logvar)                                   # EUP
    z = mu + eps_ref[...].astype(jnp.float32) * std               # f32 (TB, latent)

    # ---- decode ----
    h3 = jnp.dot(z.astype(jnp.bfloat16), w3_ref[...],
                 preferred_element_type=jnp.float32) + b3_ref[...]
    h3 = jnp.maximum(h3, 0.0)                                     # relu, f32 (TB, 400)

    logits = jnp.dot(h3.astype(jnp.bfloat16), w4_ref[...],
                     preferred_element_type=jnp.float32) + b4_ref[...]
    # sigmoid: exp on EUP, approx reciprocal on EUP -> frees VPU slots
    recon = pl.reciprocal(1.0 + jnp.exp(-logits), approx=True)

    recon_ref[...] = recon
    ml_ref[...] = ml


def vae_forward(x, eps, params, *, tb_max=TB_MAX):
    """x: (B, 1, 28, 28) or (B, 784); eps: (B, latent); returns (recon, mu, logvar)."""
    B = x.shape[0]
    x_flat = x.reshape(B, IN_DIM)

    # Batch tiling: a single tile (no padding) whenever B fits, otherwise tiles of
    # tb_max with zero-padding only for the ragged tail.
    if B <= tb_max:
        tb, bp = B, B
    else:
        tb, bp = tb_max, _round_up(B, tb_max)
    grid = (bp // tb,)

    if bp != B:
        # a materialization is unavoidable here, so also pack x to bf16
        xb = jnp.pad(x_flat.astype(jnp.bfloat16), ((0, bp - B), (0, 0)))
        epsb = jnp.pad(eps.astype(jnp.float32), ((0, bp - B), (0, 0)))
    else:
        xb = x_flat
        epsb = eps

    w1 = params["w1"].astype(jnp.bfloat16)
    b1 = params["b1"].astype(jnp.float32)
    w2 = jnp.concatenate([params["w21"], params["w22"]], axis=1).astype(jnp.bfloat16)
    b2 = jnp.concatenate([params["b21"], params["b22"]], axis=1).astype(jnp.float32)
    w3 = params["w3"].astype(jnp.bfloat16)
    b3 = params["b3"].astype(jnp.float32)
    w4 = params["w4"].astype(jnp.bfloat16)
    b4 = params["b4"].astype(jnp.float32)

    def resident(a):   # weights/biases: constant block index -> DMA'd once, VMEM-resident
        return pl.BlockSpec(a.shape, lambda i: (0, 0))

    in_specs = [
        pl.BlockSpec((tb, IN_DIM), lambda i: (i, 0)),          # x tile
        pl.BlockSpec((tb, LATENT_DIM), lambda i: (i, 0)),      # eps tile
        resident(w1), resident(b1),
        resident(w2), resident(b2),
        resident(w3), resident(b3),
        resident(w4), resident(b4),
    ]
    out_specs = (
        pl.BlockSpec((tb, IN_DIM), lambda i: (i, 0)),          # recon tile
        pl.BlockSpec((tb, 2 * LATENT_DIM), lambda i: (i, 0)),  # fused mu||logvar tile
    )
    out_shape = (
        jax.ShapeDtypeStruct((bp, IN_DIM), jnp.float32),
        jax.ShapeDtypeStruct((bp, 2 * LATENT_DIM), jnp.float32),
    )

    x_bytes = jnp.dtype(xb.dtype).itemsize
    eps_bytes = jnp.dtype(epsb.dtype).itemsize
    flops = 2 * bp * (IN_DIM * HID_DIM + HID_DIM * 2 * LATENT_DIM
                      + LATENT_DIM * HID_DIM + HID_DIM * IN_DIM)
    transcendentals = bp * (LATENT_DIM + 2 * IN_DIM)           # exp(std), exp+recip of sigmoid
    bytes_accessed = (
        2 * (w1.size + w2.size + w3.size + w4.size)            # bf16 weights
        + 4 * (b1.size + b2.size + b3.size + b4.size)          # f32 biases
        + x_bytes * bp * IN_DIM                                # x in
        + eps_bytes * bp * LATENT_DIM                          # eps in
        + 4 * bp * IN_DIM                                      # recon out (f32)
        + 4 * bp * 2 * LATENT_DIM                              # mu||logvar out (f32)
    )

    recon_p, ml_p = pl.pallas_call(
        _vae_kernel,
        out_shape=out_shape,
        grid=grid,
        in_specs=in_specs,
        out_specs=out_specs,
        compiler_params=pltpu.CompilerParams(
            dimension_semantics=("parallel",),                 # v7x: shard batch across TCs
        ),
        cost_estimate=pl.CostEstimate(
            flops=flops, transcendentals=transcendentals, bytes_accessed=bytes_accessed),
    )(xb, epsb, w1, b1, w2, b2, w3, b3, w4, b4)

    recon = recon_p[:B]
    mu = ml_p[:B, :LATENT_DIM]
    logvar = ml_p[:B, LATENT_DIM:]
    return recon, mu, logvar


def init_params(key):
    """Deterministic init. Weights stored as (in, out) = transpose of PyTorch's (out, in)."""
    def linear(k, fan_in, fan_out):
        kw, kb = jax.random.split(k)
        bound = 1.0 / jnp.sqrt(float(fan_in))
        w = jax.random.uniform(kw, (fan_in, fan_out), jnp.float32, -bound, bound)
        b = jax.random.uniform(kb, (1, fan_out), jnp.float32, -bound, bound)
        return w, b

    k1, k21, k22, k3, k4 = jax.random.split(key, 5)
    w1, b1 = linear(k1, IN_DIM, HID_DIM)
    w21, b21 = linear(k21, HID_DIM, LATENT_DIM)
    w22, b22 = linear(k22, HID_DIM, LATENT_DIM)
    w3, b3 = linear(k3, LATENT_DIM, HID_DIM)
    w4, b4 = linear(k4, HID_DIM, IN_DIM)
    return dict(w1=w1, b1=b1, w21=w21, b21=b21, w22=w22, b22=b22,
                w3=w3, b3=b3, w4=w4, b4=b4)


def _vae_reference(x, eps, params):
    """Pure-JAX f32 reference (matches the PyTorch forward)."""
    B = x.shape[0]
    xf = x.reshape(B, IN_DIM).astype(jnp.float32)
    h1 = jnp.maximum(xf @ params["w1"] + params["b1"], 0.0)
    mu = h1 @ params["w21"] + params["b21"]
    logvar = h1 @ params["w22"] + params["b22"]
    z = mu + eps * jnp.exp(0.5 * logvar)
    h3 = jnp.maximum(z @ params["w3"] + params["b3"], 0.0)
    recon = jax.nn.sigmoid(h3 @ params["w4"] + params["b4"])
    return recon, mu, logvar


if __name__ == "__main__":
    key = jax.random.PRNGKey(0)
    k_params, k_x, k_eps = jax.random.split(key, 3)

    params = init_params(k_params)

    B = 2
    x = jax.random.normal(k_x, (B, 1, 28, 28), dtype=jnp.float32)   # NCHW input
    # eps plays the role of torch.randn_like(std) in reparameterize (drawn outside
    # the kernel for determinism, passed in as an argument).
    eps = jax.random.normal(k_eps, (B, LATENT_DIM), dtype=jnp.float32)

    fwd = jax.jit(functools.partial(vae_forward, params=params))
    recon, mu, logvar = fwd(x, eps)
    jax.block_until_ready((recon, mu, logvar))

    assert recon.shape == (B, IN_DIM)
    assert mu.shape == (B, LATENT_DIM)
    assert logvar.shape == (B, LATENT_DIM)
    assert bool(jnp.all(jnp.isfinite(recon)))
    # approx-reciprocal sigmoid: allow tiny numerical slack around [0, 1]
    assert bool(jnp.all((recon >= -1e-3) & (recon <= 1.0 + 1e-3)))

    # correctness vs pure-JAX f32 reference (bf16 matmul tolerance)
    r_ref, mu_ref, lv_ref = _vae_reference(x, eps, params)
    assert float(jnp.max(jnp.abs(recon - r_ref))) < 0.1
    assert float(jnp.max(jnp.abs(mu - mu_ref))) < 0.1
    assert float(jnp.max(jnp.abs(logvar - lv_ref))) < 0.1

    print("KERNEL_OK")
</pallas_src>

<mosaic_0001>
module attributes {stable_mosaic.version = 11 : i64} {
  func.func @_vae_kernel(%arg0: i32, %arg1: memref<2x784xf32, #tpu.memory_space<vmem>>, %arg2: memref<2x20xf32, #tpu.memory_space<vmem>>, %arg3: memref<784x400xbf16, #tpu.memory_space<vmem>>, %arg4: memref<1x400xf32, #tpu.memory_space<vmem>>, %arg5: memref<400x40xbf16, #tpu.memory_space<vmem>>, %arg6: memref<1x40xf32, #tpu.memory_space<vmem>>, %arg7: memref<20x400xbf16, #tpu.memory_space<vmem>>, %arg8: memref<1x400xf32, #tpu.memory_space<vmem>>, %arg9: memref<400x784xbf16, #tpu.memory_space<vmem>>, %arg10: memref<1x784xf32, #tpu.memory_space<vmem>>, %arg11: memref<2x784xf32, #tpu.memory_space<vmem>>, %arg12: memref<2x40xf32, #tpu.memory_space<vmem>>) attributes {dimension_semantics = [#tpu.dimension_semantics<parallel>], iteration_bounds = array<i64: 1>, scalar_prefetch = 0 : i64, scratch_operands = 0 : i64, tpu.core_type = #tpu.core_type<tc>, window_params = [{transform_indices = @transform_0, window_bounds = array<i64: 2, 784>}, {transform_indices = @transform_1, window_bounds = array<i64: 2, 20>}, {pipeline_mode = #tpu.pipeline_mode<synchronous>, transform_indices = @transform_2, window_bounds = array<i64: 784, 400>}, {pipeline_mode = #tpu.pipeline_mode<synchronous>, transform_indices = @transform_3, window_bounds = array<i64: 1, 400>}, {pipeline_mode = #tpu.pipeline_mode<synchronous>, transform_indices = @transform_4, window_bounds = array<i64: 400, 40>}, {pipeline_mode = #tpu.pipeline_mode<synchronous>, transform_indices = @transform_5, window_bounds = array<i64: 1, 40>}, {pipeline_mode = #tpu.pipeline_mode<synchronous>, transform_indices = @transform_6, window_bounds = array<i64: 20, 400>}, {pipeline_mode = #tpu.pipeline_mode<synchronous>, transform_indices = @transform_7, window_bounds = array<i64: 1, 400>}, {pipeline_mode = #tpu.pipeline_mode<synchronous>, transform_indices = @transform_8, window_bounds = array<i64: 400, 784>}, {pipeline_mode = #tpu.pipeline_mode<synchronous>, transform_indices = @transform_9, window_bounds = array<i64: 1, 784>}, {transform_indices = @transform_10, window_bounds = array<i64: 2, 784>}, {transform_indices = @transform_11, window_bounds = array<i64: 2, 40>}]} {
    %c0 = arith.constant 0 : index
    %c0_0 = arith.constant 0 : index
    %0 = vector.load %arg1[%c0, %c0_0] : memref<2x784xf32, #tpu.memory_space<vmem>>, vector<2x784xf32>
    %1 = arith.truncf %0 : vector<2x784xf32> to vector<2x784xbf16>
    %c0_1 = arith.constant 0 : index
    %c0_2 = arith.constant 0 : index
    %2 = vector.load %arg3[%c0_1, %c0_2] : memref<784x400xbf16, #tpu.memory_space<vmem>>, vector<784x400xbf16>
    %cst = arith.constant dense<0.000000e+00> : vector<2x400xf32>
    %3 = tpu.matmul %1, %2, %cst {dimension_numbers = #tpu.dot_dimension_numbers<[1], [0], [0], [1], [0, 0, 1, 1], [], []>} : vector<2x784xbf16>, vector<784x400xbf16>, vector<2x400xf32> -> vector<2x400xf32>
    %c0_3 = arith.constant 0 : index
    %c0_4 = arith.constant 0 : index
    %4 = vector.load %arg4[%c0_3, %c0_4] : memref<1x400xf32, #tpu.memory_space<vmem>>, vector<1x400xf32>
    %5 = vector.broadcast %4 : vector<1x400xf32> to vector<2x400xf32>
    %6 = arith.addf %3, %5 : vector<2x400xf32>
    %cst_5 = arith.constant 0.000000e+00 : f32
    %7 = vector.broadcast %cst_5 : f32 to vector<2x400xf32>
    %8 = arith.maximumf %6, %7 : vector<2x400xf32>
    %9 = arith.truncf %8 : vector<2x400xf32> to vector<2x400xbf16>
    %c0_6 = arith.constant 0 : index
    %c0_7 = arith.constant 0 : index
    %10 = vector.load %arg5[%c0_6, %c0_7] : memref<400x40xbf16, #tpu.memory_space<vmem>>, vector<400x40xbf16>
    %cst_8 = arith.constant dense<0.000000e+00> : vector<2x40xf32>
    %11 = tpu.matmul %9, %10, %cst_8 {dimension_numbers = #tpu.dot_dimension_numbers<[1], [0], [0], [1], [0, 0, 1, 1], [], []>} : vector<2x400xbf16>, vector<400x40xbf16>, vector<2x40xf32> -> vector<2x40xf32>
    %c0_9 = arith.constant 0 : index
    %c0_10 = arith.constant 0 : index
    %12 = vector.load %arg6[%c0_9, %c0_10] : memref<1x40xf32, #tpu.memory_space<vmem>>, vector<1x40xf32>
    %13 = vector.broadcast %12 : vector<1x40xf32> to vector<2x40xf32>
    %14 = arith.addf %11, %13 : vector<2x40xf32>
    %15 = vector.extract_strided_slice %14 {offsets = [0, 0], sizes = [2, 20], strides = [1, 1]} : vector<2x40xf32> to vector<2x20xf32>
    %16 = vector.extract_strided_slice %14 {offsets = [0, 20], sizes = [2, 20], strides = [1, 1]} : vector<2x40xf32> to vector<2x20xf32>
    %cst_11 = arith.constant 5.000000e-01 : f32
    %17 = vector.broadcast %cst_11 : f32 to vector<2x20xf32>
    %18 = arith.mulf %17, %16 : vector<2x20xf32>
    %19 = math.exp %18 : vector<2x20xf32>
    %c0_12 = arith.constant 0 : index
    %c0_13 = arith.constant 0 : index
    %20 = vector.load %arg2[%c0_12, %c0_13] : memref<2x20xf32, #tpu.memory_space<vmem>>, vector<2x20xf32>
    %21 = arith.mulf %20, %19 : vector<2x20xf32>
    %22 = arith.addf %15, %21 : vector<2x20xf32>
    %23 = arith.truncf %22 : vector<2x20xf32> to vector<2x20xbf16>
    %c0_14 = arith.constant 0 : index
    %c0_15 = arith.constant 0 : index
    %24 = vector.load %arg7[%c0_14, %c0_15] : memref<20x400xbf16, #tpu.memory_space<vmem>>, vector<20x400xbf16>
    %cst_16 = arith.constant dense<0.000000e+00> : vector<2x400xf32>
    %25 = tpu.matmul %23, %24, %cst_16 {dimension_numbers = #tpu.dot_dimension_numbers<[1], [0], [0], [1], [0, 0, 1, 1], [], []>} : vector<2x20xbf16>, vector<20x400xbf16>, vector<2x400xf32> -> vector<2x400xf32>
    %c0_17 = arith.constant 0 : index
    %c0_18 = arith.constant 0 : index
    %26 = vector.load %arg8[%c0_17, %c0_18] : memref<1x400xf32, #tpu.memory_space<vmem>>, vector<1x400xf32>
    %27 = vector.broadcast %26 : vector<1x400xf32> to vector<2x400xf32>
    %28 = arith.addf %25, %27 : vector<2x400xf32>
    %cst_19 = arith.constant 0.000000e+00 : f32
    %29 = vector.broadcast %cst_19 : f32 to vector<2x400xf32>
    %30 = arith.maximumf %28, %29 : vector<2x400xf32>
    %31 = arith.truncf %30 : vector<2x400xf32> to vector<2x400xbf16>
    %c0_20 = arith.constant 0 : index
    %c0_21 = arith.constant 0 : index
    %32 = vector.load %arg9[%c0_20, %c0_21] : memref<400x784xbf16, #tpu.memory_space<vmem>>, vector<400x784xbf16>
    %cst_22 = arith.constant dense<0.000000e+00> : vector<2x784xf32>
    %33 = tpu.matmul %31, %32, %cst_22 {dimension_numbers = #tpu.dot_dimension_numbers<[1], [0], [0], [1], [0, 0, 1, 1], [], []>} : vector<2x400xbf16>, vector<400x784xbf16>, vector<2x784xf32> -> vector<2x784xf32>
    %c0_23 = arith.constant 0 : index
    %c0_24 = arith.constant 0 : index
    %34 = vector.load %arg10[%c0_23, %c0_24] : memref<1x784xf32, #tpu.memory_space<vmem>>, vector<1x784xf32>
    %35 = vector.broadcast %34 : vector<1x784xf32> to vector<2x784xf32>
    %36 = arith.addf %33, %35 : vector<2x784xf32>
    %cst_25 = arith.constant 0.000000e+00 : f32
    %37 = vector.broadcast %cst_25 : f32 to vector<2x784xf32>
    %38 = arith.subf %37, %36 : vector<2x784xf32>
    %39 = math.exp %38 : vector<2x784xf32>
    %cst_26 = arith.constant 1.000000e+00 : f32
    %40 = vector.broadcast %cst_26 : f32 to vector<2x784xf32>
    %41 = arith.addf %40, %39 : vector<2x784xf32>
    %42 = tpu.reciprocal %41 {approx = true} : vector<2x784xf32> -> vector<2x784xf32>
    %c0_27 = arith.constant 0 : index
    %c0_28 = arith.constant 0 : index
    %43 = vector.load %arg11[%c0_27, %c0_28] : memref<2x784xf32, #tpu.memory_space<vmem>>, vector<2x784xf32>
    tpu.vector_store %arg11[%c0_27, %c0_28], %42 {strides = array<i32>} : memref<2x784xf32, #tpu.memory_space<vmem>>, vector<2x784xf32>,
    %c0_29 = arith.constant 0 : index
    %c0_30 = arith.constant 0 : index
    %44 = vector.load %arg12[%c0_29, %c0_30] : memref<2x40xf32, #tpu.memory_space<vmem>>, vector<2x40xf32>
    tpu.vector_store %arg12[%c0_29, %c0_30], %14 {strides = array<i32>} : memref<2x40xf32, #tpu.memory_space<vmem>>, vector<2x40xf32>,
    return
  }
  func.func @transform_0(%arg0: i32) -> (i32, i32) {
    %c0_i32 = arith.constant 0 : i32
    %c0_i32_0 = arith.constant 0 : i32
    return %arg0, %c0_i32 : i32, i32
  }
  func.func @transform_1(%arg0: i32) -> (i32, i32) {
    %c0_i32 = arith.constant 0 : i32
    %c0_i32_0 = arith.constant 0 : i32
    return %arg0, %c0_i32 : i32, i32
  }
  func.func @transform_2(%arg0: i32) -> (i32, i32) {
    %c0_i32 = arith.constant 0 : i32
    %c0_i32_0 = arith.constant 0 : i32
    %c0_i32_1 = arith.constant 0 : i32
    return %c0_i32, %c0_i32_0 : i32, i32
  }
  func.func @transform_3(%arg0: i32) -> (i32, i32) {
    %c0_i32 = arith.constant 0 : i32
    %c0_i32_0 = arith.constant 0 : i32
    %c0_i32_1 = arith.constant 0 : i32
    return %c0_i32, %c0_i32_0 : i32, i32
  }
  func.func @transform_4(%arg0: i32) -> (i32, i32) {
    %c0_i32 = arith.constant 0 : i32
    %c0_i32_0 = arith.constant 0 : i32
    %c0_i32_1 = arith.constant 0 : i32
    return %c0_i32, %c0_i32_0 : i32, i32
  }
  func.func @transform_5(%arg0: i32) -> (i32, i32) {
    %c0_i32 = arith.constant 0 : i32
    %c0_i32_0 = arith.constant 0 : i32
    %c0_i32_1 = arith.constant 0 : i32
    return %c0_i32, %c0_i32_0 : i32, i32
  }
  func.func @transform_6(%arg0: i32) -> (i32, i32) {
    %c0_i32 = arith.constant 0 : i32
    %c0_i32_0 = arith.constant 0 : i32
    %c0_i32_1 = arith.constant 0 : i32
    return %c0_i32, %c0_i32_0 : i32, i32
  }
  func.func @transform_7(%arg0: i32) -> (i32, i32) {
    %c0_i32 = arith.constant 0 : i32
    %c0_i32_0 = arith.constant 0 : i32
    %c0_i32_1 = arith.constant 0 : i32
    return %c0_i32, %c0_i32_0 : i32, i32
  }
  func.func @transform_8(%arg0: i32) -> (i32, i32) {
    %c0_i32 = arith.constant 0 : i32
    %c0_i32_0 = arith.constant 0 : i32
    %c0_i32_1 = arith.constant 0 : i32
    return %c0_i32, %c0_i32_0 : i32, i32
  }
  func.func @transform_9(%arg0: i32) -> (i32, i32) {
    %c0_i32 = arith.constant 0 : i32
    %c0_i32_0 = arith.constant 0 : i32
    %c0_i32_1 = arith.constant 0 : i32
    return %c0_i32, %c0_i32_0 : i32, i32
  }
  func.func @transform_10(%arg0: i32) -> (i32, i32) {
    %c0_i32 = arith.constant 0 : i32
    %c0_i32_0 = arith.constant 0 : i32
    return %arg0, %c0_i32 : i32, i32
  }
  func.func @transform_11(%arg0: i32) -> (i32, i32) {
    %c0_i32 = arith.constant 0 : i32
    %c0_i32_0 = arith.constant 0 : i32
    return %arg0, %c0_i32 : i32, i32
  }
}

</mosaic_0001>

<bundles_post_ra>
// kernel: vae_forward.1
= control target key start
LH: loop header
LB: loop body
LE: loop exit
PB: predicated region body
PF: predicated region fallthrough
CT: control target
= control target key end

     0   :  { %17 = vsyncpa [#allocation3], 0  ;;  %s6281_s0 = inlined_call_operand.vmem [shape: f32[2,784], index: 0, kind: input, shape index: {}]   ;;  %s6282_s1 = inlined_call_operand.hbm [shape: f32[2,20], index: 1, kind: input, shape index: {}]   ;;  %s6283_s2 = inlined_call_operand.hbm [shape: bf16[784,400], index: 2, kind: input, shape index: {}]   ;;  %s6284_s3 = inlined_call_operand.hbm [shape: f32[1,400], index: 3, kind: input, shape index: {}]   ;;  %s6285_s4 = inlined_call_operand.vmem [shape: bf16[400,40], index: 4, kind: input, shape index: {}]   ;;  %s6286_s5 = inlined_call_operand.hbm [shape: f32[1,40], index: 5, kind: input, shape index: {}]   ;;  %s6287_s6 = inlined_call_operand.hbm [shape: bf16[20,400], index: 6, kind: input, shape index: {}]   ;;  %s6288_s7 = inlined_call_operand.vmem [shape: f32[1,400], index: 7, kind: input, shape index: {}]   ;;  %s6289_s8 = inlined_call_operand.hbm [shape: bf16[400,784], index: 8, kind: input, shape index: {}]   ;;  %s6290_s9 = inlined_call_operand.hbm [shape: f32[1,784], index: 9, kind: input, shape index: {}]   ;;  %s6291_s10 = inlined_call_operand.hbm [shape: f32[2,784], index: 10, kind: output, shape index: {0}]   ;;  %s6292_s11 = inlined_call_operand.vmem [shape: f32[2,40], index: 11, kind: output, shape index: {1}]  }
   0x1   :  { %18 = vsyncpa [#allocation6], 0 }
   0x2   :  { %19 = vsyncpa [#allocation9], 0 }
   0x3   :  { %20 = vsyncpa [#allocation12], 0  ;;  %s39_s19 = sshll.u32 %s6283_s2, 4  ;;  %s40_s19 = int_to_ptr.hbm [resolvable:$true] %s39_s19 }
   0x4   :  { %21 = vsyncpa [#allocation4], 0  ;;  %s5956_s20 = smov [#allocation5]   ;;  %s66_s24 = sshll.u32 %s6286_s5, 4  ;;  %s67_s24 = int_to_ptr.hbm [resolvable:$true] %s66_s24 }
   0x5   :  { %s41_s21 = sshll.u32 %s5956_s20, 4  ;;  %s5957_s25 = smov 256   ;;  %s42_s21 = int_to_ptr.vmem [resolvable:$true] %s41_s21 }
   0x6   :  { %s5958_s26 = smov 16   ;;  %s5959_s27 = smov [#allocation8]  }
   0x7   :  { %47 = dma.hbm_to_vmem [thread:$0]  %s40_s19, 25088, %s42_s21, [#allocation6], %s5957_s25, %s5957_s25, %s5958_s26  }
   0x8   :  { %s68_s28 = sshll.u32 %s5959_s27, 4  ;;  %s91_s30 = sshll.u32 %s6289_s8, 4  ;;  %s69_s28 = int_to_ptr.vmem [resolvable:$true] %s68_s28  ;;  %s92_s30 = int_to_ptr.hbm [resolvable:$true] %s91_s30 }
   0x9   :  { %71 = dma.hbm_to_vmem [thread:$0]  %s67_s24, 16, %s69_s28, [#allocation9]  }
   0xa   :  { %s5960_s12 = smov [#allocation11]   ;;  %s29_s15 = sshll.u32 %s6282_s1, 4  ;;  %s30_s15 = int_to_ptr.hbm [resolvable:$true] %s29_s15 }
   0xb   :  { %s93_s13 = sshll.u32 %s5960_s12, 4  ;;  %s5961_s16 = smov 448   ;;  %s94_s13 = int_to_ptr.vmem [resolvable:$true] %s93_s13 }
   0xc   :  { %s5962_s17 = smov 28   ;;  %s5963_s18 = smov [#allocation2]  }
   0xd   :  { %99 = dma.hbm_to_vmem [thread:$0]  %s92_s30, 22400, %s94_s13, [#allocation12], %s5961_s16, %s5961_s16, %s5962_s17  }
   0xe   :  { %s31_s19 = sshll.u32 %s5963_s18, 4  ;;  %s53_s8 = sshll.u32 %s6284_s3, 4  ;;  %s32_s19 = int_to_ptr.vmem [resolvable:$true] %s31_s19  ;;  %s54_s8 = int_to_ptr.hbm [resolvable:$true] %s53_s8 }
   0xf   :  { %34 = dma.hbm_to_vmem [thread:$0]  %s30_s15, 32, %s32_s19, [#allocation3]  }
  0x10   :  { %s76_s24 = sshll.u32 %s6287_s6, 4  ;;  %s5964_s27 = smov [#allocation7]   ;;  %s77_s24 = int_to_ptr.hbm [resolvable:$true] %s76_s24 }
  0x11   :  { %s55_s28 = sshll.u32 %s5964_s27, 4  ;;  %s5965_s1 = smov [#allocation10]   ;;  %s56_s28 = int_to_ptr.vmem [resolvable:$true] %s55_s28 }
  0x12   :  { %58 = dma.hbm_to_vmem [thread:$0]  %s54_s8, 64, %s56_s28, [#allocation6]  }
  0x13   :  { %s78_s29 = sshll.u32 %s5965_s1, 4  ;;  %s105_s12 = sshll.u32 %s6290_s9, 4  ;;  %s79_s29 = int_to_ptr.vmem [resolvable:$true] %s78_s29  ;;  %s106_s12 = int_to_ptr.hbm [resolvable:$true] %s105_s12 }
  0x14   :  { %84 = dma.hbm_to_vmem [thread:$0]  %s77_s24, 768, %s79_s29, [#allocation9], %s5957_s25, %s5957_s25, %s5958_s26  }
  0x15   :  { %s5966_s3 = smov [#allocation13]  }
  0x16   :  { %s107_s13 = sshll.u32 %s5966_s3, 4  ;;  %s108_s13 = int_to_ptr.vmem [resolvable:$true] %s107_s13 }
  0x17   :  { %110 = dma.hbm_to_vmem [thread:$0]  %s106_s12, 112, %s108_s13, [#allocation12]  }
  0x18   :  { %5946 = dma.done.wait [#allocation3], 32  }
  0x19   :  { %5947 = vsyncadd [#allocation3], 4294967264 }
  0x1a   :  { %5948 = dma.done.wait [#allocation6], 25152  }
  0x1b   :  { %5949 = vsyncadd [#allocation6], 4294942144 }
  0x1c   :  { %5950 = dma.done.wait [#allocation9], 784  }
  0x1d   :  { %5951 = vsyncadd [#allocation9], 4294966512 }
  0x1e   :  { %5952 = dma.done.wait [#allocation12], 22512  }
  0x1f   :  { %5953 = vsyncadd [#allocation12], 4294944784  ;;  %v3808_v0 = vld [vmem:[#allocation5 + $0xe0] sm:$0xf]  ;;  %v5340_v1 = vld [vmem:[#allocation5 + $0xec] sm:$0xf0] }
  0x20   :  { %v3936_v2 = vld [vmem:[#allocation5 + $0x1e0] sm:$0xf]  ;;  %v3809_v3 = vor.u32 %v5340_v1, %v3808_v0  ;;  %v5372_v4 = vld [vmem:[#allocation5 + $0x1ec] sm:$0xf0]  ;;  %vm1354_vm0 = vcmask 130048   ;;  %vm3668_vm1 = vcmask 320512  }
  0x21   :  { %v4064_v5 = vld [vmem:[#allocation5 + $0x2e0] sm:$0xf]  ;;  %v5404_v6 = vld [vmem:[#allocation5 + $0x2ec] sm:$0xf0]  ;;  %v3937_v7 = vor.u32 %v5372_v4, %v3936_v2  ;;  %s5967_s9 = smov 108   ;;  %vm2050_vm2 = vcmask 1041408  }
  0x22   :  { %v4065_v8 = vor.u32 %v5404_v6, %v4064_v5  ;;  %v4192_v9 = vld [vmem:[#allocation5 + $0x3e0] sm:$0xf]  ;;  %v5436_v10 = vld [vmem:[#allocation5 + $0x3ec] sm:$0xf0]  ;;  %1358 = vmatpush.bf16.msra.mxu0 %v3809_v3  ;;  %vm2046_vm3 = vcmask 162816   ;;  %vm3654_vm4 = vcmask 1045508  }
  0x23   :  { %v3792_v11 = vld [vmem:[#allocation5 + $0xc0] sm:$0xf]  ;;  %v4193_v12 = vor.u32 %v5436_v10, %v4192_v9  ;;  %v5336_v13 = vld [vmem:[#allocation5 + $0xcc] sm:$0xf0]  ;;  %1371 = vmatpush.bf16.msra.mxu1 %v3937_v7  ;;  %vm3656_vm5 = vcmask 1043456   ;;  %vm3663_vm6 = vcmask 1043458  }
  0x24   :  { %v3920_v14 = vld [vmem:[#allocation5 + $0x1c0] sm:$0xf]  ;;  %v5368_v15 = vld [vmem:[#allocation5 + $0x1cc] sm:$0xf0]  ;;  %1384 = vmatpush.bf16.msra.mxu2 %v4065_v8  ;;  %v3793_v16 = vor.u32 %v5336_v13, %v3792_v11  ;;  %vm3664_vm7 = vmor %vm3663_vm6, %vm2050_vm2  ;;  %vm3665_vm8 = vcmask 128004   ;;  %s3677_s14 = sshll.u32 %s6291_s10, 4  ;;  %s3678_s14 = int_to_ptr.hbm [resolvable:$true] %s3677_s14 }
  0x25   :  { %v3921_v17 = vor.u32 %v5368_v15, %v3920_v14  ;;  %v4048_v18 = vld [vmem:[#allocation5 + $0x2c0] sm:$0xf]  ;;  %v5400_v19 = vld [vmem:[#allocation5 + $0x2cc] sm:$0xf0]  ;;  %1397 = vmatpush.bf16.msra.mxu3 %v4193_v12  ;;  %vm3666_vm9 = vmor %vm3665_vm8, %vm3664_vm7 }
  0x26   :  { %v4176_v20 = vld [vmem:[#allocation5 + $0x3c0] sm:$0xf]  ;;  %v4049_v21 = vor.u32 %v5400_v19, %v4048_v18  ;;  %v5432_v22 = vld [vmem:[#allocation5 + $0x3cc] sm:$0xf0]  ;;  %1359 = vmatpush.bf16.msra.mxu0 %v3793_v16 }
  0x27   :  { %v3776_v23 = vld [vmem:[#allocation5 + $0xa0] sm:$0xf]  ;;  %v5332_v24 = vld [vmem:[#allocation5 + $0xac] sm:$0xf0]  ;;  %v4177_v25 = vor.u32 %v5432_v22, %v4176_v20  ;;  %1372 = vmatpush.bf16.msra.mxu1 %v3921_v17 }
  0x28   :  { %v3904_v26 = vld [vmem:[#allocation5 + $0x1a0] sm:$0xf]  ;;  %v5364_v27 = vld [vmem:[#allocation5 + $0x1ac] sm:$0xf0]  ;;  %v3777_v29 = vor.u32 %v5332_v24, %v3776_v23  ;;  %1385 = vmatpush.bf16.msra.mxu2 %v4049_v21  ;;  %v140_v21 = vld [vmem:[%s6281_s0] sm:$0xff] }
  0x29   :  { %v4032_v28 = vld [vmem:[#allocation5 + $0x2a0] sm:$0xf]  ;;  %v5396_v30 = vld [vmem:[#allocation5 + $0x2ac] sm:$0xf0]  ;;  %v3905_v33 = vor.u32 %v5364_v27, %v3904_v26  ;;  %1398 = vmatpush.bf16.msra.mxu3 %v4177_v25  ;;  %144 = vst [vmem:[#allocation1] ss:$4 sm:$0xff] %v140_v21 }
  0x2a   :  { %v4160_v31 = vld [vmem:[#allocation5 + $0x3a0] sm:$0xf]  ;;  %v5428_v32 = vld [vmem:[#allocation5 + $0x3ac] sm:$0xf0]  ;;  %v4033_v34 = vor.u32 %v5396_v30, %v4032_v28  ;;  %1360 = vmatpush.bf16.msra.mxu0 %v3777_v29  ;;  %v5358_v21 = vld [vmem:[#allocation5 + $0x184] sm:$0xf] }
  0x2b   :  { %v3760_v35 = vld [vmem:[#allocation5 + $0x80] sm:$0xf]  ;;  %v5328_v36 = vld [vmem:[#allocation5 + $0x8c] sm:$0xf0]  ;;  %v4161_v38 = vor.u32 %v5428_v32, %v4160_v31  ;;  %1373 = vmatpush.bf16.msra.mxu1 %v3905_v33 }
  0x2c   :  { %v3888_v37 = vld [vmem:[#allocation5 + $0x180] sm:$0xf]  ;;  %v5360_v39 = vld [vmem:[#allocation5 + $0x18c] sm:$0xf0]  ;;  %v3761_v44 = vor.u32 %v5328_v36, %v3760_v35  ;;  %1386 = vmatpush.bf16.msra.mxu2 %v4033_v34  ;;  %v5338_v34 = vld [vmem:[#allocation5 + $0xe4] sm:$0xf] }
  0x2d   :  { %v4016_v40 = vld [vmem:[#allocation5 + $0x280] sm:$0xf]  ;;  %v5392_v41 = vld [vmem:[#allocation5 + $0x28c] sm:$0xf0]  ;;  %v3889_v45 = vor.u32 %v5360_v39, %v3888_v37  ;;  %1399 = vmatpush.bf16.msra.mxu3 %v4161_v38  ;;  %v3810_v35 = vld [vmem:[#allocation5 + $0xf0] sm:$0xf0] }
  0x2e   :  { %v4144_v42 = vld [vmem:[#allocation5 + $0x380] sm:$0xf]  ;;  %v5424_v43 = vld [vmem:[#allocation5 + $0x38c] sm:$0xf0]  ;;  %v4017_v46 = vor.u32 %v5392_v41, %v4016_v40  ;;  %1361 = vmatpush.bf16.msra.mxu0 %v3761_v44  ;;  %v5370_v40 = vld [vmem:[#allocation5 + $0x1e4] sm:$0xf] }
  0x2f   :  { %v3744_v47 = vld [vmem:[#allocation5 + $0x60] sm:$0xf]  ;;  %v5324_v48 = vld [vmem:[#allocation5 + $0x6c] sm:$0xf0]  ;;  %v4145_v50 = vor.u32 %v5424_v43, %v4144_v42  ;;  %1374 = vmatpush.bf16.msra.mxu1 %v3889_v45  ;;  %v3938_v41 = vld [vmem:[#allocation5 + $0x1f0] sm:$0xf0] }
  0x30   :  { %v3872_v49 = vld [vmem:[#allocation5 + $0x160] sm:$0xf]  ;;  %v5356_v51 = vld [vmem:[#allocation5 + $0x16c] sm:$0xf0]  ;;  %v3745_v56 = vor.u32 %v5324_v48, %v3744_v47  ;;  %1387 = vmatpush.bf16.msra.mxu2 %v4017_v46  ;;  %v3813_v48 = vor.u32 %v5338_v34, %v3810_v35 }
  0x31   :  { %v4000_v52 = vld [vmem:[#allocation5 + $0x260] sm:$0xf]  ;;  %v5388_v53 = vld [vmem:[#allocation5 + $0x26c] sm:$0xf0]  ;;  %v3873_v57 = vor.u32 %v5356_v51, %v3872_v49  ;;  %1400 = vmatpush.bf16.msra.mxu3 %v4145_v50  ;;  %v5334_v50 = vld [vmem:[#allocation5 + $0xc4] sm:$0xf] }
  0x32   :  { %v4128_v54 = vld [vmem:[#allocation5 + $0x360] sm:$0xf]  ;;  %v5420_v55 = vld [vmem:[#allocation5 + $0x36c] sm:$0xf0]  ;;  %v4001_v58 = vor.u32 %v5388_v53, %v4000_v52  ;;  %1362 = vmatpush.bf16.msra.mxu0 %v3745_v56  ;;  %v3794_v51 = vld [vmem:[#allocation5 + $0xd0] sm:$0xf0] }
  0x33   :  { %v3728_v59 = vld [vmem:[#allocation5 + $0x40] sm:$0xf]  ;;  %v5320_v60 = vld [vmem:[#allocation5 + $0x4c] sm:$0xf0]  ;;  %v4129_v62 = vor.u32 %v5420_v55, %v4128_v54  ;;  %1375 = vmatpush.bf16.msra.mxu1 %v3873_v57 }
  0x34   :  { %v3856_v61 = vld [vmem:[#allocation5 + $0x140] sm:$0xf]  ;;  %v5352_v63 = vld [vmem:[#allocation5 + $0x14c] sm:$0xf0]  ;;  %v3729_v4 = vor.u32 %v5320_v60, %v3728_v59  ;;  %1388 = vmatpush.bf16.msra.mxu2 %v4001_v58  ;;  %v3941_v59 = vor.u32 %v5370_v40, %v3938_v41 }
  0x35   :  { %v3984_v0 = vld [vmem:[#allocation5 + $0x240] sm:$0xf]  ;;  %v5384_v1 = vld [vmem:[#allocation5 + $0x24c] sm:$0xf0]  ;;  %v3857_v6 = vor.u32 %v5352_v63, %v3856_v61  ;;  %1401 = vmatpush.bf16.msra.mxu3 %v4129_v62  ;;  %v5366_v61 = vld [vmem:[#allocation5 + $0x1c4] sm:$0xf] }
  0x36   :  { %v4112_v2 = vld [vmem:[#allocation5 + $0x340] sm:$0xf]  ;;  %v5416_v3 = vld [vmem:[#allocation5 + $0x34c] sm:$0xf0]  ;;  %v3985_v7 = vor.u32 %v5384_v1, %v3984_v0  ;;  %1363 = vmatpush.bf16.msra.mxu0 %v3729_v4  ;;  %v3922_v62 = vld [vmem:[#allocation5 + $0x1d0] sm:$0xf0]  ;;  %v3797_v1 = vor.u32 %v5334_v50, %v3794_v51 }
  0x37   :  { %v3712_v5 = vld [vmem:[#allocation5 + $0x20] sm:$0xf]  ;;  %v5316_v8 = vld [vmem:[#allocation5 + $0x2c] sm:$0xf0]  ;;  %v4113_v11 = vor.u32 %v5416_v3, %v4112_v2  ;;  %1376 = vmatpush.bf16.msra.mxu1 %v3857_v6  ;;  %v5330_v6 = vld [vmem:[#allocation5 + $0xa4] sm:$0xf] }
  0x38   :  { %v3840_v9 = vld [vmem:[#allocation5 + $0x120] sm:$0xf]  ;;  %v5348_v10 = vld [vmem:[#allocation5 + $0x12c] sm:$0xf0]  ;;  %v3713_v18 = vor.u32 %v5316_v8, %v3712_v5  ;;  %1389 = vmatpush.bf16.msra.mxu2 %v3985_v7  ;;  %v3778_v7 = vld [vmem:[#allocation5 + $0xb0] sm:$0xf0] }
  0x39   :  { %v3968_v12 = vld [vmem:[#allocation5 + $0x220] sm:$0xf]  ;;  %v5380_v13 = vld [vmem:[#allocation5 + $0x22c] sm:$0xf0]  ;;  %v3841_v22 = vor.u32 %v5348_v10, %v3840_v9  ;;  %1402 = vmatpush.bf16.msra.mxu3 %v4113_v11  ;;  %v3925_v9 = vor.u32 %v5366_v61, %v3922_v62  ;;  %v5362_v11 = vld [vmem:[#allocation5 + $0x1a4] sm:$0xf] }
  0x3a   :  { %v4096_v14 = vld [vmem:[#allocation5 + $0x320] sm:$0xf]  ;;  %v5412_v15 = vld [vmem:[#allocation5 + $0x32c] sm:$0xf0]  ;;  %v3969_v23 = vor.u32 %v5380_v13, %v3968_v12  ;;  %1364 = vmatpush.bf16.msra.mxu0 %v3713_v18  ;;  %v3906_v12 = vld [vmem:[#allocation5 + $0x1b0] sm:$0xf0] }
  0x3b   :  { %v3696_v16 = vld [vmem:[#allocation5] sm:$0xf]  ;;  %v5312_v17 = vld [vmem:[#allocation5 + $0xc] sm:$0xf0]  ;;  %v4097_v26 = vor.u32 %v5412_v15, %v4096_v14  ;;  %1377 = vmatpush.bf16.msra.mxu1 %v3841_v22  ;;  %v3781_v14 = vor.u32 %v5330_v6, %v3778_v7  ;;  %v3909_v22 = vor.u32 %v5362_v11, %v3906_v12  ;;  %v5346_v62 = vld [vmem:[#allocation5 + $0x124] sm:$0xf] }
  0x3c   :  { %v3824_v19 = vld [vmem:[#allocation5 + $0x100] sm:$0xf]  ;;  %v5344_v20 = vld [vmem:[#allocation5 + $0x10c] sm:$0xf0]  ;;  %v3697_v33 = vor.u32 %v5312_v17, %v3696_v16  ;;  %1390 = vmatpush.bf16.msra.mxu2 %v3969_v23  ;;  %v3698_v11 = vld [vmem:[#allocation5 + $0x10] sm:$0xf0] }
  0x3d   :  { %v3952_v24 = vld [vmem:[#allocation5 + $0x200] sm:$0xf]  ;;  %v5376_v25 = vld [vmem:[#allocation5 + $0x20c] sm:$0xf0]  ;;  %v3825_v37 = vor.u32 %v5344_v20, %v3824_v19  ;;  %1403 = vmatpush.bf16.msra.mxu3 %v4097_v26  ;;  %v5326_v19 = vld [vmem:[#allocation5 + $0x84] sm:$0xf] }
  0x3e   :  { %v4080_v27 = vld [vmem:[#allocation5 + $0x300] sm:$0xf]  ;;  %v5408_v28 = vld [vmem:[#allocation5 + $0x30c] sm:$0xf0]  ;;  %v3953_v38 = vor.u32 %v5376_v25, %v3952_v24  ;;  %1365 = vmatpush.bf16.msra.mxu0 %v3697_v33  ;;  %v3762_v20 = vld [vmem:[#allocation5 + $0x90] sm:$0xf0] }
  0x3f   :  { %v4320_v29 = vld [vmem:[#allocation5 + $0x4e0] sm:$0xf]  ;;  %v5468_v30 = vld [vmem:[#allocation5 + $0x4ec] sm:$0xf0]  ;;  %v4081_v42 = vor.u32 %v5408_v28, %v4080_v27  ;;  %1378 = vmatpush.bf16.msra.mxu1 %v3825_v37  ;;  %v3890_v24 = vld [vmem:[#allocation5 + $0x190] sm:$0xf0]  ;;  %v3765_v28 = vor.u32 %v5326_v19, %v3762_v20 }
  0x40   :  { %v4448_v31 = vld [vmem:[#allocation5 + $0x5e0] sm:$0xf]  ;;  %v5500_v32 = vld [vmem:[#allocation5 + $0x5ec] sm:$0xf0]  ;;  %v4321_v43 = vor.u32 %v5468_v30, %v4320_v29  ;;  %1391 = vmatpush.bf16.msra.mxu2 %v3953_v38  ;;  %v3746_v33 = vld [vmem:[#allocation5 + $0x70] sm:$0xf0]  ;;  %v3893_v34 = vor.u32 %v5358_v21, %v3890_v24 }
  0x41   :  { %v4464_v36 = vld [vmem:[#allocation5 + $0x600] sm:$0xf]  ;;  %v5504_v39 = vld [vmem:[#allocation5 + $0x60c] sm:$0xf0]  ;;  %v4449_v47 = vor.u32 %v5500_v32, %v4448_v31  ;;  %1404 = vmatpush.bf16.msra.mxu3 %v4081_v42  ;;  %v5322_v32 = vld [vmem:[#allocation5 + $0x64] sm:$0xf] }
  0x42   :  { %v4304_v44 = vld [vmem:[#allocation5 + $0x4c0] sm:$0xf]  ;;  %v5464_v45 = vld [vmem:[#allocation5 + $0x4cc] sm:$0xf0]  ;;  %v4465_v55 = vor.u32 %v5504_v39, %v4464_v36  ;;  %1410 = vmatpush.bf16.msrb.mxu0 %v4321_v43  ;;  %v5354_v36 = vld [vmem:[#allocation5 + $0x164] sm:$0xf]  ;;  %v3749_v39 = vor.u32 %v5322_v32, %v3746_v33 }
  0x43   :  { %v4432_v46 = vld [vmem:[#allocation5 + $0x5c0] sm:$0xf]  ;;  %v5496_v49 = vld [vmem:[#allocation5 + $0x5cc] sm:$0xf0]  ;;  %v4305_v60 = vor.u32 %v5464_v45, %v4304_v44  ;;  %1423 = vmatpush.bf16.msrb.mxu1 %v4449_v47  ;;  %v3874_v37 = vld [vmem:[#allocation5 + $0x170] sm:$0xf0] }
  0x44   :  { %v149_v52 = vld.sshfl [vmem:[#allocation1 + $0x10] sm:$0xff pattern:$0x73625140]  ;;  %v147_v53 = vld.sshfl [vmem:[#allocation1] sm:$0xff pattern:$0x73625140]  ;;  %v4433_v0 = vor.u32 %v5496_v49, %v4432_v46  ;;  %1443 = vmatpush.bf16.msrb.mxu2 %v4465_v55  ;;  %v3877_v47 = vor.u32 %v5354_v36, %v3874_v37 }
  0x45   :  { %v6059_v54 = vpack.c.bf16 %v149_v52, %v149_v52  ;;  %v6061_v56 = vpack.c.bf16 %v147_v53, %v147_v53  ;;  %v150_v57 = vld.sshfl [vmem:[#allocation1 + $0x18] sm:$0xff pattern:$0x73625140]  ;;  %v148_v58 = vld.sshfl [vmem:[#allocation1 + $0x8] sm:$0xff pattern:$0x73625140]  ;;  %1449 = vmatpush.bf16.msrb.mxu3 %v3813_v48 }
  0x46   :  { %v6063_v63 = vpack.c.bf16 %v150_v57, %v150_v57  ;;  %v4288_v2 = vld [vmem:[#allocation5 + $0x4a0] sm:$0xf]  ;;  %v5460_v3 = vld [vmem:[#allocation5 + $0x4ac] sm:$0xf0]  ;;  %v6067_v8 = vpack.c.bf16 %v148_v58, %v148_v58  ;;  %1411 = vmatpush.bf16.msrb.mxu0 %v4305_v60  ;;  %v5318_v44 = vld [vmem:[#allocation5 + $0x44] sm:$0xf] }
  0x47   :  { %v4416_v4 = vld [vmem:[#allocation5 + $0x5a0] sm:$0xf]  ;;  %1392 = vmatmul.bf16.vlgmr.msra.gmra.mxu2 %v6059_v54  ;;  %1366 = vmatmul.bf16.vlgmr.msra.gmra.mxu0 %v6061_v56  ;;  %v5492_v5 = vld [vmem:[#allocation5 + $0x5ac] sm:$0xf0]  ;;  %v4289_v10 = vor.u32 %v5460_v3, %v4288_v2  ;;  %v3730_v45 = vld [vmem:[#allocation5 + $0x50] sm:$0xf0] }
  0x48   :  { %1405 = vmatmul.bf16.vlgmr.msra.gmra.mxu3 %v6063_v63  ;;  %1462 = vmatpush.bf16.msra.mxu2 %v3941_v59  ;;  %v4417_v13 = vor.u32 %v5492_v5, %v4416_v4  ;;  %v4272_v15 = vld [vmem:[#allocation5 + $0x480] sm:$0xf]  ;;  %v5456_v16 = vld [vmem:[#allocation5 + $0x48c] sm:$0xf0]  ;;  %v5350_v46 = vld [vmem:[#allocation5 + $0x144] sm:$0xf]  ;;  %v3733_v53 = vor.u32 %v5318_v44, %v3730_v45 }
  0x49   :  { %1424 = vmatpush.bf16.msrb.mxu1 %v4433_v0  ;;  %1450 = vmatpush.bf16.msrb.mxu3 %v3797_v1  ;;  %v4400_v17 = vld [vmem:[#allocation5 + $0x580] sm:$0xf]  ;;  %v5488_v18 = vld [vmem:[#allocation5 + $0x58c] sm:$0xf0]  ;;  %v4273_v23 = vor.u32 %v5456_v16, %v4272_v15  ;;  %v3858_v49 = vld [vmem:[#allocation5 + $0x150] sm:$0xf0] }
  0x4a   :  { %1379 = vmatmul.bf16.vlgmr.msra.gmra.mxu1 %v6067_v8  ;;  %1412 = vmatpush.bf16.msrb.mxu0 %v4289_v10  ;;  %v4256_v25 = vld [vmem:[#allocation5 + $0x460] sm:$0xf]  ;;  %v5452_v26 = vld [vmem:[#allocation5 + $0x46c] sm:$0xf0]  ;;  %v4401_v27 = vor.u32 %v5488_v18, %v4400_v17  ;;  %v5314_v59 = vld [vmem:[#allocation5 + $0x24] sm:$0xf]  ;;  %v3861_v1 = vor.u32 %v5350_v46, %v3858_v49 }
  0x4b   :  { %v4384_v29 = vld [vmem:[#allocation5 + $0x560] sm:$0xf]  ;;  %v5484_v30 = vld [vmem:[#allocation5 + $0x56c] sm:$0xf0]  ;;  %v4257_v35 = vor.u32 %v5452_v26, %v4256_v25  ;;  %v3714_v60 = vld [vmem:[#allocation5 + $0x30] sm:$0xf0] }
  0x4c   :  { %1463 = vmatpush.bf16.msra.mxu2 %v3925_v9  ;;  %v141_v31 = vld [vmem:[%s6281_s0 + $0x8] sm:$0x3f]  ;;  %v4385_v38 = vor.u32 %v5484_v30, %v4384_v29  ;;  %v5448_v41 = vld [vmem:[#allocation5 + $0x44c] sm:$0xf0]  ;;  %v3842_v0 = vld [vmem:[#allocation5 + $0x130] sm:$0xf0]  ;;  %v3717_v7 = vor.u32 %v5314_v59, %v3714_v60 }
  0x4d   :  { %1425 = vmatpush.bf16.msrb.mxu1 %v4417_v13  ;;  %1451 = vmatpush.bf16.msrb.mxu3 %v3781_v14  ;;  %146 = vst [vmem:[#allocation1 + $0x20] ss:$4 sm:$0xff] %v141_v31  ;;  %v4240_v40 = vld [vmem:[#allocation5 + $0x440] sm:$0xf]  ;;  %v5480_v43 = vld [vmem:[#allocation5 + $0x54c] sm:$0xf0]  ;;  %v3845_v18 = vor.u32 %v5346_v62, %v3842_v0 }
  0x4e   :  { %1413 = vmatpush.bf16.msrb.mxu0 %v4273_v23  ;;  %v4368_v42 = vld [vmem:[#allocation5 + $0x540] sm:$0xf]  ;;  %v4241_v48 = vor.u32 %v5448_v41, %v4240_v40  ;;  %v5444_v51 = vld [vmem:[#allocation5 + $0x42c] sm:$0xf0]  ;;  %v5310_v10 = vld [vmem:[#allocation5 + $0x4] sm:$0xf] }
  0x4f   :  { %v4224_v50 = vld [vmem:[#allocation5 + $0x420] sm:$0xf]  ;;  %v4369_v52 = vor.u32 %v5480_v43, %v4368_v42  ;;  %v5476_v58 = vld [vmem:[#allocation5 + $0x52c] sm:$0xf0]  ;;  %v5402_v12 = vld [vmem:[#allocation5 + $0x2e4] sm:$0xf]  ;;  %v3701_v23 = vor.u32 %v5310_v10, %v3698_v11 }
  0x50   :  { %1464 = vmatpush.bf16.msra.mxu2 %v3909_v22  ;;  %v4352_v55 = vld [vmem:[#allocation5 + $0x520] sm:$0xf]  ;;  %v4225_v2 = vor.u32 %v5444_v51, %v4224_v50  ;;  %v5440_v4 = vld [vmem:[#allocation5 + $0x40c] sm:$0xf0]  ;;  %v4066_v13 = vld [vmem:[#allocation5 + $0x2f0] sm:$0xf0] }
  0x51   :  { %1426 = vmatpush.bf16.msrb.mxu1 %v4401_v27  ;;  %1452 = vmatpush.bf16.msrb.mxu3 %v3765_v28  ;;  %v4208_v3 = vld [vmem:[#allocation5 + $0x400] sm:$0xf]  ;;  %v4353_v6 = vor.u32 %v5476_v58, %v4352_v55  ;;  %v5472_v9 = vld [vmem:[#allocation5 + $0x50c] sm:$0xf0]  ;;  %v5434_v14 = vld [vmem:[#allocation5 + $0x3e4] sm:$0xf]  ;;  %v4069_v26 = vor.u32 %v5402_v12, %v4066_v13 }
  0x52   :  { %1414 = vmatpush.bf16.msrb.mxu0 %v4257_v35  ;;  %v4336_v5 = vld [vmem:[#allocation5 + $0x500] sm:$0xf]  ;;  %v4194_v15 = vld [vmem:[#allocation5 + $0x3f0] sm:$0xf0]  ;;  %v5466_v16 = vld [vmem:[#allocation5 + $0x4e4] sm:$0xf]  ;;  %v4209_v19 = vor.u32 %v5440_v4, %v4208_v3 }
  0x53   :  { %v4322_v17 = vld [vmem:[#allocation5 + $0x4f0] sm:$0xf0]  ;;  %v5342_v21 = vld [vmem:[#allocation5 + $0x104] sm:$0xf]  ;;  %v4337_v22 = vor.u32 %v5472_v9, %v4336_v5  ;;  %v4197_v27 = vor.u32 %v5434_v14, %v4194_v15 }
  0x54   :  { %1465 = vmatpush.bf16.msra.mxu2 %v3893_v34  ;;  %v153_v57 = vld.sshfl [vmem:[#allocation1 + $0x30] sm:$0xff pattern:$0x73625140]  ;;  %v151_v20 = vld.sshfl [vmem:[#allocation1 + $0x20] sm:$0xff pattern:$0x73625140]  ;;  %v4325_v31 = vor.u32 %v5466_v16, %v4322_v17 }
  0x55   :  { %1427 = vmatpush.bf16.msrb.mxu1 %v4385_v38  ;;  %1453 = vmatpush.bf16.msrb.mxu3 %v3749_v39  ;;  %v6074_v61 = vpack.c.bf16 %v153_v57, %v153_v57  ;;  %v3826_v24 = vld [vmem:[#allocation5 + $0x110] sm:$0xf0]  ;;  %v152_v25 = vld.sshfl [vmem:[#allocation1 + $0x28] sm:$0xff pattern:$0x73625140]  ;;  %v6078_v32 = vpack.c.bf16 %v151_v20, %v151_v20 }
  0x56   :  { %1415 = vmatpush.bf16.msrb.mxu0 %v4241_v48  ;;  %v5498_v28 = vld [vmem:[#allocation5 + $0x5e4] sm:$0xf]  ;;  %v4450_v29 = vld [vmem:[#allocation5 + $0x5f0] sm:$0xf0]  ;;  %v3829_v36 = vor.u32 %v5342_v21, %v3826_v24  ;;  %v6080_v37 = vpack.c.bf16 %v152_v25, %v152_v25 }
  0x57   :  { %4478 = vmatmul.msk.bf16.vlgmr.msrb.gmra.mxu2 %vm1354_vm0, %v6074_v61  ;;  %v5398_v30 = vld [vmem:[#allocation5 + $0x2c4] sm:$0xf]  ;;  %v4050_v33 = vld [vmem:[#allocation5 + $0x2d0] sm:$0xf0]  ;;  %v4453_v40 = vor.u32 %v5498_v28, %v4450_v29 }
  0x58   :  { %1466 = vmatpush.bf16.msra.mxu2 %v3877_v47  ;;  %v5430_v34 = vld [vmem:[#allocation5 + $0x3c4] sm:$0xf]  ;;  %v4178_v35 = vld [vmem:[#allocation5 + $0x3d0] sm:$0xf0]  ;;  %v4053_v41 = vor.u32 %v5398_v30, %v4050_v33 }
  0x59   :  { %1428 = vmatpush.bf16.msrb.mxu1 %v4369_v52  ;;  %1454 = vmatpush.bf16.msrb.mxu3 %v3733_v53  ;;  %v5462_v38 = vld [vmem:[#allocation5 + $0x4c4] sm:$0xf]  ;;  %v4306_v39 = vld [vmem:[#allocation5 + $0x4d0] sm:$0xf0]  ;;  %v4181_v42 = vor.u32 %v5430_v34, %v4178_v35 }
  0x5a   :  { %1416 = vmatpush.bf16.msrb.mxu0 %v4225_v2  ;;  %v5494_v43 = vld [vmem:[#allocation5 + $0x5c4] sm:$0xf]  ;;  %v4434_v44 = vld [vmem:[#allocation5 + $0x5d0] sm:$0xf0]  ;;  %v4309_v46 = vor.u32 %v5462_v38, %v4306_v39 }
  0x5b   :  { %v5394_v45 = vld [vmem:[#allocation5 + $0x2a4] sm:$0xf]  ;;  %v4034_v47 = vld [vmem:[#allocation5 + $0x2b0] sm:$0xf0]  ;;  %v4437_v52 = vor.u32 %v5494_v43, %v4434_v44 }
  0x5c   :  { %1467 = vmatpush.bf16.msra.mxu2 %v3861_v1  ;;  %v5426_v48 = vld [vmem:[#allocation5 + $0x3a4] sm:$0xf]  ;;  %v4162_v49 = vld [vmem:[#allocation5 + $0x3b0] sm:$0xf0]  ;;  %v4037_v53 = vor.u32 %v5394_v45, %v4034_v47 }
  0x5d   :  { %1429 = vmatpush.bf16.msrb.mxu1 %v4353_v6  ;;  %1455 = vmatpush.bf16.msrb.mxu3 %v3717_v7  ;;  %v5458_v50 = vld [vmem:[#allocation5 + $0x4a4] sm:$0xf]  ;;  %v4290_v51 = vld [vmem:[#allocation5 + $0x4b0] sm:$0xf0]  ;;  %v4165_v55 = vor.u32 %v5426_v48, %v4162_v49 }
  0x5e   :  { %1417 = vmatpush.bf16.msrb.mxu0 %v4209_v19  ;;  %v5490_v57 = vld [vmem:[#allocation5 + $0x5a4] sm:$0xf]  ;;  %v4418_v58 = vld [vmem:[#allocation5 + $0x5b0] sm:$0xf0]  ;;  %v4293_v60 = vor.u32 %v5458_v50, %v4290_v51 }
  0x5f   :  { %v5390_v59 = vld [vmem:[#allocation5 + $0x284] sm:$0xf]  ;;  %v4018_v62 = vld [vmem:[#allocation5 + $0x290] sm:$0xf0]  ;;  %v4421_v4 = vor.u32 %v5490_v57, %v4418_v58  ;;  %v3816_v57 = vld [vmem:[#allocation5 + $0xe8] sm:$0xf] }
  0x60   :  { %1468 = vmatpush.bf16.msra.mxu2 %v3845_v18  ;;  %v5422_v0 = vld [vmem:[#allocation5 + $0x384] sm:$0xf]  ;;  %v4146_v1 = vld [vmem:[#allocation5 + $0x390] sm:$0xf0]  ;;  %v4021_v5 = vor.u32 %v5390_v59, %v4018_v62  ;;  %v5341_v58 = vld [vmem:[#allocation5 + $0xf4] sm:$0xf0] }
  0x61   :  { %1430 = vmatpush.bf16.msrb.mxu1 %v4337_v22  ;;  %1456 = vmatpush.bf16.msrb.mxu3 %v3701_v23  ;;  %v5454_v2 = vld [vmem:[#allocation5 + $0x484] sm:$0xf]  ;;  %v4274_v3 = vld [vmem:[#allocation5 + $0x490] sm:$0xf0]  ;;  %v4149_v6 = vor.u32 %v5422_v0, %v4146_v1  ;;  %v3944_v59 = vld [vmem:[#allocation5 + $0x1e8] sm:$0xf] }
  0x62   :  { %1475 = vmatpush.bf16.msra.mxu0 %v4069_v26  ;;  %v5486_v7 = vld [vmem:[#allocation5 + $0x584] sm:$0xf]  ;;  %v4402_v9 = vld [vmem:[#allocation5 + $0x590] sm:$0xf0]  ;;  %v4277_v11 = vor.u32 %v5454_v2, %v4274_v3  ;;  %v5373_v62 = vld [vmem:[#allocation5 + $0x1f4] sm:$0xf0] }
  0x63   :  { %1418 = vmatmul.bf16.vlgmr.msrb.gmra.mxu0 %v6078_v32  ;;  %v5386_v10 = vld [vmem:[#allocation5 + $0x264] sm:$0xf]  ;;  %v4002_v12 = vld [vmem:[#allocation5 + $0x270] sm:$0xf0]  ;;  %v4405_v17 = vor.u32 %v5486_v7, %v4402_v9  ;;  %v3817_v9 = vor.u32 %v5341_v58, %v3816_v57  ;;  %v5325_v57 = vld [vmem:[#allocation5 + $0x74] sm:$0xf0] }
  0x64   :  { %1469 = vmatpush.bf16.msra.mxu2 %v3829_v36  ;;  %1431 = vmatmul.bf16.vlgmr.msrb.gmra.mxu1 %v6080_v37  ;;  %v5418_v13 = vld [vmem:[#allocation5 + $0x364] sm:$0xf]  ;;  %v4130_v14 = vld [vmem:[#allocation5 + $0x370] sm:$0xf0]  ;;  %v4005_v18 = vor.u32 %v5386_v10, %v4002_v12  ;;  %v5405_v10 = vld [vmem:[#allocation5 + $0x2f4] sm:$0xf0] }
  0x65   :  { %1488 = vmatpush.bf16.msra.mxu1 %v4197_v27  ;;  %1501 = vmatpush.bf16.msra.mxu3 %v4325_v31  ;;  %v5450_v15 = vld [vmem:[#allocation5 + $0x464] sm:$0xf]  ;;  %v4258_v16 = vld [vmem:[#allocation5 + $0x470] sm:$0xf0]  ;;  %v4133_v19 = vor.u32 %v5418_v13, %v4130_v14  ;;  %v5437_v12 = vld [vmem:[#allocation5 + $0x3f4] sm:$0xf0]  ;;  %v3945_v13 = vor.u32 %v5373_v62, %v3944_v59 }
  0x66   :  { %1457 = vmatmul.bf16.vlgmr.msrb.gmra.mxu3 %v6061_v56  ;;  %1476 = vmatpush.bf16.msra.mxu0 %v4053_v41  ;;  %v5482_v20 = vld [vmem:[#allocation5 + $0x564] sm:$0xf]  ;;  %v4386_v21 = vld [vmem:[#allocation5 + $0x570] sm:$0xf0]  ;;  %v4261_v23 = vor.u32 %v5450_v15, %v4258_v16  ;;  %v3800_v15 = vld [vmem:[#allocation5 + $0xc8] sm:$0xf] }
  0x67   :  { %1470 = vmatmul.bf16.vlgmr.msra.gmra.mxu2 %v6067_v8  ;;  %v5382_v22 = vld [vmem:[#allocation5 + $0x244] sm:$0xf]  ;;  %v3986_v24 = vld [vmem:[#allocation5 + $0x250] sm:$0xf0]  ;;  %v4389_v29 = vor.u32 %v5482_v20, %v4386_v21  ;;  %v5337_v16 = vld [vmem:[#allocation5 + $0xd4] sm:$0xf0] }
  0x68   :  { %1514 = vmatpush.bf16.msrb.mxu2 %v4453_v40  ;;  %v5414_v25 = vld [vmem:[#allocation5 + $0x344] sm:$0xf]  ;;  %v4114_v26 = vld [vmem:[#allocation5 + $0x350] sm:$0xf0]  ;;  %v3989_v30 = vor.u32 %v5382_v22, %v3986_v24  ;;  %v4056_v22 = vld [vmem:[#allocation5 + $0x2c8] sm:$0xf] }
  0x69   :  { %1489 = vmatpush.bf16.msra.mxu1 %v4181_v42  ;;  %1502 = vmatpush.bf16.msra.mxu3 %v4309_v46  ;;  %v5446_v27 = vld [vmem:[#allocation5 + $0x444] sm:$0xf]  ;;  %v4242_v28 = vld [vmem:[#allocation5 + $0x450] sm:$0xf0]  ;;  %v4117_v31 = vor.u32 %v5414_v25, %v4114_v26  ;;  %v5401_v24 = vld [vmem:[#allocation5 + $0x2d4] sm:$0xf0] }
  0x6a   :  { %1477 = vmatpush.bf16.msra.mxu0 %v4037_v53  ;;  %v5478_v33 = vld [vmem:[#allocation5 + $0x544] sm:$0xf]  ;;  %v4370_v34 = vld [vmem:[#allocation5 + $0x550] sm:$0xf0]  ;;  %v4245_v36 = vor.u32 %v5446_v27, %v4242_v28  ;;  %v4184_v25 = vld [vmem:[#allocation5 + $0x3c8] sm:$0xf] }
  0x6b   :  { %v5378_v35 = vld [vmem:[#allocation5 + $0x224] sm:$0xf]  ;;  %v3970_v38 = vld [vmem:[#allocation5 + $0x230] sm:$0xf0]  ;;  %v4373_v43 = vor.u32 %v5478_v33, %v4370_v34  ;;  %v5433_v26 = vld [vmem:[#allocation5 + $0x3d4] sm:$0xf0]  ;;  %v4057_v33 = vor.u32 %v5401_v24, %v4056_v22 }
  0x6c   :  { %1515 = vmatpush.bf16.msrb.mxu2 %v4437_v52  ;;  %v5410_v39 = vld [vmem:[#allocation5 + $0x324] sm:$0xf]  ;;  %v4098_v40 = vld [vmem:[#allocation5 + $0x330] sm:$0xf0]  ;;  %v3973_v46 = vor.u32 %v5378_v35, %v3970_v38  ;;  %v3784_v28 = vld [vmem:[#allocation5 + $0xa8] sm:$0xf]  ;;  %v4185_v34 = vor.u32 %v5433_v26, %v4184_v25 }
  0x6d   :  { %1490 = vmatpush.bf16.msra.mxu1 %v4165_v55  ;;  %1503 = vmatpush.bf16.msra.mxu3 %v4293_v60  ;;  %v5442_v41 = vld [vmem:[#allocation5 + $0x424] sm:$0xf]  ;;  %v4226_v42 = vld [vmem:[#allocation5 + $0x430] sm:$0xf0]  ;;  %v4101_v47 = vor.u32 %v5410_v39, %v4098_v40  ;;  %v4040_v35 = vld [vmem:[#allocation5 + $0x2a8] sm:$0xf] }
  0x6e   :  { %1478 = vmatpush.bf16.msra.mxu0 %v4021_v5  ;;  %v5474_v44 = vld [vmem:[#allocation5 + $0x524] sm:$0xf]  ;;  %v4354_v45 = vld [vmem:[#allocation5 + $0x530] sm:$0xf0]  ;;  %v4229_v51 = vor.u32 %v5442_v41, %v4226_v42  ;;  %v5397_v38 = vld [vmem:[#allocation5 + $0x2b4] sm:$0xf0] }
  0x6f   :  { %v5374_v48 = vld [vmem:[#allocation5 + $0x204] sm:$0xf]  ;;  %v3954_v49 = vld [vmem:[#allocation5 + $0x210] sm:$0xf0]  ;;  %v4357_v60 = vor.u32 %v5474_v44, %v4354_v45  ;;  %v4168_v39 = vld [vmem:[#allocation5 + $0x3a8] sm:$0xf] }
  0x70   :  { %1516 = vmatpush.bf16.msrb.mxu2 %v4421_v4  ;;  %v5406_v50 = vld [vmem:[#allocation5 + $0x304] sm:$0xf]  ;;  %v4082_v52 = vld [vmem:[#allocation5 + $0x310] sm:$0xf0]  ;;  %v3957_v2 = vor.u32 %v5374_v48, %v3954_v49  ;;  %v5429_v40 = vld [vmem:[#allocation5 + $0x3b4] sm:$0xf0] }
  0x71   :  { %1491 = vmatpush.bf16.msra.mxu1 %v4149_v6  ;;  %1504 = vmatpush.bf16.msra.mxu3 %v4277_v11  ;;  %v5438_v53 = vld [vmem:[#allocation5 + $0x404] sm:$0xf]  ;;  %v4210_v55 = vld [vmem:[#allocation5 + $0x410] sm:$0xf0]  ;;  %v4085_v3 = vor.u32 %v5406_v50, %v4082_v52  ;;  %v4072_v6 = vld [vmem:[#allocation5 + $0x2e8] sm:$0xf] }
  0x72   :  { %1479 = vmatpush.bf16.msra.mxu0 %v4005_v18  ;;  %v5502_v0 = vld [vmem:[#allocation5 + $0x604] sm:$0xf]  ;;  %v4466_v1 = vld [vmem:[#allocation5 + $0x610] sm:$0xf0]  ;;  %v4213_v7 = vor.u32 %v5438_v53, %v4210_v55  ;;  %v4200_v11 = vld [vmem:[#allocation5 + $0x3e8] sm:$0xf]  ;;  %v4073_v20 = vor.u32 %v5405_v10, %v4072_v6 }
  0x73   :  { %v5470_v4 = vld [vmem:[#allocation5 + $0x504] sm:$0xf]  ;;  %v4338_v5 = vld [vmem:[#allocation5 + $0x510] sm:$0xf0]  ;;  %v4469_v14 = vor.u32 %v5502_v0, %v4466_v1  ;;  %v3928_v18 = vld [vmem:[#allocation5 + $0x1c8] sm:$0xf]  ;;  %v4201_v21 = vor.u32 %v5437_v12, %v4200_v11 }
  0x74   :  { %1517 = vmatpush.bf16.msrb.mxu2 %v4405_v17  ;;  %v4341_v17 = vor.u32 %v5470_v4, %v4338_v5  ;;  %v3768_v42 = vld [vmem:[#allocation5 + $0x88] sm:$0xf]  ;;  %v5361_v45 = vld [vmem:[#allocation5 + $0x194] sm:$0xf0] }
  0x75   :  { %1492 = vmatpush.bf16.msra.mxu1 %v4133_v19  ;;  %1505 = vmatpush.bf16.msra.mxu3 %v4261_v23  ;;  %v5369_v19 = vld [vmem:[#allocation5 + $0x1d4] sm:$0xf0]  ;;  %v3801_v23 = vor.u32 %v5337_v16, %v3800_v15  ;;  %v3896_v44 = vld [vmem:[#allocation5 + $0x188] sm:$0xf] }
  0x76   :  { %1480 = vmatpush.bf16.msra.mxu0 %v3989_v30  ;;  %v3929_v27 = vor.u32 %v5369_v19, %v3928_v18  ;;  %v3912_v30 = vld [vmem:[#allocation5 + $0x1a8] sm:$0xf]  ;;  %v5393_v50 = vld [vmem:[#allocation5 + $0x294] sm:$0xf0]  ;;  %v3897_v53 = vor.u32 %v5361_v45, %v3896_v44 }
  0x77   :  { %v4024_v48 = vld [vmem:[#allocation5 + $0x288] sm:$0xf]  ;;  %v5425_v52 = vld [vmem:[#allocation5 + $0x394] sm:$0xf0] }
  0x78   :  { %1518 = vmatpush.bf16.msrb.mxu2 %v4389_v29  ;;  %v5333_v29 = vld [vmem:[#allocation5 + $0xb4] sm:$0xf0]  ;;  %v3752_v55 = vld [vmem:[#allocation5 + $0x68] sm:$0xf] }
  0x79   :  { %1493 = vmatpush.bf16.msra.mxu1 %v4117_v31  ;;  %1506 = vmatpush.bf16.msra.mxu3 %v4245_v36  ;;  %v5365_v31 = vld [vmem:[#allocation5 + $0x1b4] sm:$0xf0]  ;;  %v3785_v36 = vor.u32 %v5333_v29, %v3784_v28  ;;  %v3880_v58 = vld [vmem:[#allocation5 + $0x168] sm:$0xf]  ;;  %v3753_v1 = vor.u32 %v5325_v57, %v3752_v55 }
  0x7a   :  { %1481 = vmatpush.bf16.msra.mxu0 %v3973_v46  ;;  %v3913_v41 = vor.u32 %v5365_v31, %v3912_v30  ;;  %v4041_v46 = vor.u32 %v5397_v38, %v4040_v35  ;;  %v5357_v59 = vld [vmem:[#allocation5 + $0x174] sm:$0xf0]  ;;  %v4008_v0 = vld [vmem:[#allocation5 + $0x268] sm:$0xf] }
  0x7b   :  { %v5421_v4 = vld [vmem:[#allocation5 + $0x374] sm:$0xf0]  ;;  %v3881_v5 = vor.u32 %v5357_v59, %v3880_v58  ;;  %v3736_v6 = vld [vmem:[#allocation5 + $0x48] sm:$0xf] }
  0x7c   :  { %1519 = vmatpush.bf16.msrb.mxu2 %v4373_v43  ;;  %v5329_v43 = vld [vmem:[#allocation5 + $0x94] sm:$0xf0]  ;;  %v4120_v16 = vld [vmem:[#allocation5 + $0x348] sm:$0xf] }
  0x7d   :  { %1494 = vmatpush.bf16.msra.mxu1 %v4101_v47  ;;  %1507 = vmatpush.bf16.msra.mxu3 %v4229_v51  ;;  %v4169_v47 = vor.u32 %v5429_v40, %v4168_v39  ;;  %v3769_v49 = vor.u32 %v5329_v43, %v3768_v42  ;;  %v4152_v51 = vld [vmem:[#allocation5 + $0x388] sm:$0xf]  ;;  %v5353_v10 = vld [vmem:[#allocation5 + $0x154] sm:$0xf0] }
  0x7e   :  { %1482 = vmatpush.bf16.msra.mxu0 %v3957_v2  ;;  %v4153_v62 = vor.u32 %v5425_v52, %v4152_v51  ;;  %v5389_v2 = vld [vmem:[#allocation5 + $0x274] sm:$0xf0]  ;;  %v3720_v19 = vld [vmem:[#allocation5 + $0x28] sm:$0xf]  ;;  %v3818_v51 = vld [vmem:[#allocation5 + $0xf8] sm:$0xf0] }
  0x7f   :  { %v4009_v11 = vor.u32 %v5389_v2, %v4008_v0  ;;  %v5385_v15 = vld [vmem:[#allocation5 + $0x254] sm:$0xf0]  ;;  %v3976_v25 = vld [vmem:[#allocation5 + $0x228] sm:$0xf] }
  0x80   :  { %1520 = vmatpush.bf16.msrb.mxu2 %v4357_v60  ;;  %v4025_v60 = vor.u32 %v5393_v50, %v4024_v48  ;;  %v5349_v22 = vld [vmem:[#allocation5 + $0x134] sm:$0xf0]  ;;  %v4104_v28 = vld [vmem:[#allocation5 + $0x328] sm:$0xf]  ;;  %v5339_v48 = vld [vmem:[#allocation5 + $0xec] sm:$0xf] }
  0x81   :  { %1495 = vmatpush.bf16.msra.mxu1 %v4085_v3  ;;  %1508 = vmatpush.bf16.msra.mxu3 %v4213_v7  ;;  %v4136_v3 = vld [vmem:[#allocation5 + $0x368] sm:$0xf]  ;;  %v5321_v7 = vld [vmem:[#allocation5 + $0x54] sm:$0xf0] }
  0x82   :  { %1534 = vmatpush.bf16.msrb.mxu0 %v4469_v14  ;;  %v4137_v12 = vor.u32 %v5421_v4, %v4136_v3  ;;  %v3737_v14 = vor.u32 %v5321_v7, %v3736_v6  ;;  %v5381_v26 = vld [vmem:[#allocation5 + $0x234] sm:$0xf0]  ;;  %v3704_v30 = vld [vmem:[#allocation5 + $0x8] sm:$0xf]  ;;  %v5371_v3 = vld [vmem:[#allocation5 + $0x1ec] sm:$0xf] }
  0x83   :  { %1483 = vmatmul.bf16.vlgmr.msra.gmra.mxu0 %v6059_v54  ;;  %v5413_v29 = vld [vmem:[#allocation5 + $0x334] sm:$0xf0]  ;;  %v4456_v39 = vld [vmem:[#allocation5 + $0x5e8] sm:$0xf]  ;;  %v3977_v40 = vor.u32 %v5381_v26, %v3976_v25  ;;  %v3946_v4 = vld [vmem:[#allocation5 + $0x1f8] sm:$0xf0] }
  0x84   :  { %1521 = vmatpush.bf16.msrb.mxu2 %v4341_v17  ;;  %1509 = vmatmul.bf16.vlgmr.msra.gmra.mxu3 %v6078_v32  ;;  %v5417_v17 = vld [vmem:[#allocation5 + $0x354] sm:$0xf0]  ;;  %v3960_v43 = vld [vmem:[#allocation5 + $0x208] sm:$0xf]  ;;  %v5335_v6 = vld [vmem:[#allocation5 + $0xcc] sm:$0xf] }
  0x85   :  { %1540 = vmatpush.bf16.msrb.mxu1 %v3817_v9  ;;  %1553 = vmatpush.bf16.msrb.mxu3 %v3945_v13  ;;  %v3864_v9 = vld [vmem:[#allocation5 + $0x148] sm:$0xf]  ;;  %v4121_v24 = vor.u32 %v5417_v17, %v4120_v16  ;;  %v5345_v35 = vld [vmem:[#allocation5 + $0x114] sm:$0xf0]  ;;  %v3802_v7 = vld [vmem:[#allocation5 + $0xd8] sm:$0xf0] }
  0x86   :  { %1566 = vmatpush.bf16.msra.mxu0 %v4073_v20  ;;  %1496 = vmatmul.bf16.vlgmr.msra.gmra.mxu1 %v6063_v63  ;;  %v3992_v13 = vld [vmem:[#allocation5 + $0x248] sm:$0xf]  ;;  %v3865_v18 = vor.u32 %v5353_v10, %v3864_v9  ;;  %v5317_v20 = vld [vmem:[#allocation5 + $0x34] sm:$0xf0]  ;;  %v5367_v16 = vld [vmem:[#allocation5 + $0x1cc] sm:$0xf] }
  0x87   :  { %1522 = vmatmul.bf16.vlgmr.msrb.gmra.mxu2 %v6080_v37  ;;  %v5469_v38 = vld [vmem:[#allocation5 + $0x4f4] sm:$0xf0]  ;;  %v4472_v52 = vld [vmem:[#allocation5 + $0x608] sm:$0xf]  ;;  %v3930_v17 = vld [vmem:[#allocation5 + $0x1d8] sm:$0xf0] }
  0x88   :  { %1579 = vmatpush.bf16.msra.mxu2 %v4201_v21  ;;  %v3848_v21 = vld [vmem:[#allocation5 + $0x128] sm:$0xf]  ;;  %v5501_v42 = vld [vmem:[#allocation5 + $0x5f4] sm:$0xf0] }
  0x89   :  { %1541 = vmatpush.bf16.msrb.mxu1 %v3801_v23  ;;  %1554 = vmatpush.bf16.msrb.mxu3 %v3929_v27  ;;  %v3993_v23 = vor.u32 %v5385_v15, %v3992_v13  ;;  %v3721_v27 = vor.u32 %v5317_v20, %v3720_v19  ;;  %v3849_v31 = vor.u32 %v5349_v22, %v3848_v21  ;;  %v5377_v44 = vld [vmem:[#allocation5 + $0x214] sm:$0xf0]  ;;  %v4312_v57 = vld [vmem:[#allocation5 + $0x4c8] sm:$0xf]  ;;  %v5331_v19 = vld [vmem:[#allocation5 + $0xac] sm:$0xf] }
  0x8a   :  { %1567 = vmatpush.bf16.msra.mxu0 %v4057_v33  ;;  %v5313_v33 = vld [vmem:[#allocation5 + $0x14] sm:$0xf0]  ;;  %v4457_v55 = vor.u32 %v5501_v42, %v4456_v39  ;;  %v3961_v59 = vor.u32 %v5377_v44, %v3960_v43  ;;  %v4296_v10 = vld [vmem:[#allocation5 + $0x4a8] sm:$0xf]  ;;  %v3805_v15 = vor.u32 %v5335_v6, %v3802_v7  ;;  %v3786_v20 = vld [vmem:[#allocation5 + $0xb8] sm:$0xf0] }
  0x8b   :  { %v3705_v45 = vor.u32 %v5313_v33, %v3704_v30  ;;  %v5465_v58 = vld [vmem:[#allocation5 + $0x4d4] sm:$0xf0]  ;;  %v4424_v13 = vld [vmem:[#allocation5 + $0x5a8] sm:$0xf]  ;;  %v3770_v33 = vld [vmem:[#allocation5 + $0x98] sm:$0xf0] }
  0x8c   :  { %1580 = vmatpush.bf16.msra.mxu2 %v4185_v34  ;;  %v3832_v34 = vld [vmem:[#allocation5 + $0x108] sm:$0xf]  ;;  %v5497_v0 = vld [vmem:[#allocation5 + $0x5d4] sm:$0xf0]  ;;  %v5359_v42 = vld [vmem:[#allocation5 + $0x18c] sm:$0xf] }
  0x8d   :  { %1542 = vmatpush.bf16.msrb.mxu1 %v3785_v36  ;;  %1555 = vmatpush.bf16.msrb.mxu3 %v3913_v41  ;;  %v4328_v36 = vld [vmem:[#allocation5 + $0x4e8] sm:$0xf]  ;;  %v4105_v41 = vor.u32 %v5413_v29, %v4104_v28  ;;  %v5489_v26 = vld [vmem:[#allocation5 + $0x594] sm:$0xf0]  ;;  %v5363_v28 = vld [vmem:[#allocation5 + $0x1ac] sm:$0xf] }
  0x8e   :  { %1568 = vmatpush.bf16.msra.mxu0 %v4041_v46  ;;  %v4088_v46 = vld [vmem:[#allocation5 + $0x308] sm:$0xf]  ;;  %v4329_v50 = vor.u32 %v5469_v38, %v4328_v36  ;;  %v3914_v29 = vld [vmem:[#allocation5 + $0x1b8] sm:$0xf0]  ;;  %v5453_v36 = vld [vmem:[#allocation5 + $0x474] sm:$0xf0] }
  0x8f   :  { %v4280_v22 = vld [vmem:[#allocation5 + $0x488] sm:$0xf]  ;;  %v3917_v38 = vor.u32 %v5363_v28, %v3914_v29  ;;  %v3898_v43 = vld [vmem:[#allocation5 + $0x198] sm:$0xf0]  ;;  %v5351_v6 = vld [vmem:[#allocation5 + $0x14c] sm:$0xf] }
  0x90   :  { %1581 = vmatpush.bf16.msra.mxu2 %v4169_v47  ;;  %v5409_v47 = vld [vmem:[#allocation5 + $0x314] sm:$0xf0]  ;;  %v4408_v25 = vld [vmem:[#allocation5 + $0x588] sm:$0xf]  ;;  %v3866_v7 = vld [vmem:[#allocation5 + $0x158] sm:$0xf0] }
  0x91   :  { %1543 = vmatpush.bf16.msrb.mxu1 %v3769_v49  ;;  %1556 = vmatpush.bf16.msrb.mxu3 %v3897_v53  ;;  %v3833_v49 = vor.u32 %v5345_v35, %v3832_v34  ;;  %v5505_v53 = vld [vmem:[#allocation5 + $0x614] sm:$0xf0]  ;;  %v4409_v34 = vor.u32 %v5489_v26, %v4408_v25  ;;  %v4264_v35 = vld [vmem:[#allocation5 + $0x468] sm:$0xf]  ;;  %v5311_v26 = vld [vmem:[#allocation5 + $0xc] sm:$0xf] }
  0x92   :  { %1569 = vmatpush.bf16.msra.mxu0 %v4025_v60  ;;  %v4089_v60 = vor.u32 %v5409_v47, %v4088_v46  ;;  %v4473_v2 = vor.u32 %v5505_v53, %v4472_v52  ;;  %v4392_v39 = vld [vmem:[#allocation5 + $0x568] sm:$0xf]  ;;  %v4265_v44 = vor.u32 %v5453_v36, %v4264_v35  ;;  %v3754_v46 = vld [vmem:[#allocation5 + $0x78] sm:$0xf0]  ;;  %v5481_v52 = vld [vmem:[#allocation5 + $0x554] sm:$0xf0] }
  0x93   :  { %4479 = vmatmul.msk.bf16.vlgmr.msrb.gmra.mxu0 %vm1354_vm0, %v6074_v61  ;;  %v5399_v35 = vld [vmem:[#allocation5 + $0x2cc] sm:$0xf]  ;;  %v4058_v36 = vld [vmem:[#allocation5 + $0x2d8] sm:$0xf0] }
  0x94   :  { %1582 = vmatpush.bf16.msra.mxu2 %v4153_v62  ;;  %v4440_v62 = vld [vmem:[#allocation5 + $0x5c8] sm:$0xf] }
  0x95   :  { %1544 = vmatpush.bf16.msrb.mxu1 %v3753_v1  ;;  %1557 = vmatpush.bf16.msrb.mxu3 %v3881_v5  ;;  %v3821_v1 = vor.u32 %v5339_v48, %v3818_v51  ;;  %v4313_v5 = vor.u32 %v5465_v58, %v4312_v57  ;;  %v4441_v9 = vor.u32 %v5497_v0, %v4440_v62  ;;  %v4248_v48 = vld [vmem:[#allocation5 + $0x448] sm:$0xf]  ;;  %v3882_v57 = vld [vmem:[#allocation5 + $0x178] sm:$0xf0] }
  0x96   :  { %1570 = vmatpush.bf16.msra.mxu0 %v4009_v11  ;;  %v5461_v11 = vld [vmem:[#allocation5 + $0x4b4] sm:$0xf0]  ;;  %v4376_v51 = vld [vmem:[#allocation5 + $0x548] sm:$0xf] }
  0x97   :  { %v4377_v62 = vor.u32 %v5481_v52, %v4376_v51  ;;  %v4232_v0 = vld [vmem:[#allocation5 + $0x428] sm:$0xf]  ;;  %v5395_v51 = vld [vmem:[#allocation5 + $0x2ac] sm:$0xf]  ;;  %v4042_v52 = vld [vmem:[#allocation5 + $0x2b8] sm:$0xf0] }
  0x98   :  { %1583 = vmatpush.bf16.msra.mxu2 %v4137_v12  ;;  %v3949_v12 = vor.u32 %v5371_v3, %v3946_v4  ;;  %v4360_v3 = vld [vmem:[#allocation5 + $0x528] sm:$0xf]  ;;  %v5477_v4 = vld [vmem:[#allocation5 + $0x534] sm:$0xf0] }
  0x99   :  { %1545 = vmatpush.bf16.msrb.mxu1 %v3737_v14  ;;  %1558 = vmatpush.bf16.msrb.mxu3 %v3865_v18  ;;  %v5493_v14 = vld [vmem:[#allocation5 + $0x5b4] sm:$0xf0]  ;;  %v4297_v18 = vor.u32 %v5461_v11, %v4296_v10  ;;  %v5315_v10 = vld [vmem:[#allocation5 + $0x2c] sm:$0xf]  ;;  %v3722_v11 = vld [vmem:[#allocation5 + $0x38] sm:$0xf0] }
  0x9a   :  { %1571 = vmatpush.bf16.msra.mxu0 %v3993_v23  ;;  %v4425_v21 = vor.u32 %v5493_v14, %v4424_v13  ;;  %v5457_v23 = vld [vmem:[#allocation5 + $0x494] sm:$0xf0]  ;;  %v4361_v13 = vor.u32 %v5477_v4, %v4360_v3  ;;  %v5391_v3 = vld [vmem:[#allocation5 + $0x28c] sm:$0xf]  ;;  %v4026_v4 = vld [vmem:[#allocation5 + $0x298] sm:$0xf0] }
  0x9b   :  { %v4281_v30 = vor.u32 %v5457_v23, %v4280_v22  ;;  %v5441_v14 = vld [vmem:[#allocation5 + $0x414] sm:$0xf0]  ;;  %v4202_v22 = vld [vmem:[#allocation5 + $0x3f8] sm:$0xf0]  ;;  %v5347_v23 = vld [vmem:[#allocation5 + $0x12c] sm:$0xf] }
  0x9c   :  { %1584 = vmatpush.bf16.msra.mxu2 %v4121_v24  ;;  %v3933_v24 = vor.u32 %v5367_v16, %v3930_v17  ;;  %v5473_v16 = vld [vmem:[#allocation5 + $0x514] sm:$0xf0]  ;;  %v3869_v17 = vor.u32 %v5351_v6, %v3866_v7  ;;  %v5423_v6 = vld [vmem:[#allocation5 + $0x38c] sm:$0xf]  ;;  %v4154_v7 = vld [vmem:[#allocation5 + $0x398] sm:$0xf0] }
  0x9d   :  { %1546 = vmatpush.bf16.msrb.mxu1 %v3721_v27  ;;  %1559 = vmatpush.bf16.msrb.mxu3 %v3849_v31  ;;  %v3789_v27 = vor.u32 %v5331_v19, %v3786_v20  ;;  %v5327_v31 = vld [vmem:[#allocation5 + $0x8c] sm:$0xf]  ;;  %v4074_v19 = vld [vmem:[#allocation5 + $0x2f8] sm:$0xf0] }
  0x9e   :  { %1572 = vmatpush.bf16.msra.mxu0 %v3977_v40  ;;  %v5485_v40 = vld [vmem:[#allocation5 + $0x574] sm:$0xf0]  ;;  %v5435_v20 = vld [vmem:[#allocation5 + $0x3ec] sm:$0xf] }
  0x9f   :  { %v4393_v47 = vor.u32 %v5485_v40, %v4392_v39  ;;  %v4186_v40 = vld [vmem:[#allocation5 + $0x3d8] sm:$0xf0] }
  0xa0   :  { %1585 = vmatpush.bf16.msra.mxu2 %v4105_v41  ;;  %v3773_v41 = vor.u32 %v5327_v31, %v3770_v33  ;;  %v4330_v31 = vld [vmem:[#allocation5 + $0x4f8] sm:$0xf0]  ;;  %v4205_v33 = vor.u32 %v5435_v20, %v4202_v22  ;;  %v5487_v22 = vld [vmem:[#allocation5 + $0x58c] sm:$0xf] }
  0xa1   :  { %1547 = vmatpush.bf16.msrb.mxu1 %v3705_v45  ;;  %1560 = vmatpush.bf16.msrb.mxu3 %v3833_v49  ;;  %v5323_v45 = vld [vmem:[#allocation5 + $0x6c] sm:$0xf]  ;;  %v5449_v49 = vld [vmem:[#allocation5 + $0x454] sm:$0xf0]  ;;  %v4138_v20 = vld [vmem:[#allocation5 + $0x378] sm:$0xf0] }
  0xa2   :  { %1573 = vmatpush.bf16.msra.mxu0 %v3961_v59  ;;  %v3757_v53 = vor.u32 %v5323_v45, %v3754_v46  ;;  %v4249_v58 = vor.u32 %v5449_v49, %v4248_v48  ;;  %v5319_v59 = vld [vmem:[#allocation5 + $0x4c] sm:$0xf]  ;;  %v4458_v45 = vld [vmem:[#allocation5 + $0x5f8] sm:$0xf0]  ;;  %v4061_v46 = vor.u32 %v5399_v35, %v4058_v36 }
  0xa3   :  { %v4314_v48 = vld [vmem:[#allocation5 + $0x4d8] sm:$0xf0]  ;;  %v5483_v35 = vld [vmem:[#allocation5 + $0x56c] sm:$0xf] }
  0xa4   :  { %1586 = vmatpush.bf16.msra.mxu2 %v4089_v60  ;;  %1561 = vmatmul.bf16.vlgmr.msrb.gmra.mxu3 %v6067_v8  ;;  %v3738_v60 = vld [vmem:[#allocation5 + $0x58] sm:$0xf0] }
  0xa5   :  { %1592 = vmatpush.bf16.msra.mxu1 %v4329_v50  ;;  %1605 = vmatpush.bf16.msra.mxu3 %v4457_v55  ;;  %v3901_v50 = vor.u32 %v5359_v42, %v3898_v43  ;;  %v5355_v55 = vld [vmem:[#allocation5 + $0x16c] sm:$0xf]  ;;  %v3834_v42 = vld [vmem:[#allocation5 + $0x118] sm:$0xf0] }
  0xa6   :  { %1625 = vmatpush.bf16.msrb.mxu0 %v4473_v2  ;;  %1548 = vmatmul.bf16.vlgmr.msrb.gmra.mxu1 %v6061_v56  ;;  %v3885_v2 = vor.u32 %v5355_v55, %v3882_v57  ;;  %v5427_v55 = vld [vmem:[#allocation5 + $0x3ac] sm:$0xf]  ;;  %v4170_v57 = vld [vmem:[#allocation5 + $0x3b8] sm:$0xf0] }
  0xa7   :  { %1574 = vmatmul.bf16.vlgmr.msra.gmra.mxu0 %v6059_v54  ;;  %1587 = vmatmul.bf16.vlgmr.msra.gmra.mxu2 %v6063_v63  ;;  %v4394_v36 = vld [vmem:[#allocation5 + $0x578] sm:$0xf0] }
  0xa8   :  { %1631 = vmatpush.bf16.msrb.mxu2 %v3821_v1  ;;  %v5445_v1 = vld [vmem:[#allocation5 + $0x434] sm:$0xf0] }
  0xa9   :  { %1593 = vmatpush.bf16.msra.mxu1 %v4313_v5  ;;  %1606 = vmatpush.bf16.msra.mxu3 %v4441_v9  ;;  %v3741_v5 = vor.u32 %v5319_v59, %v3738_v60  ;;  %v4233_v9 = vor.u32 %v5445_v1, %v4232_v0  ;;  %v5495_v59 = vld [vmem:[#allocation5 + $0x5cc] sm:$0xf]  ;;  %v4442_v60 = vld [vmem:[#allocation5 + $0x5d8] sm:$0xf0] }
  0xaa   :  { %1644 = vmatpush.bf16.msra.mxu0 %v3949_v12  ;;  %v4216_v12 = vld [vmem:[#allocation5 + $0x408] sm:$0xf]  ;;  %v5459_v0 = vld [vmem:[#allocation5 + $0x4ac] sm:$0xf]  ;;  %v4298_v1 = vld [vmem:[#allocation5 + $0x4b8] sm:$0xf0] }
  0xab   :  { %v4217_v25 = vor.u32 %v5441_v14, %v4216_v12  ;;  %v4029_v12 = vor.u32 %v5391_v3, %v4026_v4  ;;  %v4282_v14 = vld [vmem:[#allocation5 + $0x498] sm:$0xf0]  ;;  %v5503_v4 = vld [vmem:[#allocation5 + $0x60c] sm:$0xf] }
  0xac   :  { %1632 = vmatpush.bf16.msrb.mxu2 %v3805_v15  ;;  %v4344_v15 = vld [vmem:[#allocation5 + $0x508] sm:$0xf] }
  0xad   :  { %1594 = vmatpush.bf16.msra.mxu1 %v4297_v18  ;;  %1607 = vmatpush.bf16.msra.mxu3 %v4425_v21  ;;  %v5403_v18 = vld [vmem:[#allocation5 + $0x2ec] sm:$0xf]  ;;  %v3725_v21 = vor.u32 %v5315_v10, %v3722_v11  ;;  %v4345_v28 = vor.u32 %v5473_v16, %v4344_v15  ;;  %v4426_v11 = vld [vmem:[#allocation5 + $0x5b8] sm:$0xf0]  ;;  %v4157_v15 = vor.u32 %v5423_v6, %v4154_v7 }
  0xae   :  { %1645 = vmatpush.bf16.msra.mxu0 %v3933_v24  ;;  %v3850_v24 = vld [vmem:[#allocation5 + $0x138] sm:$0xf0]  ;;  %v4077_v29 = vor.u32 %v5403_v18, %v4074_v19  ;;  %v5491_v10 = vld [vmem:[#allocation5 + $0x5ac] sm:$0xf] }
  0xaf   :  { %v5387_v16 = vld [vmem:[#allocation5 + $0x26c] sm:$0xf]  ;;  %v4429_v18 = vor.u32 %v5491_v10, %v4426_v11 }
  0xb0   :  { %1633 = vmatpush.bf16.msrb.mxu2 %v3789_v27  ;;  %v3706_v27 = vld [vmem:[#allocation5 + $0x18] sm:$0xf0]  ;;  %v5419_v19 = vld [vmem:[#allocation5 + $0x36c] sm:$0xf] }
  0xb1   :  { %1595 = vmatpush.bf16.msra.mxu1 %v4281_v30  ;;  %1608 = vmatpush.bf16.msra.mxu3 %v4409_v34  ;;  %v5467_v30 = vld [vmem:[#allocation5 + $0x4ec] sm:$0xf]  ;;  %v3853_v34 = vor.u32 %v5347_v23, %v3850_v24  ;;  %v3709_v39 = vor.u32 %v5311_v26, %v3706_v27  ;;  %v4410_v23 = vld [vmem:[#allocation5 + $0x598] sm:$0xf0] }
  0xb2   :  { %1646 = vmatpush.bf16.msra.mxu0 %v3917_v38  ;;  %v5431_v38 = vld [vmem:[#allocation5 + $0x3cc] sm:$0xf]  ;;  %v4333_v43 = vor.u32 %v5467_v30, %v4330_v31  ;;  %v4266_v26 = vld [vmem:[#allocation5 + $0x478] sm:$0xf0] }
  0xb3   :  { %v4189_v49 = vor.u32 %v5431_v38, %v4186_v40  ;;  %v5383_v27 = vld [vmem:[#allocation5 + $0x24c] sm:$0xf] }
  0xb4   :  { %1634 = vmatpush.bf16.msrb.mxu2 %v3773_v41  ;;  %v5343_v41 = vld [vmem:[#allocation5 + $0x10c] sm:$0xf] }
  0xb5   :  { %1596 = vmatpush.bf16.msra.mxu1 %v4265_v44  ;;  %1609 = vmatpush.bf16.msra.mxu3 %v4393_v47  ;;  %v5499_v44 = vld [vmem:[#allocation5 + $0x5ec] sm:$0xf] }
  0xb6   :  { %1647 = vmatpush.bf16.msra.mxu0 %v3901_v50  ;;  %v5463_v47 = vld [vmem:[#allocation5 + $0x4cc] sm:$0xf]  ;;  %v3837_v50 = vor.u32 %v5343_v41, %v3834_v42  ;;  %v4250_v41 = vld [vmem:[#allocation5 + $0x458] sm:$0xf0] }
  0xb7   :  { %4480 = vmatmul.msk.bf16.vlgmr.msrb.gmra.mxu0 %vm1354_vm0, %v6074_v61  ;;  %v5415_v31 = vld [vmem:[#allocation5 + $0x34c] sm:$0xf] }
  0xb8   :  { %1635 = vmatpush.bf16.msrb.mxu2 %v3757_v53  ;;  %v4461_v53 = vor.u32 %v5499_v44, %v4458_v45  ;;  %v5447_v40 = vld [vmem:[#allocation5 + $0x44c] sm:$0xf]  ;;  %v3978_v45 = vld [vmem:[#allocation5 + $0x238] sm:$0xf0] }
  0xb9   :  { %1597 = vmatpush.bf16.msra.mxu1 %v4249_v58  ;;  %1610 = vmatpush.bf16.msra.mxu3 %v4377_v62  ;;  %v4317_v58 = vor.u32 %v5463_v47, %v4314_v48  ;;  %v4045_v62 = vor.u32 %v5395_v51, %v4042_v52  ;;  %v5379_v44 = vld [vmem:[#allocation5 + $0x22c] sm:$0xf]  ;;  %v4106_v48 = vld [vmem:[#allocation5 + $0x338] sm:$0xf0] }
  0xba   :  { %1648 = vmatpush.bf16.msra.mxu0 %v3885_v2  ;;  %v4173_v2 = vor.u32 %v5427_v55, %v4170_v57  ;;  %v5411_v47 = vld [vmem:[#allocation5 + $0x32c] sm:$0xf]  ;;  %v4378_v52 = vld [vmem:[#allocation5 + $0x558] sm:$0xf0]  ;;  %v3981_v55 = vor.u32 %v5379_v44, %v3978_v45 }
  0xbb   :  { %v5479_v51 = vld [vmem:[#allocation5 + $0x54c] sm:$0xf]  ;;  %v5507_v44 = vld [vmem:[%s6285_s4 + $0x8] sm:$0xff] }
  0xbc   :  { %1636 = vmatpush.bf16.msrb.mxu2 %v3741_v5  ;;  %v4445_v5 = vor.u32 %v5495_v59, %v4442_v60  ;;  %v5443_v57 = vld [vmem:[#allocation5 + $0x42c] sm:$0xf]  ;;  %v4109_v59 = vor.u32 %v5411_v47, %v4106_v48  ;;  %v5506_v47 = vld [vmem:[%s6285_s4] sm:$0xff] }
  0xbd   :  { %1598 = vmatpush.bf16.msra.mxu1 %v4233_v9  ;;  %1611 = vmatpush.bf16.msra.mxu3 %v4361_v13  ;;  %v4301_v9 = vor.u32 %v5459_v0, %v4298_v1  ;;  %v5455_v13 = vld [vmem:[#allocation5 + $0x48c] sm:$0xf]  ;;  %v4381_v1 = vor.u32 %v5479_v51, %v4378_v52 }
  0xbe   :  { %1649 = vmatpush.bf16.msra.mxu0 %v3869_v17  ;;  %v4010_v17 = vld [vmem:[#allocation5 + $0x278] sm:$0xf0]  ;;  %v5375_v60 = vld [vmem:[#allocation5 + $0x20c] sm:$0xf] }
  0xbf   :  { %v4013_v24 = vor.u32 %v5387_v16, %v4010_v17  ;;  %v5407_v0 = vld [vmem:[#allocation5 + $0x30c] sm:$0xf] }
  0xc0   :  { %1637 = vmatpush.bf16.msrb.mxu2 %v3725_v21  ;;  %v5475_v7 = vld [vmem:[#allocation5 + $0x52c] sm:$0xf] }
  0xc1   :  { %1599 = vmatpush.bf16.msra.mxu1 %v4217_v25  ;;  %1612 = vmatpush.bf16.msra.mxu3 %v4345_v28  ;;  %v5451_v25 = vld [vmem:[#allocation5 + $0x46c] sm:$0xf]  ;;  %v3994_v28 = vld [vmem:[#allocation5 + $0x258] sm:$0xf0] }
  0xc2   :  { %1650 = vmatpush.bf16.msra.mxu0 %v3853_v34  ;;  %v4269_v34 = vor.u32 %v5451_v25, %v4266_v26  ;;  %v5512_v25 = vld [vmem:[%s6285_s4 + $0x30] sm:$0xff] }
  0xc4   :  { %1600 = vmatmul.bf16.vlgmr.msra.gmra.mxu1 %v6078_v32  ;;  %1638 = vmatpush.bf16.msrb.mxu2 %v3709_v39  ;;  %v6102_v21 = vpop.f32.mrf.mxu0  ;;  %v3997_v39 = vor.u32 %v5383_v27, %v3994_v28  ;;  %v5511_v27 = vld [vmem:[%s6285_s4 + $0x28] sm:$0xff] }
  0xc5   :  { %1657 = vmatpush.bf16.msrb.mxu1 %v4077_v29  ;;  %1670 = vmatpush.bf16.msrb.mxu3 %v4205_v33  ;;  %v4413_v29 = vor.u32 %v5487_v22, %v4410_v23  ;;  %v4122_v33 = vld [vmem:[#allocation5 + $0x358] sm:$0xf0]  ;;  %v5521_v23 = vld [vmem:[%s6285_s4 + $0x78] sm:$0xff] }
  0xc6   :  { %1613 = vmatmul.bf16.vlgmr.msra.gmra.mxu3 %v6080_v37  ;;  %1651 = vmatpush.bf16.msra.mxu0 %v3837_v50  ;;  %v4125_v42 = vor.u32 %v5415_v31, %v4122_v33  ;;  %v4253_v50 = vor.u32 %v5447_v40, %v4250_v41  ;;  %v4346_v22 = vld [vmem:[#allocation5 + $0x518] sm:$0xf0] }
  0xc7   :  { %1639 = vmatmul.bf16.vlgmr.msrb.gmra.mxu2 %v6061_v56  ;;  %v4285_v56 = vor.u32 %v5455_v13, %v4282_v14  ;;  %v6104_v30 = vpop.f32.mrf.mxu1  ;;  %v4218_v13 = vld [vmem:[#allocation5 + $0x418] sm:$0xf0] }
  0xc8   :  { %1683 = vmatpush.bf16.msra.mxu2 %v4333_v43  ;;  %v5518_v31 = vld [vmem:[%s6285_s4 + $0x60] sm:$0xff] }
  0xc9   :  { %1658 = vmatpush.bf16.msrb.mxu1 %v4061_v46  ;;  %1671 = vmatpush.bf16.msrb.mxu3 %v4189_v49  ;;  %v4397_v46 = vor.u32 %v5483_v35, %v4394_v36  ;;  %v5517_v36 = vld [vmem:[%s6285_s4 + $0x58] sm:$0xff] }
  0xca   :  { %1696 = vmatpush.bf16.msrb.mxu0 %v4461_v53  ;;  %v6106_v38 = vpop.f32.mrf.mxu2  ;;  %v6110_v53 = vld [vmem:[#allocation7] sm:$0xf] }
  0xcb   :  { %1652 = vmatmul.bf16.vlgmr.msra.gmra.mxu0 %v6067_v8  ;;  %v4141_v8 = vor.u32 %v5419_v19, %v4138_v20  ;;  %v6108_v43 = vpop.f32.mrf.mxu3  ;;  %v366_v14 = vperm.slane %v6110_v53, 0  ;;  %v367_v51 = vperm.slane %v6110_v53, 1 }
  0xcc   :  { %1684 = vmatpush.bf16.msra.mxu2 %v4317_v58  ;;  %v1369_v49 = vpop.f32.mrf.mxu0  ;;  %v4234_v58 = vld [vmem:[#allocation5 + $0x438] sm:$0xf0] }
  0xcd   :  { %1659 = vmatpush.bf16.msrb.mxu1 %v4045_v62  ;;  %1672 = vmatpush.bf16.msrb.mxu3 %v4173_v2  ;;  %v3962_v62 = vld [vmem:[#allocation5 + $0x218] sm:$0xf0]  ;;  %v4237_v6 = vor.u32 %v5443_v57, %v4234_v58 }
  0xce   :  { %1697 = vmatpush.bf16.msrb.mxu0 %v4445_v5  ;;  %v4090_v2 = vld [vmem:[#allocation5 + $0x318] sm:$0xf0]  ;;  %v3965_v11 = vor.u32 %v5375_v60, %v3962_v62 }
  0xcf   :  { %v1382_v3 = vpop.f32.mrf.mxu1  ;;  %v4474_v5 = vld [vmem:[#allocation5 + $0x618] sm:$0xf0] }
  0xd0   :  { %1685 = vmatpush.bf16.msra.mxu2 %v4301_v9  ;;  %v4362_v9 = vld [vmem:[#allocation5 + $0x538] sm:$0xf0]  ;;  %v4477_v16 = vor.u32 %v5503_v4, %v4474_v5  ;;  %v5529_v3 = vld [vmem:[%s6285_s4 + $0xb8] sm:$0xff] }
  0xd1   :  { %1660 = vmatpush.bf16.msrb.mxu1 %v4029_v12  ;;  %1673 = vmatpush.bf16.msrb.mxu3 %v4157_v15  ;;  %v5439_v12 = vld [vmem:[#allocation5 + $0x40c] sm:$0xf]  ;;  %v4093_v15 = vor.u32 %v5407_v0, %v4090_v2  ;;  %v4365_v19 = vor.u32 %v5475_v7, %v4362_v9 }
  0xd2   :  { %1698 = vmatpush.bf16.msrb.mxu0 %v4429_v18  ;;  %v1395_v10 = vpop.f32.mrf.mxu2  ;;  %v5513_v18 = vld [vmem:[%s6285_s4 + $0x38] sm:$0xff]  ;;  %v4221_v20 = vor.u32 %v5439_v12, %v4218_v13 }
  0xd3   :  { %v1408_v17 = vpop.f32.mrf.mxu3  ;;  %v5527_v10 = vld [vmem:[%s6285_s4 + $0xa8] sm:$0xff] }
  0xd4   :  { %1686 = vmatpush.bf16.msra.mxu2 %v4285_v56  ;;  %v5471_v56 = vld [vmem:[#allocation5 + $0x50c] sm:$0xf] }
  0xd5   :  { %1661 = vmatpush.bf16.msrb.mxu1 %v4013_v24  ;;  %1674 = vmatpush.bf16.msrb.mxu3 %v4141_v8  ;;  %v1368_v24 = vadd.f32 %v6102_v21, %v366_v14  ;;  %v4349_v26 = vor.u32 %v5471_v56, %v4346_v22  ;;  %v5520_v8 = vld [vmem:[%s6285_s4 + $0x70] sm:$0xff] }
  0xd6   :  { %1699 = vmatpush.bf16.msrb.mxu0 %v4413_v29 }
  0xd7   :  { %v1381_v21 = vadd.f32 %v6104_v30, %v1368_v24 }
  0xd8   :  { %1687 = vmatpush.bf16.msra.mxu2 %v4269_v34  ;;  %v5509_v34 = vld [vmem:[%s6285_s4 + $0x18] sm:$0xff] }
  0xd9   :  { %1662 = vmatpush.bf16.msrb.mxu1 %v3997_v39  ;;  %1675 = vmatpush.bf16.msrb.mxu3 %v4125_v42  ;;  %v1394_v28 = vadd.f32 %v6106_v38, %v1381_v21  ;;  %v5508_v38 = vld [vmem:[%s6285_s4 + $0x10] sm:$0xff] }
  0xda   :  { %1700 = vmatpush.bf16.msrb.mxu0 %v4397_v46  ;;  %v5515_v46 = vld [vmem:[%s6285_s4 + $0x48] sm:$0xff] }
  0xdb   :  { %v1407_v33 = vadd.f32 %v6108_v43, %v1394_v28  ;;  %v5516_v43 = vld [vmem:[%s6285_s4 + $0x50] sm:$0xff] }
  0xdc   :  { %1688 = vmatpush.bf16.msra.mxu2 %v4253_v50  ;;  %v5514_v50 = vld [vmem:[%s6285_s4 + $0x40] sm:$0xff] }
  0xdd   :  { %1663 = vmatpush.bf16.msrb.mxu1 %v3981_v55  ;;  %1676 = vmatpush.bf16.msrb.mxu3 %v4109_v59 }
  0xde   :  { %1701 = vmatpush.bf16.msrb.mxu0 %v4381_v1 }
  0xe0   :  { %1689 = vmatpush.bf16.msra.mxu2 %v4237_v6  ;;  %v1419_v29 = vpop.f32.mrf.mxu0  ;;  %v5528_v6 = vld [vmem:[%s6285_s4 + $0xb0] sm:$0xff] }
  0xe1   :  { %1664 = vmatpush.bf16.msrb.mxu1 %v3965_v11  ;;  %1677 = vmatpush.bf16.msrb.mxu3 %v4093_v15  ;;  %v1432_v30 = vpop.f32.mrf.mxu1  ;;  %v5526_v15 = vld [vmem:[%s6285_s4 + $0xa0] sm:$0xff] }
  0xe2   :  { %1702 = vmatpush.bf16.msrb.mxu0 %v4365_v19  ;;  %v5525_v19 = vld [vmem:[%s6285_s4 + $0x98] sm:$0xff] }
  0xe4   :  { %1665 = vmatmul.bf16.vlgmr.msrb.gmra.mxu1 %v6059_v54  ;;  %1690 = vmatpush.bf16.msra.mxu2 %v4221_v20  ;;  %v1445_v54 = vpop.f32.mrf.mxu2  ;;  %v5524_v20 = vld [vmem:[%s6285_s4 + $0x90] sm:$0xff] }
  0xe5   :  { %1716 = vmatpush.bf16.msra.mxu1 %v4477_v16  ;;  %1937 = vmatpush.bf16.msra.mxu3 %v5513_v18 }
  0xe6   :  { %1678 = vmatmul.bf16.vlgmr.msrb.gmra.mxu3 %v6063_v63  ;;  %1703 = vmatpush.bf16.msrb.mxu0 %v4349_v26  ;;  %v5519_v63 = vld [vmem:[%s6285_s4 + $0x68] sm:$0xff] }
  0xe7   :  { %1691 = vmatmul.bf16.vlgmr.msra.gmra.mxu2 %v6078_v32  ;;  %v5510_v32 = vld [vmem:[%s6285_s4 + $0x20] sm:$0xff] }
  0xe8   :  { %v1421_v40 = vpop.f32.mrf.mxu0  ;;  %1963 = vmatpush.bf16.msrb.mxu2 %v5529_v3 }
  0xe9   :  { %1950 = vmatpush.bf16.msrb.mxu1 %v5521_v23  ;;  %1938 = vmatpush.bf16.msra.mxu3 %v5512_v25  ;;  %v1458_v41 = vpop.f32.mrf.mxu3  ;;  %v1434_v42 = vpop.f32.mrf.mxu1  ;;  %v5523_v23 = vld [vmem:[%s6285_s4 + $0x88] sm:$0xff]  ;;  %v5522_v25 = vld [vmem:[%s6285_s4 + $0x80] sm:$0xff] }
  0xea   :  { %1704 = vmatmul.bf16.vlgmr.msrb.gmra.mxu0 %v6080_v37  ;;  %v1420_v37 = vadd.f32 %v1419_v29, %v1407_v33  ;;  %v1459_v57 = vadd.f32 %v1458_v41, %v367_v51 }
  0xec   :  { %v1447_v35 = vpop.f32.mrf.mxu2  ;;  %v1433_v39 = vadd.f32 %v1432_v30, %v1420_v37  ;;  %1964 = vmatpush.bf16.msrb.mxu2 %v5528_v6 }
  0xed   :  { %1951 = vmatpush.bf16.msrb.mxu1 %v5520_v8  ;;  %1939 = vmatpush.bf16.msra.mxu3 %v5511_v27 }
  0xee   :  { %v1446_v45 = vadd.f32 %v1445_v54, %v1433_v39  ;;  %v368_v54 = vperm.slane %v6110_v53, 2 }
  0xf0   :  { %v1722_v48 = vmax.f32 %v1446_v45, 0.0  ;;  %1965 = vmatpush.bf16.msrb.mxu2 %v5527_v10  ;;  %v5723_v10 = vld [vmem:[#allocation8] ss:$0 sm:$0xff] }
  0xf1   :  { %1952 = vmatpush.bf16.msrb.mxu1 %v5519_v63  ;;  %1940 = vmatpush.bf16.msra.mxu3 %v5510_v32  ;;  %v1460_v49 = vpop.f32.mrf.mxu3 }
  0xf2   :  { %v1726_v52 = vpack.c.bf16 %v1722_v48, %v1722_v48 }
  0xf4   :  { %4481 = vmatmul.msk.bf16.vlgmr.msra.gmra.mxu1 %vm1354_vm0, %v6074_v61  ;;  %v1471_v61 = vpop.f32.mrf.mxu2  ;;  %1966 = vmatpush.bf16.msrb.mxu2 %v5526_v15 }
  0xf5   :  { %1953 = vmatpush.bf16.msrb.mxu1 %v5518_v31  ;;  %1941 = vmatpush.bf16.msra.mxu3 %v5509_v34  ;;  %v1472_v58 = vadd.f32 %v1471_v61, %v1459_v57 }
  0xf8   :  { %1967 = vmatpush.bf16.msrb.mxu2 %v5525_v19 }
  0xf9   :  { %1954 = vmatpush.bf16.msrb.mxu1 %v5517_v36  ;;  %1942 = vmatpush.bf16.msra.mxu3 %v5508_v38 }
  0xfc   :  { %v1473_v55 = vpop.f32.mrf.mxu2  ;;  %1968 = vmatpush.bf16.msrb.mxu2 %v5524_v20 }
  0xfd   :  { %1955 = vmatpush.bf16.msrb.mxu1 %v5516_v43  ;;  %1943 = vmatpush.bf16.msra.mxu3 %v5507_v44 }
 0x100   :  { %v1484_v59 = vpop.f32.mrf.mxu0  ;;  %1969 = vmatpush.bf16.msrb.mxu2 %v5523_v23 }
 0x101   :  { %1956 = vmatpush.bf16.msrb.mxu1 %v5515_v46  ;;  %1944 = vmatpush.bf16.msra.mxu3 %v5506_v47  ;;  %v1485_v60 = vadd.f32 %v1484_v59, %v1472_v58  ;;  %v5530_v46 = vld [vmem:[%s6285_s4 + $0xc0] sm:$0xff]  ;;  %v369_v47 = vperm.slane %v6110_v53, 3 }
 0x102   :  { %1983 = vmatpush.bf16.msra.mxu0 %v5530_v46  ;;  %v4801_v46 = vld [vmem:[#allocation11 + $0x188] sm:$0xf] }
 0x103   :  { %v1497_v62 = vpop.f32.mrf.mxu1 }
 0x104   :  { %1945 = vmatmul.bf16.vlgmr.msra.gmra.mxu3 %v1726_v52  ;;  %v1498_v0 = vadd.f32 %v1497_v62, %v1485_v60  ;;  %1970 = vmatpush.bf16.msrb.mxu2 %v5522_v25  ;;  %v2005_v25 = vld [vmem:[#allocation10 + $0x28] sm:$0x33] }
 0x105   :  { %1957 = vmatpush.bf16.msrb.mxu1 %v5514_v50 }
 0x107   :  { %v1510_v2 = vpop.f32.mrf.mxu3 }
 0x108   :  { %v1486_v1 = vpop.f32.mrf.mxu0  ;;  %v1511_v4 = vadd.f32 %v1510_v2, %v1498_v0 }
 0x10a   :  { %v1523_v5 = vpop.f32.mrf.mxu2 }
 0x10b   :  { %v1499_v7 = vpop.f32.mrf.mxu1  ;;  %v1524_v9 = vadd.f32 %v1523_v5, %v1511_v4 }
 0x10f   :  { %v1512_v12 = vpop.f32.mrf.mxu3 }
 0x110   :  { %v1536_v11 = vpop.f32.mrf.mxu0 }
 0x111   :  { %v1537_v13 = vadd.f32 %v1536_v11, %v1524_v9 }
 0x112   :  { %v1525_v14 = vpop.f32.mrf.mxu2 }
 0x113   :  { %v1723_v16 = vmax.f32 %v1537_v13, 0.0 }
 0x115   :  { %v1727_v17 = vpack.c.bf16 %v1723_v16, %v1723_v16 }
 0x117   :  { %1958 = vmatmul.bf16.vlgmr.msrb.gmra.mxu1 %v1727_v17 }
 0x118   :  { %v1538_v18 = vpop.f32.mrf.mxu0 }
 0x123   :  { %v1549_v22 = vpop.f32.mrf.mxu1 }
 0x124   :  { %v1575_v56 = vpop.f32.mrf.mxu0  ;;  %v1550_v32 = vadd.f32 %v1549_v22, %v368_v54 }
 0x127   :  { %v1562_v24 = vpop.f32.mrf.mxu3 }
 0x128   :  { %v1563_v29 = vadd.f32 %v1562_v24, %v1550_v32  ;;  %v2004_v24 = vld [vmem:[#allocation10 + $0x20] sm:$0x33] }
 0x12a   :  { %v1588_v8 = vpop.f32.mrf.mxu2  ;;  %v1576_v31 = vadd.f32 %v1575_v56, %v1563_v29 }
 0x12b   :  { %v1551_v21 = vpop.f32.mrf.mxu1 }
 0x12c   :  { %v1577_v26 = vpop.f32.mrf.mxu0  ;;  %v1589_v34 = vadd.f32 %v1588_v8, %v1576_v31  ;;  %v2031_v8 = vunpack.c.h.b16 %v2004_v24  ;;  %v2032_v21 = vunpack.c.l.b16 %v2005_v25 }
 0x12d   :  { %v2030_v26 = vunpack.c.l.b16 %v2004_v24  ;;  %v4913_v24 = vld [vmem:[#allocation11 + $0x268] sm:$0xf] }
 0x12f   :  { %v1564_v27 = vpop.f32.mrf.mxu3  ;;  %v2038_v54 = vpack.c.b16 %v2030_v26, %v2030_v26 }
 0x130   :  { %v2033_v27 = vunpack.c.h.b16 %v2005_v25  ;;  %v5615_v25 = vld [vmem:[#allocation11 + $0x280] sm:$0xf0] }
 0x131   :  { %v2052_v29 = vsel %vm2050_vm2, %v2038_v54, 0  ;;  %v4661_v54 = vld [vmem:[#allocation11 + $0x70] sm:$0xf] }
 0x132   :  { %v1590_v28 = vpop.f32.mrf.mxu2  ;;  %v2041_v32 = vpack.c.b16 %v2033_v27, %v2033_v27  ;;  %2069 = vmatpush.bf16.msrb.mxu3 %v2052_v29  ;;  %v5678_v27 = vld [vmem:[#allocation11 + $0x478] sm:$0xf0]  ;;  %v5608_v29 = vld [vmem:[#allocation11 + $0x248] sm:$0xf0] }
 0x133   :  { %v2040_v28 = vpack.c.b16 %v2032_v21, %v2032_v21  ;;  %v5165_v21 = vld [vmem:[#allocation11 + $0x460] sm:$0xf] }
 0x134   :  { %v1627_v63 = vpop.f32.mrf.mxu0 }
 0x135   :  { %v2058_v31 = vsel %vm2050_vm2, %v2040_v28, 0  ;;  %v4914_v28 = vor.u32 %v5615_v25, %v4913_v24 }
 0x136   :  { %2095 = vmatpush.bf16.msra.mxu1 %v2058_v31 }
 0x13c   :  { %v1629_v30 = vpop.f32.mrf.mxu0 }
 0x141   :  { %v1601_v33 = vpop.f32.mrf.mxu1 }
 0x142   :  { %v1602_v37 = vadd.f32 %v1601_v33, %v1589_v34  ;;  %v2061_v33 = vsel %vm2050_vm2, %v2041_v32, 0  ;;  %v4585_v34 = vld [vmem:[#allocation10] sm:$0xf] }
 0x143   :  { %2108 = vmatpush.bf16.msra.mxu2 %v2061_v33  ;;  %v4885_v32 = vld [vmem:[#allocation11 + $0x230] sm:$0xf]  ;;  %v5137_v33 = vld [vmem:[#allocation11 + $0x428] sm:$0xf] }
 0x148   :  { %v1653_v35 = vpop.f32.mrf.mxu0 }
 0x149   :  { %v1614_v36 = vpop.f32.mrf.mxu3  ;;  %v1603_v39 = vpop.f32.mrf.mxu1 }
 0x14a   :  { %v1615_v38 = vadd.f32 %v1614_v36, %v1602_v37  ;;  %v1640_v41 = vpop.f32.mrf.mxu2  ;;  %v5533_v37 = vld [vmem:[#allocation10 + $0xc] sm:$0xf0]  ;;  %v4593_v39 = vld [vmem:[#allocation10 + $0x8] sm:$0xf] }
 0x14b   :  { %v1641_v48 = vadd.f32 %v1640_v41, %v369_v47  ;;  %v4586_v36 = vor.u32 %v5533_v37, %v4585_v34  ;;  %v4773_v47 = vld [vmem:[#allocation11 + $0x150] sm:$0xf]  ;;  %v5671_v34 = vld [vmem:[#allocation11 + $0x440] sm:$0xf0]  ;;  %v4633_v37 = vld [vmem:[#allocation11 + $0x38] sm:$0xf] }
 0x14c   :  { %v1628_v40 = vadd.f32 %v1627_v63, %v1615_v38  ;;  %v2039_v63 = vpack.c.b16 %v2031_v8, %v2031_v8  ;;  %v4587_v38 = vld [vmem:[#allocation10 + $0x10] sm:$0xf0] }
 0x14d   :  { %v1654_v50 = vadd.f32 %v1653_v35, %v1641_v48  ;;  %v5531_v35 = vld [vmem:[#allocation10 + $0x4] sm:$0xf]  ;;  %2070 = vmatpush.bf16.msrb.mxu3 %v4586_v36  ;;  %v4886_v36 = vor.u32 %v5608_v29, %v4885_v32  ;;  %v5556_v32 = vld [vmem:[#allocation11 + $0xac] sm:$0xf]  ;;  %v4691_v29 = vld [vmem:[#allocation11 + $0xc4] sm:$0xf0] }
 0x14e   :  { %v1724_v42 = vmax.f32 %v1628_v40, 0.0  ;;  %v2055_v30 = vsel %vm2050_vm2, %v2039_v63, 0  ;;  %v5534_v40 = vld [vmem:[#allocation10 + $0x14] sm:$0xf0]  ;;  %v4590_v41 = vor.u32 %v5531_v35, %v4587_v38  ;;  %v5552_v63 = vld [vmem:[#allocation11 + $0x88] sm:$0xf0] }
 0x14f   :  { %2082 = vmatpush.bf16.msrb.mxu0 %v2055_v30  ;;  %v5166_v30 = vor.u32 %v5678_v27, %v5165_v21  ;;  %v4662_v31 = vor.u32 %v5552_v63, %v4661_v54  ;;  %v5545_v35 = vld [vmem:[#allocation11 + $0x50] sm:$0xf0]  ;;  %v4857_v38 = vld [vmem:[#allocation11 + $0x1f8] sm:$0xf]  ;;  %v5619_v21 = vld [vmem:[#allocation11 + $0x2a4] sm:$0xf] }
 0x150   :  { %v1728_v43 = vpack.c.bf16 %v1724_v42, %v1724_v42  ;;  %v1655_v44 = vpop.f32.mrf.mxu0  ;;  %v4594_v42 = vor.u32 %v5534_v40, %v4593_v39  ;;  %v5601_v39 = vld [vmem:[#allocation11 + $0x210] sm:$0xf0]  ;;  %v1992_v40 = vld [vmem:[#allocation2] sm:$0x3]  ;;  %v4943_v27 = vld [vmem:[#allocation11 + $0x2bc] sm:$0xf0] }
 0x151   :  { %v1616_v45 = vpop.f32.mrf.mxu3  ;;  %v4595_v44 = vld [vmem:[#allocation10 + $0x18] sm:$0xf0] }
 0x152   :  { %1971 = vmatmul.bf16.vlgmr.msrb.gmra.mxu2 %v1728_v43  ;;  %v1642_v61 = vpop.f32.mrf.mxu2  ;;  %v5532_v43 = vld [vmem:[#allocation10 + $0xc] sm:$0xf]  ;;  %2096 = vmatpush.bf16.msra.mxu1 %v4594_v42  ;;  %v4634_v42 = vor.u32 %v5545_v35, %v4633_v37  ;;  %v5053_v37 = vld [vmem:[#allocation11 + $0x380] sm:$0xf] }
 0x153   :  { %v4598_v45 = vor.u32 %v5532_v43, %v4595_v44  ;;  %2083 = vmatpush.bf16.msrb.mxu0 %v4590_v41  ;;  %v5587_v61 = vld [vmem:[#allocation11 + $0x1a0] sm:$0xf0]  ;;  %v5138_v41 = vor.u32 %v5671_v34, %v5137_v33  ;;  %v5109_v43 = vld [vmem:[#allocation11 + $0x3f0] sm:$0xf]  ;;  %v5664_v44 = vld [vmem:[#allocation11 + $0x408] sm:$0xf0] }
 0x154   :  { %v4802_v48 = vor.u32 %v5587_v61, %v4801_v46  ;;  %v4858_v46 = vor.u32 %v5601_v39, %v4857_v38  ;;  %v4915_v33 = vld [vmem:[#allocation11 + $0x284] sm:$0xf0]  ;;  %v5650_v35 = vld [vmem:[#allocation11 + $0x398] sm:$0xf0]  ;;  %v5167_v39 = vld [vmem:[#allocation11 + $0x47c] sm:$0xf0] }
 0x155   :  { %2109 = vmatpush.bf16.msra.mxu2 %v4598_v45  ;;  %v5054_v38 = vor.u32 %v5650_v35, %v5053_v37  ;;  %v5700_v37 = vld [vmem:[#allocation11 + $0x528] sm:$0xf0] }
 0x156   :  { %3242 = vmatpush.bf16.msra.mxu3 %v4802_v48  ;;  %v5538_v48 = vld [vmem:[#allocation11 + $0x18] sm:$0xf0] }
 0x161   :  { %v1666_v49 = vpop.f32.mrf.mxu1 }
 0x162   :  { %v1667_v51 = vadd.f32 %v1666_v49, %v1654_v50  ;;  %v5580_v49 = vld [vmem:[#allocation11 + $0x168] sm:$0xf0]  ;;  %v5025_v50 = vld [vmem:[#allocation11 + $0x348] sm:$0xf] }
 0x167   :  { %v1705_v55 = vpop.f32.mrf.mxu0 }
 0x169   :  { %v1679_v52 = vpop.f32.mrf.mxu3  ;;  %v1668_v58 = vpop.f32.mrf.mxu1 }
 0x16a   :  { %v1680_v57 = vadd.f32 %v1679_v52, %v1667_v51  ;;  %v1692_v59 = vpop.f32.mrf.mxu2  ;;  %v5643_v51 = vld [vmem:[#allocation11 + $0x360] sm:$0xf0]  ;;  %v5636_v58 = vld [vmem:[#allocation11 + $0x328] sm:$0xf0] }
 0x16b   :  { %v5026_v52 = vor.u32 %v5643_v51, %v5025_v50  ;;  %v4803_v50 = vld [vmem:[#allocation11 + $0x1a4] sm:$0xf0]  ;;  %v5640_v51 = vld [vmem:[#allocation11 + $0x34c] sm:$0xf] }
 0x16c   :  { %v1693_v60 = vadd.f32 %v1692_v59, %v1680_v57  ;;  %v4774_v57 = vor.u32 %v5580_v49, %v4773_v47  ;;  %v4745_v59 = vld [vmem:[#allocation11 + $0x118] sm:$0xf]  ;;  %v4605_v47 = vld [vmem:[#allocation11] sm:$0xf]  ;;  %v5584_v49 = vld [vmem:[#allocation11 + $0x18c] sm:$0xf] }
 0x16e   :  { %v1706_v1 = vadd.f32 %v1705_v55, %v1693_v60  ;;  %v4997_v55 = vld [vmem:[#allocation11 + $0x310] sm:$0xf]  ;;  %v5573_v60 = vld [vmem:[#allocation11 + $0x130] sm:$0xf0]  ;;  %3243 = vmatpush.bf16.msra.mxu3 %v4774_v57 }
 0x16f   :  { %v1707_v0 = vpop.f32.mrf.mxu0 }
 0x170   :  { %v4969_v0 = vld [vmem:[#allocation11 + $0x2d8] sm:$0xf] }
 0x171   :  { %v1681_v62 = vpop.f32.mrf.mxu3  ;;  %v1718_v2 = vpop.f32.mrf.mxu1 }
 0x172   :  { %v1719_v3 = vadd.f32 %v1718_v2, %v1706_v1  ;;  %v1694_v4 = vpop.f32.mrf.mxu2  ;;  %v4998_v62 = vor.u32 %v5636_v58, %v4997_v55  ;;  %v5629_v1 = vld [vmem:[#allocation11 + $0x2f0] sm:$0xf0]  ;;  %v5249_v2 = vld [vmem:[#allocation11 + $0x508] sm:$0xf]  ;;  %v5110_v55 = vor.u32 %v5664_v44, %v5109_v43  ;;  %v4829_v58 = vld [vmem:[#allocation11 + $0x1c0] sm:$0xf] }
 0x173   :  { %v5699_v4 = vld [vmem:[#allocation11 + $0x520] sm:$0xf0]  ;;  %v5605_v44 = vld [vmem:[#allocation11 + $0x234] sm:$0xf] }
 0x174   :  { %v1725_v5 = vmax.f32 %v1719_v3, 0.0  ;;  %v4746_v3 = vor.u32 %v5573_v60, %v4745_v59  ;;  %v5594_v59 = vld [vmem:[#allocation11 + $0x1d8] sm:$0xf0]  ;;  %v5696_v60 = vld [vmem:[#allocation11 + $0x50c] sm:$0xf] }
 0x176   :  { %v1729_v6 = vpack.c.bf16 %v1725_v5, %v1725_v5  ;;  %v4717_v5 = vld [vmem:[#allocation11 + $0xe0] sm:$0xf]  ;;  %3244 = vmatpush.bf16.msra.mxu3 %v4746_v3  ;;  %v4606_v3 = vor.u32 %v5538_v48, %v4605_v47 }
 0x177   :  { %v5279_v47 = vld [vmem:[#allocation11 + $0x55c] sm:$0xf0] }
 0x178   :  { %4582 = vmatmul.msk.bf16.vlgmr.msra.gmra.mxu0 %vm1354_vm0, %v1729_v6  ;;  %v5566_v6 = vld [vmem:[#allocation11 + $0xf8] sm:$0xf0] }
 0x179   :  { %v1720_v53 = vpop.f32.mrf.mxu1  ;;  %3255 = vmatpush.bf16.msra.mxu0 %v5026_v52  ;;  %v5027_v52 = vld [vmem:[#allocation11 + $0x364] sm:$0xf0] }
 0x17a   :  { %v4970_v53 = vor.u32 %v5629_v1, %v4969_v0  ;;  %v5081_v0 = vld [vmem:[#allocation11 + $0x3b8] sm:$0xf]  ;;  %v5657_v1 = vld [vmem:[#allocation11 + $0x3d0] sm:$0xf0] }
 0x17d   :  { %3256 = vmatpush.bf16.msra.mxu0 %v4998_v62  ;;  %v5251_v62 = vld [vmem:[#allocation11 + $0x524] sm:$0xf0] }
 0x181   :  { %3257 = vmatpush.bf16.msra.mxu0 %v4970_v53  ;;  %v4775_v53 = vld [vmem:[#allocation11 + $0x16c] sm:$0xf0] }
 0x187   :  { %v1946_v7 = vpop.f32.mrf.mxu3 }
 0x188   :  { %v1947_v11 = vadd.f32 %v5723_v10, %v1946_v7  ;;  %v5250_v7 = vor.u32 %v5699_v4, %v5249_v2  ;;  %v4941_v10 = vld [vmem:[#allocation11 + $0x2a0] sm:$0xf]  ;;  %v4806_v4 = vor.u32 %v5584_v49, %v4803_v50  ;;  %v5668_v49 = vld [vmem:[#allocation11 + $0x42c] sm:$0xf]  ;;  %v5139_v50 = vld [vmem:[#allocation11 + $0x444] sm:$0xf0] }
 0x18a   :  { %3268 = vmatpush.bf16.msrb.mxu1 %v5250_v7  ;;  %v4830_v7 = vor.u32 %v5594_v59, %v4829_v58  ;;  %v4859_v59 = vld [vmem:[#allocation11 + $0x214] sm:$0xf0] }
 0x18f   :  { %v1948_v9 = vpop.f32.mrf.mxu3 }
 0x190   :  { %v5221_v9 = vld [vmem:[#allocation11 + $0x4d0] sm:$0xf] }
 0x194   :  { %v1959_v12 = vpop.f32.mrf.mxu1 }
 0x195   :  { %v1960_v13 = vadd.f32 %v1959_v12, %v1947_v11  ;;  %v5622_v11 = vld [vmem:[#allocation11 + $0x2b8] sm:$0xf0]  ;;  %v5692_v12 = vld [vmem:[#allocation11 + $0x4e8] sm:$0xf0] }
 0x19c   :  { %v1961_v14 = vpop.f32.mrf.mxu1 }
 0x19d   :  { %v5193_v14 = vld [vmem:[#allocation11 + $0x498] sm:$0xf] }
 0x1d5   :  { %v1972_v15 = vpop.f32.mrf.mxu2 }
 0x1d6   :  { %v1973_v17 = vadd.f32 %v1972_v15, %v1960_v13  ;;  %v5222_v13 = vor.u32 %v5692_v12, %v5221_v9  ;;  %v4718_v15 = vor.u32 %v5566_v6, %v4717_v5  ;;  %v5030_v5 = vor.u32 %v5640_v51, %v5027_v52  ;;  %v5577_v6 = vld [vmem:[#allocation11 + $0x154] sm:$0xf]  ;;  %v4999_v9 = vld [vmem:[#allocation11 + $0x32c] sm:$0xf0]  ;;  %v5542_v52 = vld [vmem:[#allocation11 + $0x3c] sm:$0xf] }
 0x1d7   :  { %v5689_v12 = vld [vmem:[#allocation11 + $0x4d4] sm:$0xf]  ;;  %v5142_v51 = vor.u32 %v5668_v49, %v5139_v50 }
 0x1d8   :  { %3269 = vmatpush.bf16.msrb.mxu1 %v5222_v13  ;;  %3245 = vmatpush.bf16.msra.mxu3 %v4718_v15  ;;  %v5223_v13 = vld [vmem:[#allocation11 + $0x4ec] sm:$0xf0]  ;;  %v5693_v49 = vld [vmem:[#allocation11 + $0x4f0] sm:$0xf0] }
 0x1dd   :  { %v1974_v16 = vpop.f32.mrf.mxu2 }
 0x1de   :  { %v5685_v16 = vld [vmem:[#allocation11 + $0x4b0] sm:$0xf0] }
 0x1df   :  { %v5194_v26 = vor.u32 %v5685_v16, %v5193_v14  ;;  %v4778_v14 = vor.u32 %v5577_v6, %v4775_v53  ;;  %v5570_v16 = vld [vmem:[#allocation11 + $0x11c] sm:$0xf]  ;;  %v4831_v6 = vld [vmem:[#allocation11 + $0x1dc] sm:$0xf0] }
 0x1e1   :  { %3270 = vmatpush.bf16.msrb.mxu1 %v5194_v26  ;;  %v5563_v26 = vld [vmem:[#allocation11 + $0xe4] sm:$0xf] }
 0x1e5   :  { %3271 = vmatpush.bf16.msrb.mxu1 %v5166_v30  ;;  %v5612_v30 = vld [vmem:[#allocation11 + $0x26c] sm:$0xf] }
 0x1e6   :  { %v4918_v34 = vor.u32 %v5612_v30, %v4915_v33  ;;  %v5581_v30 = vld [vmem:[#allocation11 + $0x170] sm:$0xf0] }
 0x1e9   :  { %3272 = vmatpush.bf16.msrb.mxu1 %v5138_v41  ;;  %v4663_v41 = vld [vmem:[#allocation11 + $0x8c] sm:$0xf0] }
 0x1ed   :  { %3273 = vmatpush.bf16.msrb.mxu1 %v5110_v55  ;;  %v4635_v55 = vld [vmem:[#allocation11 + $0x54] sm:$0xf0] }
 0x1ee   :  { %v4638_v58 = vor.u32 %v5542_v52, %v4635_v55  ;;  %v5637_v52 = vld [vmem:[#allocation11 + $0x330] sm:$0xf0] }
 0x1f5   :  { %v1985_v18 = vpop.f32.mrf.mxu0 }
 0x1f6   :  { %v6202_v19 = vadd.f32 %v1985_v18, %v1973_v17  ;;  %v5277_v17 = vld [vmem:[#allocation11 + $0x540] sm:$0xf]  ;;  %v5706_v18 = vld [vmem:[#allocation11 + $0x558] sm:$0xf0] }
 0x1f8   :  { %v1989_v20 = vmul.f32 0.5, %v6202_v19  ;;  %3669 = vst.msk [vmem:[%s6292_s11] sm:$0x3] %vm3668_vm1, %v6202_v19 }
 0x1fa   :  { %v1990_v56 = vmul.f32 1.442695, %v1989_v20  ;;  %v4689_v20 = vld [vmem:[#allocation11 + $0xa8] sm:$0xf] }
 0x1fc   :  { %5724 = vpow2.f32 %v1990_v56  ;;  %v5559_v56 = vld [vmem:[#allocation11 + $0xc0] sm:$0xf0] }
 0x1fd   :  { %v1987_v22 = vpop.f32.mrf.mxu0  ;;  %v4690_v8 = vor.u32 %v5559_v56, %v4689_v20  ;;  %v4971_v20 = vld [vmem:[#allocation11 + $0x2f4] sm:$0xf0]  ;;  %v5226_v56 = vor.u32 %v5689_v12, %v5223_v13  ;;  %v2006_v13 = vld [vmem:[%s6288_s7] sm:$0xf]  ;;  %s5968_s7 = smov [#allocation14]  }
 0x1fe   :  { %v4942_v22 = vor.u32 %v5622_v11, %v4941_v10  ;;  %v5254_v10 = vor.u32 %v5696_v60, %v5251_v62  ;;  %v5082_v11 = vor.u32 %v5657_v1, %v5081_v0  ;;  %v5661_v62 = vld [vmem:[#allocation11 + $0x3f4] sm:$0xf]  ;;  %v5111_v0 = vld [vmem:[#allocation11 + $0x40c] sm:$0xf0]  ;;  %s3675_s26 = sshll.u32 %s5968_s7, 4  ;;  %s3676_s26 = int_to_ptr.vmem [resolvable:$true] %s3675_s26 }
 0x1ff   :  { %3246 = vmatpush.bf16.msra.mxu3 %v4690_v8  ;;  %v4719_v8 = vld [vmem:[#allocation11 + $0xfc] sm:$0xf0]  ;;  %v5114_v1 = vor.u32 %v5661_v62, %v5111_v0 }
 0x200   :  { %3258 = vmatpush.bf16.msra.mxu0 %v4942_v22  ;;  %3274 = vmatpush.bf16.msrb.mxu1 %v5082_v11  ;;  %v5682_v22 = vld [vmem:[#allocation11 + $0x49c] sm:$0xf]  ;;  %v4722_v63 = vor.u32 %v5563_v26, %v4719_v8  ;;  %v5055_v11 = vld [vmem:[#allocation11 + $0x39c] sm:$0xf0]  ;;  %v2008_v26 = vperm.slane %v2006_v13, 0 }
 0x202   :  { %v5725_v23 = vpop.eup %5724 }
 0x203   :  { %1994 = vrot.lane.b32.xlu0 %v5725_v23, %s5967_s9  ;;  %v5278_v23 = vor.u32 %v5706_v18, %v5277_v17  ;;  %3247 = vmatpush.bf16.msra.mxu3 %v4662_v31  ;;  %v4747_v17 = vld [vmem:[#allocation11 + $0x134] sm:$0xf0]  ;;  %v5626_v18 = vld [vmem:[#allocation11 + $0x2dc] sm:$0xf]  ;;  %v4694_v31 = vor.u32 %v5556_v32, %v4691_v29 }
 0x204   :  { %3259 = vmatpush.bf16.msra.mxu0 %v4914_v28  ;;  %v4750_v24 = vor.u32 %v5570_v16, %v4747_v17  ;;  %v4974_v25 = vor.u32 %v5626_v18, %v4971_v20  ;;  %v4946_v28 = vor.u32 %v5619_v21, %v4943_v27  ;;  %3275 = vmatpush.bf16.msrb.mxu1 %v5054_v38  ;;  %v5285_v20 = vld [vmem:[#allocation11 + $0x548] sm:$0xf]  ;;  %v2011_v21 = vperm.slane %v2006_v13, 3  ;;  %v4781_v29 = vld [vmem:[#allocation11 + $0x158] sm:$0xf] }
 0x205   :  { %3288 = vmatpush.bf16.msrb.mxu2 %v5278_v23  ;;  %v5195_v23 = vld [vmem:[#allocation11 + $0x4b4] sm:$0xf0]  ;;  %v5033_v38 = vld [vmem:[#allocation11 + $0x350] sm:$0xf] }
 0x206   :  { %v5198_v54 = vor.u32 %v5682_v22, %v5195_v23  ;;  %v4809_v23 = vld [vmem:[#allocation11 + $0x190] sm:$0xf] }
 0x207   :  { %3248 = vmatpush.bf16.msra.mxu3 %v4634_v42 }
 0x208   :  { %3260 = vmatpush.bf16.msra.mxu0 %v4886_v36  ;;  %v5675_v36 = vld [vmem:[#allocation11 + $0x464] sm:$0xf] }
 0x209   :  { %v5170_v42 = vor.u32 %v5675_v36, %v5167_v39  ;;  %v5644_v39 = vld [vmem:[#allocation11 + $0x368] sm:$0xf0] }
 0x20b   :  { %3249 = vmatpush.bf16.msra.mxu3 %v4606_v3  ;;  %v4607_v3 = vld [vmem:[#allocation11 + $0x1c] sm:$0xf0] }
 0x20c   :  { %3261 = vmatpush.bf16.msra.mxu0 %v4858_v46 }
 0x210   :  { %3262 = vmatpush.bf16.msra.mxu0 %v4830_v7  ;;  %v5654_v7 = vld [vmem:[#allocation11 + $0x3bc] sm:$0xf] }
 0x275   :  { %v1995_v45 = vpop.permute.xlu0 %1994 }
 0x276   :  { %v1997_v61 = vmul.f32 %v1995_v45, %v1992_v40  ;;  %v5549_v40 = vld [vmem:[#allocation11 + $0x74] sm:$0xf]  ;;  %v4887_v45 = vld [vmem:[#allocation11 + $0x24c] sm:$0xf0] }
 0x277   :  { %v4666_v43 = vor.u32 %v5549_v40, %v4663_v41  ;;  %v4890_v46 = vor.u32 %v5605_v44, %v4887_v45  ;;  %v4753_v45 = vld [vmem:[#allocation11 + $0x120] sm:$0xf] }
 0x278   :  { %v1998_v57 = vadd.f32 %v1997_v61, %v6202_v19  ;;  %v5633_v19 = vld [vmem:[#allocation11 + $0x314] sm:$0xf]  ;;  %v5703_v61 = vld [vmem:[#allocation11 + $0x544] sm:$0xf] }
 0x279   :  { %v5002_v15 = vor.u32 %v5633_v19, %v4999_v9  ;;  %v5282_v48 = vor.u32 %v5703_v61, %v5279_v47  ;;  %v5083_v19 = vld [vmem:[#allocation11 + $0x3d4] sm:$0xf0]  ;;  %v5034_v47 = vor.u32 %v5644_v39, %v5033_v38  ;;  %v5609_v38 = vld [vmem:[#allocation11 + $0x250] sm:$0xf0] }
 0x27a   :  { %v1999_v2 = vpack.c.bf16 %v1998_v57, %v1998_v57  ;;  %v5598_v57 = vld [vmem:[#allocation11 + $0x1fc] sm:$0xf]  ;;  %v5086_v9 = vor.u32 %v5654_v7, %v5083_v19  ;;  %v4697_v19 = vld [vmem:[#allocation11 + $0xb0] sm:$0xf] }
 0x27b   :  { %v4862_v60 = vor.u32 %v5598_v57, %v4859_v59  ;;  %v4725_v59 = vld [vmem:[#allocation11 + $0xe8] sm:$0xf] }
 0x27c   :  { %4599 = vmatmul.msk.bf16.vlgmr.msrb.gmra.mxu3 %vm2046_vm3, %v1999_v2  ;;  %4600 = vmatmul.msk.bf16.vlgmr.msrb.gmra.mxu0 %vm2046_vm3, %v1999_v2 }
 0x27d   :  { %4601 = vmatmul.msk.bf16.vlgmr.msra.gmra.mxu1 %vm2046_vm3, %v1999_v2  ;;  %4602 = vmatmul.msk.bf16.vlgmr.msra.gmra.mxu2 %vm2046_vm3, %v1999_v2  ;;  %v5535_v2 = vld [vmem:[#allocation11 + $0x4] sm:$0xf] }
 0x27e   :  { %3294 = vmatpush.bf16.msra.mxu2 %v4806_v4  ;;  %3307 = vmatpush.bf16.msrb.mxu3 %v5030_v5  ;;  %v4610_v4 = vor.u32 %v5535_v2, %v4607_v3  ;;  %v5591_v5 = vld [vmem:[#allocation11 + $0x1c4] sm:$0xf]  ;;  %v5686_v2 = vld [vmem:[#allocation11 + $0x4b8] sm:$0xf0]  ;;  %v4977_v3 = vld [vmem:[#allocation11 + $0x2e0] sm:$0xf] }
 0x27f   :  { %3320 = vmatpush.bf16.msrb.mxu0 %v5254_v10  ;;  %3340 = vmatpush.bf16.msra.mxu1 %v5282_v48  ;;  %v4834_v53 = vor.u32 %v5591_v5, %v4831_v6  ;;  %v5647_v10 = vld [vmem:[#allocation11 + $0x384] sm:$0xf]  ;;  %v5229_v48 = vld [vmem:[#allocation11 + $0x4d8] sm:$0xf]  ;;  %v5585_v6 = vld [vmem:[#allocation11 + $0x194] sm:$0xf] }
 0x280   :  { %v5058_v12 = vor.u32 %v5647_v10, %v5055_v11  ;;  %v5173_v11 = vld [vmem:[#allocation11 + $0x468] sm:$0xf] }
 0x282   :  { %3295 = vmatpush.bf16.msra.mxu2 %v4778_v14  ;;  %3308 = vmatpush.bf16.msrb.mxu3 %v5002_v15  ;;  %v2009_v14 = vperm.slane %v2006_v13, 1  ;;  %v2010_v15 = vperm.slane %v2006_v13, 2 }
 0x283   :  { %3321 = vmatpush.bf16.msrb.mxu0 %v5226_v56  ;;  %v5707_v56 = vld [vmem:[#allocation11 + $0x560] sm:$0xf0] }
 0x284   :  { %v5286_v27 = vor.u32 %v5707_v56, %v5285_v20  ;;  %v4669_v56 = vld [vmem:[#allocation11 + $0x78] sm:$0xf] }
 0x286   :  { %3296 = vmatpush.bf16.msra.mxu2 %v4750_v24  ;;  %3309 = vmatpush.bf16.msrb.mxu3 %v4974_v25  ;;  %v5588_v24 = vld [vmem:[#allocation11 + $0x1a8] sm:$0xf0] }
 0x287   :  { %3322 = vmatpush.bf16.msrb.mxu0 %v5198_v54 }
 0x28a   :  { %3297 = vmatpush.bf16.msra.mxu2 %v4722_v63  ;;  %3310 = vmatpush.bf16.msrb.mxu3 %v4946_v28  ;;  %v4810_v63 = vor.u32 %v5588_v24, %v4809_v23  ;;  %v5145_v24 = vld [vmem:[#allocation11 + $0x430] sm:$0xf] }
 0x28b   :  { %3323 = vmatpush.bf16.msrb.mxu0 %v5170_v42  ;;  %v4782_v42 = vor.u32 %v5581_v30, %v4781_v29  ;;  %v4641_v30 = vld [vmem:[#allocation11 + $0x40] sm:$0xf] }
 0x28e   :  { %3298 = vmatpush.bf16.msra.mxu2 %v4694_v31  ;;  %3311 = vmatpush.bf16.msrb.mxu3 %v4918_v34  ;;  %v5257_v34 = vld [vmem:[#allocation11 + $0x510] sm:$0xf] }
 0x28f   :  { %3324 = vmatpush.bf16.msrb.mxu0 %v5142_v51  ;;  %v5258_v44 = vor.u32 %v5700_v37, %v5257_v34  ;;  %v5005_v51 = vld [vmem:[#allocation11 + $0x318] sm:$0xf]  ;;  %v5665_v37 = vld [vmem:[#allocation11 + $0x410] sm:$0xf0] }
 0x290   :  { %v5006_v0 = vor.u32 %v5637_v52, %v5005_v51  ;;  %v5117_v34 = vld [vmem:[#allocation11 + $0x3f8] sm:$0xf]  ;;  %v4865_v52 = vld [vmem:[#allocation11 + $0x200] sm:$0xf] }
 0x292   :  { %3299 = vmatpush.bf16.msra.mxu2 %v4666_v43  ;;  %3312 = vmatpush.bf16.msrb.mxu3 %v4890_v46  ;;  %v5574_v46 = vld [vmem:[#allocation11 + $0x138] sm:$0xf0] }
 0x293   :  { %3325 = vmatpush.bf16.msrb.mxu0 %v5114_v1  ;;  %v4754_v55 = vor.u32 %v5574_v46, %v4753_v45  ;;  %v5201_v1 = vld [vmem:[#allocation11 + $0x4a0] sm:$0xf]  ;;  %v5641_v45 = vld [vmem:[#allocation11 + $0x354] sm:$0xf] }
 0x294   :  { %v5202_v7 = vor.u32 %v5686_v2, %v5201_v1  ;;  %v5007_v1 = vld [vmem:[#allocation11 + $0x334] sm:$0xf0]  ;;  %v4837_v2 = vld [vmem:[#allocation11 + $0x1c8] sm:$0xf] }
 0x296   :  { %3300 = vmatpush.bf16.msra.mxu2 %v4638_v58  ;;  %3313 = vmatpush.bf16.msrb.mxu3 %v4862_v60  ;;  %v5230_v58 = vor.u32 %v5693_v49, %v5229_v48  ;;  %v5567_v60 = vld [vmem:[#allocation11 + $0x100] sm:$0xf0]  ;;  %v5089_v48 = vld [vmem:[#allocation11 + $0x3c0] sm:$0xf]  ;;  %v5658_v49 = vld [vmem:[#allocation11 + $0x3d8] sm:$0xf0] }
 0x297   :  { %3326 = vmatpush.bf16.msrb.mxu0 %v5086_v9  ;;  %v4726_v5 = vor.u32 %v5567_v60, %v4725_v59  ;;  %v5560_v9 = vld [vmem:[#allocation11 + $0xc8] sm:$0xf0]  ;;  %v4699_v59 = vld [vmem:[#allocation11 + $0xcc] sm:$0xf0] }
 0x29a   :  { %3301 = vmatpush.bf16.msra.mxu2 %v4610_v4  ;;  %3314 = vmatpush.bf16.msrb.mxu3 %v4834_v53  ;;  %v5630_v4 = vld [vmem:[#allocation11 + $0x2f8] sm:$0xf0]  ;;  %v4811_v53 = vld [vmem:[#allocation11 + $0x1ac] sm:$0xf0] }
 0x29b   :  { %3327 = vmatpush.bf16.msrb.mxu0 %v5058_v12  ;;  %v4978_v10 = vor.u32 %v5630_v4, %v4977_v3  ;;  %v5679_v12 = vld [vmem:[#allocation11 + $0x480] sm:$0xf0]  ;;  %v4814_v13 = vor.u32 %v5585_v6, %v4811_v53 }
 0x29c   :  { %v5174_v20 = vor.u32 %v5679_v12, %v5173_v11  ;;  %v5595_v4 = vld [vmem:[#allocation11 + $0x1e0] sm:$0xf0]  ;;  %v5550_v11 = vld [vmem:[#allocation11 + $0x7c] sm:$0xf]  ;;  %v4671_v12 = vld [vmem:[#allocation11 + $0x94] sm:$0xf0] }
 0x29d   :  { %v5651_v6 = vld [vmem:[#allocation11 + $0x3a0] sm:$0xf0] }
 0x2f9   :  { %v2085_v16 = vpop.f32.mrf.mxu0 }
 0x2fa   :  { %v2086_v17 = vadd.f32 %v2085_v16, %v2009_v14  ;;  %v2098_v18 = vpop.f32.mrf.mxu1  ;;  %v4949_v14 = vld [vmem:[#allocation11 + $0x2a8] sm:$0xf]  ;;  %v4698_v16 = vor.u32 %v5560_v9, %v4697_v19  ;;  %v5704_v19 = vld [vmem:[#allocation11 + $0x54c] sm:$0xf] }
 0x2fb   :  { %v2099_v22 = vadd.f32 %v2098_v18, %v2010_v15  ;;  %v5623_v15 = vld [vmem:[#allocation11 + $0x2c0] sm:$0xf0]  ;;  %v4783_v18 = vld [vmem:[#allocation11 + $0x174] sm:$0xf0]  ;;  %v5287_v9 = vld [vmem:[#allocation11 + $0x564] sm:$0xf0] }
 0x2fc   :  { %v2116_v25 = vmax.f32 %v2086_v17, 0.0  ;;  %v5578_v17 = vld [vmem:[#allocation11 + $0x15c] sm:$0xf]  ;;  %v4950_v23 = vor.u32 %v5623_v15, %v4949_v14  ;;  %v4838_v15 = vor.u32 %v5595_v4, %v4837_v2  ;;  %v5147_v4 = vld [vmem:[#allocation11 + $0x44c] sm:$0xf0] }
 0x2fd   :  { %v2117_v8 = vmax.f32 %v2099_v22, 0.0  ;;  %v5553_v22 = vld [vmem:[#allocation11 + $0x90] sm:$0xf0] }
 0x2fe   :  { %v6221_v54 = vpack.c.bf16 %v2116_v25, %v2116_v25  ;;  %v5672_v25 = vld [vmem:[#allocation11 + $0x448] sm:$0xf0] }
 0x2ff   :  { %v6223_v28 = vpack.c.bf16 %v2117_v8, %v2117_v8  ;;  %v2072_v32 = vpop.f32.mrf.mxu3  ;;  %v4921_v8 = vld [vmem:[#allocation11 + $0x270] sm:$0xf]  ;;  %v5146_v29 = vor.u32 %v5672_v25, %v5145_v24  ;;  %v5690_v24 = vld [vmem:[#allocation11 + $0x4dc] sm:$0xf]  ;;  %v5231_v25 = vld [vmem:[#allocation11 + $0x4f4] sm:$0xf0] }
 0x300   :  { %v2073_v31 = vadd.f32 %v2072_v32, %v2008_v26  ;;  %v2111_v33 = vpop.f32.mrf.mxu2  ;;  %3263 = vmatmul.bf16.vlgmr.msra.gmra.mxu0 %v6221_v54  ;;  %v4786_v26 = vor.u32 %v5578_v17, %v4783_v18  ;;  %v4755_v32 = vld [vmem:[#allocation11 + $0x13c] sm:$0xf0]  ;;  %v5290_v18 = vor.u32 %v5704_v19, %v5287_v9  ;;  %v5599_v19 = vld [vmem:[#allocation11 + $0x204] sm:$0xf] }
 0x301   :  { %v2112_v35 = vadd.f32 %v2111_v33, %v2011_v21  ;;  %3276 = vmatmul.bf16.vlgmr.msrb.gmra.mxu1 %v6223_v28  ;;  %v2087_v36 = vpop.f32.mrf.mxu0  ;;  %3392 = vmatpush.bf16.msra.mxu0 %v5286_v27  ;;  %v5616_v21 = vld [vmem:[#allocation11 + $0x288] sm:$0xf0]  ;;  %v4670_v27 = vor.u32 %v5553_v22, %v4669_v56  ;;  %v4979_v17 = vld [vmem:[#allocation11 + $0x2fc] sm:$0xf0]  ;;  %v4674_v56 = vor.u32 %v5550_v11, %v4671_v12  ;;  %v4817_v22 = vld [vmem:[#allocation11 + $0x198] sm:$0xf] }
 0x302   :  { %v2115_v40 = vmax.f32 %v2073_v31, 0.0  ;;  %3346 = vmatpush.bf16.msrb.mxu1 %v4810_v63  ;;  %v2100_v41 = vpop.f32.mrf.mxu1  ;;  %v5571_v63 = vld [vmem:[#allocation11 + $0x124] sm:$0xf]  ;;  %v5546_v31 = vld [vmem:[#allocation11 + $0x58] sm:$0xf0]  ;;  %v4922_v33 = vor.u32 %v5616_v21, %v4921_v8 }
 0x303   :  { %v2118_v43 = vmax.f32 %v2112_v35, 0.0  ;;  %v4758_v35 = vor.u32 %v5571_v63, %v4755_v32  ;;  %v4893_v36 = vld [vmem:[#allocation11 + $0x238] sm:$0xf]  ;;  %v4642_v39 = vor.u32 %v5546_v31, %v4641_v30  ;;  %v4727_v41 = vld [vmem:[#allocation11 + $0x104] sm:$0xf0] }
 0x304   :  { %v6227_v61 = vpack.c.bf16 %v2115_v40, %v2115_v40  ;;  %v5564_v40 = vld [vmem:[#allocation11 + $0xec] sm:$0xf]  ;;  %v4894_v46 = vor.u32 %v5609_v38, %v4893_v36  ;;  %v4643_v8 = vld [vmem:[#allocation11 + $0x5c] sm:$0xf0]  ;;  %v4951_v32 = vld [vmem:[#allocation11 + $0x2c4] sm:$0xf0] }
 0x305   :  { %v6229_v50 = vpack.c.bf16 %v2118_v43, %v2118_v43  ;;  %v4613_v43 = vld [vmem:[#allocation11 + $0x8] sm:$0xf]  ;;  %v4730_v51 = vor.u32 %v5564_v40, %v4727_v41  ;;  %v5620_v63 = vld [vmem:[#allocation11 + $0x2ac] sm:$0xf]  ;;  %v4789_v31 = vld [vmem:[#allocation11 + $0x160] sm:$0xf] }
 0x306   :  { %3347 = vmatpush.bf16.msrb.mxu1 %v4782_v42  ;;  %3250 = vmatmul.bf16.vlgmr.msra.gmra.mxu3 %v6227_v61  ;;  %v5118_v42 = vor.u32 %v5665_v37, %v5117_v34  ;;  %v5683_v34 = vld [vmem:[#allocation11 + $0x4a4] sm:$0xf]  ;;  %v5203_v37 = vld [vmem:[#allocation11 + $0x4bc] sm:$0xf0]  ;;  %v4615_v36 = vld [vmem:[#allocation11 + $0x24] sm:$0xf0]  ;;  %v4954_v38 = vor.u32 %v5620_v63, %v4951_v32 }
 0x307   :  { %5303 = vmatmul.msk.bf16.vlgmr.msrb.gmra.mxu2 %vm1354_vm0, %v6229_v50  ;;  %3372 = vmatpush.bf16.msra.mxu3 %v5258_v44  ;;  %v2074_v57 = vpop.f32.mrf.mxu3  ;;  %v5539_v44 = vld [vmem:[#allocation11 + $0x20] sm:$0xf0]  ;;  %v5645_v40 = vld [vmem:[#allocation11 + $0x370] sm:$0xf0]  ;;  %v4867_v9 = vld [vmem:[#allocation11 + $0x21c] sm:$0xf0] }
 0x308   :  { %3359 = vmatpush.bf16.msrb.mxu2 %v5034_v47  ;;  %v2113_v62 = vpop.f32.mrf.mxu2  ;;  %v5035_v47 = vld [vmem:[#allocation11 + $0x36c] sm:$0xf0]  ;;  %v4614_v57 = vor.u32 %v5539_v44, %v4613_v43  ;;  %v5206_v44 = vor.u32 %v5683_v34, %v5203_v37  ;;  %v4705_v11 = vld [vmem:[#allocation11 + $0xb8] sm:$0xf]  ;;  %v5561_v12 = vld [vmem:[#allocation11 + $0xd0] sm:$0xf0] }
 0x309   :  { %v5038_v60 = vor.u32 %v5641_v45, %v5035_v47  ;;  %v5090_v62 = vor.u32 %v5658_v49, %v5089_v48  ;;  %v4923_v43 = vld [vmem:[#allocation11 + $0x28c] sm:$0xf0]  ;;  %v5575_v47 = vld [vmem:[#allocation11 + $0x140] sm:$0xf0]  ;;  %v5676_v49 = vld [vmem:[#allocation11 + $0x46c] sm:$0xf] }
 0x30a   :  { %3348 = vmatpush.bf16.msrb.mxu1 %v4754_v55  ;;  %v5602_v55 = vld [vmem:[#allocation11 + $0x218] sm:$0xf0]  ;;  %v5091_v63 = vld [vmem:[#allocation11 + $0x3dc] sm:$0xf0]  ;;  %v4649_v34 = vld [vmem:[#allocation11 + $0x48] sm:$0xf] }
 0x30b   :  { %3373 = vmatpush.bf16.msra.mxu3 %v5230_v58  ;;  %v5557_v58 = vld [vmem:[#allocation11 + $0xb4] sm:$0xf]  ;;  %v4866_v3 = vor.u32 %v5602_v55, %v4865_v52  ;;  %v5013_v55 = vld [vmem:[#allocation11 + $0x320] sm:$0xf] }
 0x30c   :  { %3360 = vmatpush.bf16.msrb.mxu2 %v5006_v0  ;;  %v5634_v0 = vld [vmem:[#allocation11 + $0x31c] sm:$0xf]  ;;  %v4702_v53 = vor.u32 %v5557_v58, %v4699_v59 }
 0x30d   :  { %v5606_v59 = vld [vmem:[#allocation11 + $0x23c] sm:$0xf] }
 0x30e   :  { %3349 = vmatpush.bf16.msrb.mxu1 %v4726_v5  ;;  %v5061_v5 = vld [vmem:[#allocation11 + $0x388] sm:$0xf] }
 0x30f   :  { %3374 = vmatpush.bf16.msra.mxu3 %v5202_v7  ;;  %v5697_v7 = vld [vmem:[#allocation11 + $0x514] sm:$0xf]  ;;  %v5062_v14 = vor.u32 %v5651_v6, %v5061_v5  ;;  %v4985_v6 = vld [vmem:[#allocation11 + $0x2e8] sm:$0xf] }
 0x310   :  { %3361 = vmatpush.bf16.msrb.mxu2 %v4978_v10  ;;  %3328 = vmatmul.bf16.vlgmr.msrb.gmra.mxu0 %v6223_v28  ;;  %v5259_v10 = vld [vmem:[#allocation11 + $0x52c] sm:$0xf0] }
 0x311   :  { %5304 = vmatmul.msk.bf16.vlgmr.msra.gmra.mxu1 %vm1354_vm0, %v6229_v50  ;;  %3398 = vmatpush.bf16.msrb.mxu0 %v4814_v13  ;;  %v5010_v13 = vor.u32 %v5634_v0, %v5007_v1  ;;  %v4733_v0 = vld [vmem:[#allocation11 + $0xf0] sm:$0xf]  ;;  %v5568_v1 = vld [vmem:[#allocation11 + $0x108] sm:$0xf0] }
 0x312   :  { %3350 = vmatpush.bf16.msrb.mxu1 %v4698_v16  ;;  %v5627_v16 = vld [vmem:[#allocation11 + $0x2e4] sm:$0xf] }
 0x313   :  { %3375 = vmatpush.bf16.msra.mxu3 %v5174_v20  ;;  %v5262_v20 = vor.u32 %v5697_v7, %v5259_v10  ;;  %v4982_v21 = vor.u32 %v5627_v16, %v4979_v17  ;;  %v4734_v7 = vor.u32 %v5568_v1, %v4733_v0  ;;  %v4870_v16 = vor.u32 %v5599_v19, %v4867_v9  ;;  %v4957_v17 = vld [vmem:[#allocation11 + $0x2b0] sm:$0xf]  ;;  %v5043_v0 = vld [vmem:[#allocation11 + $0x374] sm:$0xf0]  ;;  %v4873_v1 = vld [vmem:[#allocation11 + $0x208] sm:$0xf] }
 0x314   :  { %3362 = vmatpush.bf16.msrb.mxu2 %v4950_v23  ;;  %v5589_v23 = vld [vmem:[#allocation11 + $0x1b0] sm:$0xf0]  ;;  %v5579_v9 = vld [vmem:[#allocation11 + $0x164] sm:$0xf] }
 0x315   :  { %3399 = vmatpush.bf16.msrb.mxu0 %v4786_v26  ;;  %v5543_v26 = vld [vmem:[#allocation11 + $0x44] sm:$0xf] }
 0x316   :  { %3351 = vmatpush.bf16.msrb.mxu1 %v4670_v27  ;;  %3315 = vmatmul.bf16.vlgmr.msrb.gmra.mxu3 %v6221_v54  ;;  %v4818_v27 = vor.u32 %v5589_v23, %v4817_v22  ;;  %v4646_v30 = vor.u32 %v5543_v26, %v4643_v8  ;;  %v4839_v22 = vld [vmem:[#allocation11 + $0x1e4] sm:$0xf0]  ;;  %v4677_v23 = vld [vmem:[#allocation11 + $0x80] sm:$0xf]  ;;  %v5265_v26 = vld [vmem:[#allocation11 + $0x518] sm:$0xf] }
 0x317   :  { %3302 = vmatmul.bf16.vlgmr.msra.gmra.mxu2 %v6227_v61  ;;  %3376 = vmatpush.bf16.msra.mxu3 %v5146_v29  ;;  %v5234_v29 = vor.u32 %v5690_v24, %v5231_v25  ;;  %v5554_v25 = vld [vmem:[#allocation11 + $0x98] sm:$0xf0]  ;;  %v5701_v8 = vld [vmem:[#allocation11 + $0x530] sm:$0xf0] }
 0x318   :  { %3363 = vmatpush.bf16.msrb.mxu2 %v4922_v33  ;;  %v5582_v33 = vld [vmem:[#allocation11 + $0x178] sm:$0xf0] }
 0x319   :  { %3400 = vmatpush.bf16.msrb.mxu0 %v4758_v35  ;;  %v5536_v35 = vld [vmem:[#allocation11 + $0xc] sm:$0xf]  ;;  %v4790_v41 = vor.u32 %v5582_v33, %v4789_v31  ;;  %v4678_v31 = vor.u32 %v5554_v25, %v4677_v23  ;;  %v5266_v33 = vor.u32 %v5701_v8, %v5265_v26  ;;  %v5673_v23 = vld [vmem:[#allocation11 + $0x450] sm:$0xf0]  ;;  %v4763_v25 = vld [vmem:[#allocation11 + $0x144] sm:$0xf0] }
 0x31a   :  { %3352 = vmatpush.bf16.msrb.mxu1 %v4642_v39  ;;  %v5041_v39 = vld [vmem:[#allocation11 + $0x358] sm:$0xf]  ;;  %v4618_v45 = vor.u32 %v5536_v35, %v4615_v36  ;;  %v5547_v35 = vld [vmem:[#allocation11 + $0x60] sm:$0xf0]  ;;  %v5237_v36 = vld [vmem:[#allocation11 + $0x4e0] sm:$0xf] }
 0x31b   :  { %3377 = vmatpush.bf16.msra.mxu3 %v5118_v42  ;;  %v5613_v42 = vld [vmem:[#allocation11 + $0x274] sm:$0xf]  ;;  %v5042_v48 = vor.u32 %v5645_v40, %v5041_v39  ;;  %v5648_v40 = vld [vmem:[#allocation11 + $0x38c] sm:$0xf] }
 0x31c   :  { %3364 = vmatpush.bf16.msrb.mxu2 %v4894_v46  ;;  %v4761_v46 = vld [vmem:[#allocation11 + $0x128] sm:$0xf]  ;;  %v4926_v52 = vor.u32 %v5613_v42, %v4923_v43  ;;  %v4901_v42 = vld [vmem:[#allocation11 + $0x240] sm:$0xf]  ;;  %v5610_v43 = vld [vmem:[#allocation11 + $0x258] sm:$0xf0] }
 0x31d   :  { %3401 = vmatpush.bf16.msrb.mxu0 %v4730_v51  ;;  %v5175_v51 = vld [vmem:[#allocation11 + $0x484] sm:$0xf0]  ;;  %v4762_v58 = vor.u32 %v5575_v47, %v4761_v46  ;;  %v4650_v46 = vor.u32 %v5547_v35, %v4649_v34  ;;  %v5628_v8 = vld [vmem:[#allocation11 + $0x2ec] sm:$0xf]  ;;  %v5565_v34 = vld [vmem:[#allocation11 + $0xf4] sm:$0xf] }
 0x31e   :  { %3353 = vmatpush.bf16.msrb.mxu1 %v4614_v57  ;;  %v5638_v57 = vld [vmem:[#allocation11 + $0x338] sm:$0xf0] }
 0x31f   :  { %3378 = vmatpush.bf16.msra.mxu3 %v5090_v62  ;;  %v5178_v62 = vor.u32 %v5676_v49, %v5175_v51  ;;  %v5014_v2 = vor.u32 %v5638_v57, %v5013_v55  ;;  %v5540_v51 = vld [vmem:[#allocation11 + $0x28] sm:$0xf0]  ;;  %v5687_v55 = vld [vmem:[#allocation11 + $0x4c0] sm:$0xf0]  ;;  %v4902_v57 = vor.u32 %v5610_v43, %v4901_v42  ;;  %v5097_v43 = vld [vmem:[#allocation11 + $0x3c8] sm:$0xf] }
 0x320   :  { %3365 = vmatpush.bf16.msrb.mxu2 %v4866_v3  ;;  %5305 = vmatmul.msk.bf16.vlgmr.msra.gmra.mxu0 %vm1354_vm0, %v6229_v50  ;;  %v5669_v3 = vld [vmem:[#allocation11 + $0x434] sm:$0xf] }
 0x321   :  { %3354 = vmatmul.bf16.vlgmr.msrb.gmra.mxu1 %v6227_v61  ;;  %3402 = vmatpush.bf16.msrb.mxu0 %v4702_v53  ;;  %v5631_v53 = vld [vmem:[#allocation11 + $0x300] sm:$0xf0]  ;;  %v5150_v10 = vor.u32 %v5669_v3, %v5147_v4 }
 0x322   :  { %3411 = vmatpush.bf16.msra.mxu1 %v5038_v60  ;;  %v4895_v60 = vld [vmem:[#allocation11 + $0x254] sm:$0xf0] }
 0x323   :  { %3379 = vmatpush.bf16.msra.mxu3 %v5062_v14  ;;  %v4898_v5 = vor.u32 %v5606_v59, %v4895_v60  ;;  %v5662_v14 = vld [vmem:[#allocation11 + $0x3fc] sm:$0xf]  ;;  %v4819_v60 = vld [vmem:[#allocation11 + $0x1b4] sm:$0xf0] }
 0x324   :  { %3366 = vmatpush.bf16.msrb.mxu2 %v4838_v15  ;;  %v5119_v15 = vld [vmem:[#allocation11 + $0x414] sm:$0xf0]  ;;  %v5586_v59 = vld [vmem:[#allocation11 + $0x19c] sm:$0xf] }
 0x325   :  { %3403 = vmatpush.bf16.msrb.mxu0 %v4674_v56  ;;  %v5592_v56 = vld [vmem:[#allocation11 + $0x1cc] sm:$0xf]  ;;  %v5122_v24 = vor.u32 %v5662_v14, %v5119_v15  ;;  %v5698_v15 = vld [vmem:[#allocation11 + $0x51c] sm:$0xf] }
 0x326   :  { %3412 = vmatpush.bf16.msra.mxu1 %v5010_v13  ;;  %3380 = vmatmul.bf16.vlgmr.msra.gmra.mxu3 %v6223_v28  ;;  %v4986_v13 = vor.u32 %v5631_v53, %v4985_v6  ;;  %v4842_v32 = vor.u32 %v5592_v56, %v4839_v22  ;;  %v5181_v6 = vld [vmem:[#allocation11 + $0x470] sm:$0xf]  ;;  %v5680_v53 = vld [vmem:[#allocation11 + $0x488] sm:$0xf0] }
 0x327   :  { %3444 = vmatpush.bf16.msrb.mxu3 %v5290_v18  ;;  %3367 = vmatmul.bf16.vlgmr.msrb.gmra.mxu2 %v6221_v54  ;;  %v5624_v18 = vld [vmem:[#allocation11 + $0x2c8] sm:$0xf0] }
 0x328   :  { %3424 = vmatpush.bf16.msra.mxu2 %v5262_v20  ;;  %v4706_v20 = vor.u32 %v5561_v12, %v4705_v11  ;;  %v5635_v11 = vld [vmem:[#allocation11 + $0x324] sm:$0xf]  ;;  %v5015_v12 = vld [vmem:[#allocation11 + $0x33c] sm:$0xf0]  ;;  %v5596_v14 = vld [vmem:[#allocation11 + $0x1e8] sm:$0xf0] }
 0x329   :  { %3404 = vmatpush.bf16.msrb.mxu0 %v4646_v30  ;;  %v5617_v30 = vld [vmem:[#allocation11 + $0x290] sm:$0xf0]  ;;  %v5018_v56 = vor.u32 %v5635_v11, %v5015_v12 }
 0x32a   :  { %3413 = vmatpush.bf16.msra.mxu1 %v4982_v21  ;;  %v4958_v21 = vor.u32 %v5624_v18, %v4957_v17  ;;  %v5182_v17 = vor.u32 %v5680_v53, %v5181_v6  ;;  %v5295_v6 = vld [vmem:[#allocation11 + $0x56c] sm:$0xf0]  ;;  %v5670_v53 = vld [vmem:[#allocation11 + $0x43c] sm:$0xf] }
 0x32b   :  { %3450 = vmatpush.bf16.msra.mxu3 %v4818_v27  ;;  %v5655_v27 = vld [vmem:[#allocation11 + $0x3c4] sm:$0xf] }
 0x32c   :  { %3425 = vmatpush.bf16.msra.mxu2 %v5234_v29  ;;  %v4929_v29 = vld [vmem:[#allocation11 + $0x278] sm:$0xf]  ;;  %v5094_v37 = vor.u32 %v5655_v27, %v5091_v63  ;;  %v5691_v27 = vld [vmem:[#allocation11 + $0x4e4] sm:$0xf]  ;;  %v5239_v63 = vld [vmem:[#allocation11 + $0x4fc] sm:$0xf0] }
 0x32d   :  { %3405 = vmatpush.bf16.msrb.mxu0 %v4618_v45  ;;  %v4930_v39 = vor.u32 %v5617_v30, %v4929_v29  ;;  %v5708_v45 = vld [vmem:[#allocation11 + $0x568] sm:$0xf0]  ;;  %v5125_v30 = vld [vmem:[#allocation11 + $0x400] sm:$0xf]  ;;  %v5242_v35 = vor.u32 %v5691_v27, %v5239_v63  ;;  %v5593_v27 = vld [vmem:[#allocation11 + $0x1d4] sm:$0xf] }
 0x32e   :  { %3414 = vmatpush.bf16.msra.mxu1 %v4954_v38  ;;  %v5694_v38 = vld [vmem:[#allocation11 + $0x4f8] sm:$0xf0]  ;;  %v4847_v63 = vld [vmem:[#allocation11 + $0x1ec] sm:$0xf0] }
 0x32f   :  { %3451 = vmatpush.bf16.msra.mxu3 %v4790_v41  ;;  %v5063_v41 = vld [vmem:[#allocation11 + $0x3a4] sm:$0xf0]  ;;  %v5238_v47 = vor.u32 %v5694_v38, %v5237_v36  ;;  %v5621_v36 = vld [vmem:[#allocation11 + $0x2b4] sm:$0xf]  ;;  %v4959_v38 = vld [vmem:[#allocation11 + $0x2cc] sm:$0xf0] }
 0x330   :  { %3426 = vmatpush.bf16.msra.mxu2 %v5206_v44  ;;  %3406 = vmatmul.bf16.vlgmr.msrb.gmra.mxu0 %v6227_v61  ;;  %v5293_v44 = vld [vmem:[#allocation11 + $0x550] sm:$0xf]  ;;  %v5066_v49 = vor.u32 %v5648_v40, %v5063_v41  ;;  %v5211_v40 = vld [vmem:[#allocation11 + $0x4c4] sm:$0xf0] }
 0x331   :  { %3463 = vmatpush.bf16.msra.mxu0 %v5042_v48  ;;  %v4621_v48 = vld [vmem:[#allocation11 + $0x10] sm:$0xf] }
 0x332   :  { %3415 = vmatpush.bf16.msra.mxu1 %v4926_v52  ;;  %v5209_v52 = vld [vmem:[#allocation11 + $0x4a8] sm:$0xf]  ;;  %v4622_v3 = vor.u32 %v5540_v51, %v4621_v48  ;;  %v4931_v51 = vld [vmem:[#allocation11 + $0x294] sm:$0xf0] }
 0x333   :  { %3452 = vmatpush.bf16.msra.mxu3 %v4762_v58  ;;  %v5294_v58 = vor.u32 %v5708_v45, %v5293_v44  ;;  %v5210_v4 = vor.u32 %v5687_v55, %v5209_v52  ;;  %v4962_v44 = vor.u32 %v5621_v36, %v4959_v38  ;;  %v5659_v45 = vld [vmem:[#allocation11 + $0x3e0] sm:$0xf0]  ;;  %v5677_v52 = vld [vmem:[#allocation11 + $0x474] sm:$0xf]  ;;  %v5183_v55 = vld [vmem:[#allocation11 + $0x48c] sm:$0xf0]  ;;  %v4850_v38 = vor.u32 %v5593_v27, %v4847_v63 }
 0x334   :  { %3427 = vmatpush.bf16.msra.mxu2 %v5178_v62  ;;  %v5642_v62 = vld [vmem:[#allocation11 + $0x35c] sm:$0xf]  ;;  %v5611_v27 = vld [vmem:[#allocation11 + $0x260] sm:$0xf0]  ;;  %v5133_v63 = vld [vmem:[#allocation11 + $0x408] sm:$0xf] }
 0x335   :  { %3464 = vmatpush.bf16.msra.mxu0 %v5014_v2  ;;  %v5603_v2 = vld [vmem:[#allocation11 + $0x220] sm:$0xf0] }
 0x336   :  { %3416 = vmatpush.bf16.msra.mxu1 %v4898_v5  ;;  %5306 = vmatmul.msk.bf16.vlgmr.msrb.gmra.mxu3 %vm1354_vm0, %v6229_v50  ;;  %v4822_v5 = vor.u32 %v5586_v59, %v4819_v60  ;;  %v4874_v19 = vor.u32 %v5603_v2, %v4873_v1  ;;  %v5069_v59 = vld [vmem:[#allocation11 + $0x390] sm:$0xf]  ;;  %v5652_v60 = vld [vmem:[#allocation11 + $0x3a8] sm:$0xf0]  ;;  %v4679_v1 = vld [vmem:[#allocation11 + $0x9c] sm:$0xf0] }
 0x337   :  { %3453 = vmatpush.bf16.msra.mxu3 %v4734_v7  ;;  %v5046_v7 = vor.u32 %v5642_v62, %v5043_v0  ;;  %v5551_v0 = vld [vmem:[#allocation11 + $0x84] sm:$0xf] }
 0x338   :  { %3428 = vmatpush.bf16.msra.mxu2 %v5150_v10  ;;  %v4791_v10 = vld [vmem:[#allocation11 + $0x17c] sm:$0xf0]  ;;  %v5607_v2 = vld [vmem:[#allocation11 + $0x244] sm:$0xf] }
 0x339   :  { %3465 = vmatpush.bf16.msra.mxu0 %v4986_v13  ;;  %v4845_v13 = vld [vmem:[#allocation11 + $0x1d0] sm:$0xf]  ;;  %v4794_v18 = vor.u32 %v5579_v9, %v4791_v10  ;;  %v4682_v9 = vor.u32 %v5551_v0, %v4679_v1  ;;  %v4825_v10 = vld [vmem:[#allocation11 + $0x1a0] sm:$0xf]  ;;  %v5632_v1 = vld [vmem:[#allocation11 + $0x308] sm:$0xf0] }
 0x33a   :  { %3417 = vmatpush.bf16.msra.mxu1 %v4870_v16  ;;  %v5267_v16 = vld [vmem:[#allocation11 + $0x534] sm:$0xf0]  ;;  %v4846_v22 = vor.u32 %v5596_v14, %v4845_v13  ;;  %v5590_v13 = vld [vmem:[#allocation11 + $0x1b8] sm:$0xf0]  ;;  %v5544_v14 = vld [vmem:[#allocation11 + $0x4c] sm:$0xf] }
 0x33b   :  { %3454 = vmatpush.bf16.msra.mxu3 %v4706_v20  ;;  %v5153_v20 = vld [vmem:[#allocation11 + $0x438] sm:$0xf]  ;;  %v5270_v26 = vor.u32 %v5698_v15, %v5267_v16  ;;  %v4651_v15 = vld [vmem:[#allocation11 + $0x64] sm:$0xf0]  ;;  %v4993_v0 = vld [vmem:[#allocation11 + $0x2f0] sm:$0xf] }
 0x33c   :  { %3429 = vmatpush.bf16.msra.mxu2 %v5122_v24  ;;  %v5572_v24 = vld [vmem:[#allocation11 + $0x12c] sm:$0xf] }
 0x33d   :  { %3466 = vmatpush.bf16.msra.mxu0 %v4958_v21  ;;  %v4987_v21 = vld [vmem:[#allocation11 + $0x304] sm:$0xf0]  ;;  %v4766_v29 = vor.u32 %v5572_v24, %v4763_v25  ;;  %v5583_v25 = vld [vmem:[#allocation11 + $0x180] sm:$0xf0] }
 0x33e   :  { %3418 = vmatpush.bf16.msra.mxu1 %v4842_v32  ;;  %v5154_v32 = vor.u32 %v5673_v23, %v5153_v20  ;;  %v5663_v20 = vld [vmem:[#allocation11 + $0x404] sm:$0xf]  ;;  %v4654_v23 = vor.u32 %v5544_v14, %v4651_v15  ;;  %v4797_v24 = vld [vmem:[#allocation11 + $0x168] sm:$0xf] }
 0x33f   :  { %3455 = vmatpush.bf16.msra.mxu3 %v4678_v31  ;;  %v4990_v31 = vor.u32 %v5628_v8, %v4987_v21  ;;  %v4623_v21 = vld [vmem:[#allocation11 + $0x2c] sm:$0xf0]  ;;  %v4685_v15 = vld [vmem:[#allocation11 + $0x88] sm:$0xf] }
 0x340   :  { %3430 = vmatpush.bf16.msra.mxu2 %v5094_v37  ;;  %v4735_v37 = vld [vmem:[#allocation11 + $0x10c] sm:$0xf0] }
 0x341   :  { %3419 = vmatmul.bf16.vlgmr.msra.gmra.mxu1 %v6221_v54  ;;  %3467 = vmatpush.bf16.msra.mxu0 %v4930_v39  ;;  %v5684_v39 = vld [vmem:[#allocation11 + $0x4ac] sm:$0xf]  ;;  %v4738_v42 = vor.u32 %v5565_v34, %v4735_v37  ;;  %v5099_v37 = vld [vmem:[#allocation11 + $0x3e4] sm:$0xf0] }
 0x342   :  { %3476 = vmatpush.bf16.msrb.mxu1 %v5266_v33  ;;  %v5666_v33 = vld [vmem:[#allocation11 + $0x418] sm:$0xf0]  ;;  %v5214_v48 = vor.u32 %v5684_v39, %v5211_v40  ;;  %v5656_v34 = vld [vmem:[#allocation11 + $0x3cc] sm:$0xf]  ;;  %v4769_v40 = vld [vmem:[#allocation11 + $0x130] sm:$0xf] }
 0x343   :  { %3456 = vmatpush.bf16.msra.mxu3 %v4650_v46  ;;  %v5126_v41 = vor.u32 %v5666_v33, %v5125_v30  ;;  %v5558_v46 = vld [vmem:[#allocation11 + $0xbc] sm:$0xf] }
 0x344   :  { %3431 = vmatpush.bf16.msra.mxu2 %v5066_v49  ;;  %v5614_v49 = vld [vmem:[#allocation11 + $0x27c] sm:$0xf] }
 0x345   :  { %3468 = vmatpush.bf16.msra.mxu0 %v4902_v57  ;;  %v5098_v57 = vor.u32 %v5659_v45, %v5097_v43  ;;  %v4934_v62 = vor.u32 %v5614_v49, %v4931_v51  ;;  %v5646_v30 = vld [vmem:[#allocation11 + $0x378] sm:$0xf0]  ;;  %v5102_v43 = vor.u32 %v5656_v34, %v5099_v37  ;;  %v5639_v45 = vld [vmem:[#allocation11 + $0x340] sm:$0xf0]  ;;  %v5071_v49 = vld [vmem:[#allocation11 + $0x3ac] sm:$0xf0] }
 0x346   :  { %3477 = vmatpush.bf16.msrb.mxu1 %v5238_v47  ;;  %v4707_v47 = vld [vmem:[#allocation11 + $0xd4] sm:$0xf0]  ;;  %v5702_v33 = vld [vmem:[#allocation11 + $0x538] sm:$0xf0]  ;;  %v4881_v37 = vld [vmem:[#allocation11 + $0x210] sm:$0xf] }
 0x347   :  { %3432 = vmatmul.bf16.vlgmr.msra.gmra.mxu2 %v6223_v28  ;;  %3457 = vmatpush.bf16.msra.mxu3 %v4622_v3  ;;  %v5186_v3 = vor.u32 %v5677_v52, %v5183_v55  ;;  %v5301_v52 = vld [vmem:[#allocation11 + $0x558] sm:$0xf]  ;;  %v5709_v55 = vld [vmem:[#allocation11 + $0x570] sm:$0xf0] }
 0x348   :  { %3496 = vmatpush.bf16.msrb.mxu2 %v5294_v58  ;;  %v4710_v58 = vor.u32 %v5558_v46, %v4707_v47  ;;  %v5245_v46 = vld [vmem:[#allocation11 + $0x4e8] sm:$0xf]  ;;  %v5695_v47 = vld [vmem:[#allocation11 + $0x500] sm:$0xf0] }
 0x349   :  { %3469 = vmatpush.bf16.msra.mxu0 %v4874_v19  ;;  %v5070_v19 = vor.u32 %v5652_v60, %v5069_v59  ;;  %v5569_v59 = vld [vmem:[#allocation11 + $0x110] sm:$0xf0]  ;;  %v5246_v60 = vor.u32 %v5695_v47, %v5245_v46 }
 0x34a   :  { %3478 = vmatpush.bf16.msrb.mxu1 %v5210_v4  ;;  %3458 = vmatmul.bf16.vlgmr.msra.gmra.mxu3 %v6227_v61  ;;  %v4903_v4 = vld [vmem:[#allocation11 + $0x25c] sm:$0xf0] }
 0x34b   :  { %3515 = vmatpush.bf16.msrb.mxu3 %v5046_v7  ;;  %v5155_v7 = vld [vmem:[#allocation11 + $0x454] sm:$0xf0]  ;;  %v4906_v11 = vor.u32 %v5607_v2, %v4903_v4  ;;  %v5217_v2 = vld [vmem:[#allocation11 + $0x4b0] sm:$0xf]  ;;  %v5302_v4 = vor.u32 %v5709_v55, %v5301_v52 }
 0x34c   :  { %3502 = vmatpush.bf16.msra.mxu2 %v4822_v5  ;;  %v5705_v5 = vld [vmem:[#allocation11 + $0x554] sm:$0xf]  ;;  %v5158_v16 = vor.u32 %v5670_v53, %v5155_v7  ;;  %v4713_v53 = vld [vmem:[#allocation11 + $0xc0] sm:$0xf]  ;;  %v5562_v7 = vld [vmem:[#allocation11 + $0xd8] sm:$0xf0] }
 0x34d   :  { %3470 = vmatpush.bf16.msra.mxu0 %v4846_v22  ;;  %v5298_v12 = vor.u32 %v5705_v5, %v5295_v6  ;;  %v4826_v22 = vor.u32 %v5590_v13, %v4825_v10  ;;  %v4994_v6 = vor.u32 %v5632_v1, %v4993_v0  ;;  %v5625_v10 = vld [vmem:[#allocation11 + $0x2d0] sm:$0xf0]  ;;  %v4714_v13 = vor.u32 %v5562_v7, %v4713_v53 }
 0x34e   :  { %3479 = vmatpush.bf16.msrb.mxu1 %v5182_v17  ;;  %v5600_v17 = vld [vmem:[#allocation11 + $0x20c] sm:$0xf] }
 0x34f   :  { %3516 = vmatpush.bf16.msrb.mxu3 %v5018_v56  ;;  %v5127_v56 = vld [vmem:[#allocation11 + $0x41c] sm:$0xf0] }
 0x350   :  { %3503 = vmatpush.bf16.msra.mxu2 %v4794_v18  ;;  %3471 = vmatmul.bf16.vlgmr.msra.gmra.mxu0 %v6221_v54  ;;  %v4875_v18 = vld [vmem:[#allocation11 + $0x224] sm:$0xf0] }
 0x351   :  { %3528 = vmatpush.bf16.msrb.mxu0 %v5270_v26  ;;  %v5537_v26 = vld [vmem:[#allocation11 + $0x14] sm:$0xf]  ;;  %v4878_v8 = vor.u32 %v5600_v17, %v4875_v18  ;;  %v4937_v18 = vld [vmem:[#allocation11 + $0x280] sm:$0xf] }
 0x352   :  { %3480 = vmatpush.bf16.msrb.mxu1 %v5154_v32  ;;  %v5130_v32 = vor.u32 %v5663_v20, %v5127_v56  ;;  %v4626_v36 = vor.u32 %v5537_v26, %v4623_v21  ;;  %v5618_v20 = vld [vmem:[#allocation11 + $0x298] sm:$0xf0]  ;;  %v5161_v56 = vld [vmem:[#allocation11 + $0x440] sm:$0xf]  ;;  %v5548_v26 = vld [vmem:[#allocation11 + $0x68] sm:$0xf0] }
 0x353   :  { %3517 = vmatpush.bf16.msrb.mxu3 %v4990_v31  ;;  %v5273_v31 = vld [vmem:[#allocation11 + $0x520] sm:$0xf]  ;;  %v4909_v21 = vld [vmem:[#allocation11 + $0x248] sm:$0xf] }
 0x354   :  { %3504 = vmatpush.bf16.msra.mxu2 %v4766_v29  ;;  %v5049_v29 = vld [vmem:[#allocation11 + $0x360] sm:$0xf] }
 0x355   :  { %3529 = vmatpush.bf16.msrb.mxu0 %v5242_v35  ;;  %v4798_v35 = vor.u32 %v5583_v25, %v4797_v24  ;;  %v5050_v39 = vor.u32 %v5646_v30, %v5049_v29  ;;  %v4938_v24 = vor.u32 %v5618_v20, %v4937_v18  ;;  %v4657_v25 = vld [vmem:[#allocation11 + $0x50] sm:$0xf]  ;;  %v4910_v30 = vor.u32 %v5611_v27, %v4909_v21 }
 0x356   :  { %3481 = vmatpush.bf16.msrb.mxu1 %v5126_v41  ;;  %v5576_v41 = vld [vmem:[#allocation11 + $0x148] sm:$0xf0]  ;;  %v4658_v29 = vor.u32 %v5548_v26, %v4657_v25 }
 0x357   :  { %3518 = vmatpush.bf16.msrb.mxu3 %v4962_v44  ;;  %5307 = vmatmul.msk.bf16.vlgmr.msrb.gmra.mxu2 %vm1354_vm0, %v6229_v50  ;;  %v5021_v44 = vld [vmem:[#allocation11 + $0x328] sm:$0xf]  ;;  %v4770_v51 = vor.u32 %v5576_v41, %v4769_v40 }
 0x358   :  { %3505 = vmatpush.bf16.msra.mxu2 %v4738_v42  ;;  %v5274_v42 = vor.u32 %v5702_v33, %v5273_v31  ;;  %v4629_v31 = vld [vmem:[#allocation11 + $0x18] sm:$0xf]  ;;  %v5541_v33 = vld [vmem:[#allocation11 + $0x30] sm:$0xf0] }
 0x359   :  { %3530 = vmatpush.bf16.msrb.mxu0 %v5214_v48  ;;  %v5649_v48 = vld [vmem:[#allocation11 + $0x394] sm:$0xf] }
 0x35a   :  { %3482 = vmatpush.bf16.msrb.mxu1 %v5098_v57  ;;  %v5022_v57 = vor.u32 %v5639_v45, %v5021_v44  ;;  %v5077_v44 = vld [vmem:[#allocation11 + $0x398] sm:$0xf]  ;;  %v5653_v45 = vld [vmem:[#allocation11 + $0x3b0] sm:$0xf0] }
 0x35b   :  { %3519 = vmatpush.bf16.msrb.mxu3 %v4934_v62  ;;  %v5074_v62 = vor.u32 %v5649_v48, %v5071_v49  ;;  %v5078_v47 = vor.u32 %v5653_v45, %v5077_v44 }
 0x35c   :  { %3506 = vmatpush.bf16.msra.mxu2 %v4710_v58  ;;  %v4741_v58 = vld [vmem:[#allocation11 + $0xf8] sm:$0xf] }
 0x35d   :  { %3531 = vmatpush.bf16.msrb.mxu0 %v5186_v3  ;;  %v5688_v3 = vld [vmem:[#allocation11 + $0x4c8] sm:$0xf0]  ;;  %v4742_v5 = vor.u32 %v5569_v59, %v4741_v58 }
 0x35e   :  { %3483 = vmatpush.bf16.msrb.mxu1 %v5070_v19  ;;  %v5218_v19 = vor.u32 %v5688_v3, %v5217_v2 }
 0x35f   :  { %3520 = vmatpush.bf16.msrb.mxu3 %v4906_v11  ;;  %v5189_v11 = vld [vmem:[#allocation11 + $0x478] sm:$0xf] }
 0x360   :  { %3507 = vmatpush.bf16.msra.mxu2 %v4682_v9  ;;  %v4965_v9 = vld [vmem:[#allocation11 + $0x2b8] sm:$0xf] }
 0x361   :  { %3532 = vmatpush.bf16.msrb.mxu0 %v5158_v16  ;;  %3484 = vmatmul.bf16.vlgmr.msrb.gmra.mxu1 %v6223_v28  ;;  %v4966_v14 = vor.u32 %v5625_v10, %v4965_v9  ;;  %v5555_v16 = vld [vmem:[#allocation11 + $0xa0] sm:$0xf0] }
 0x362   :  { %3548 = vmatpush.bf16.msra.mxu1 %v5298_v12  ;;  %v5681_v12 = vld [vmem:[#allocation11 + $0x490] sm:$0xf0] }
 0x363   :  { %3521 = vmatpush.bf16.msrb.mxu3 %v4878_v8  ;;  %v5190_v17 = vor.u32 %v5681_v12, %v5189_v11 }
 0x364   :  { %3508 = vmatpush.bf16.msra.mxu2 %v4654_v23  ;;  %v4686_v23 = vor.u32 %v5555_v16, %v4685_v15 }
 0x365   :  { %3533 = vmatpush.bf16.msrb.mxu0 %v5130_v32  ;;  %v5667_v32 = vld [vmem:[#allocation11 + $0x420] sm:$0xf0] }
 0x366   :  { %3554 = vmatpush.bf16.msrb.mxu1 %v4826_v22  ;;  %v5674_v22 = vld [vmem:[#allocation11 + $0x458] sm:$0xf0]  ;;  %v5134_v34 = vor.u32 %v5667_v32, %v5133_v63 }
 0x367   :  { %3522 = vmatpush.bf16.msrb.mxu3 %v4850_v38  ;;  %v5162_v8 = vor.u32 %v5674_v22, %v5161_v56  ;;  %v5660_v38 = vld [vmem:[#allocation11 + $0x3e8] sm:$0xf0] }
 0x368   :  { %3509 = vmatpush.bf16.msra.mxu2 %v4626_v36  ;;  %v5105_v36 = vld [vmem:[#allocation11 + $0x3d0] sm:$0xf] }
 0x369   :  { %3534 = vmatpush.bf16.msrb.mxu0 %v5102_v43  ;;  %v5106_v41 = vor.u32 %v5660_v38, %v5105_v36  ;;  %v5597_v43 = vld [vmem:[#allocation11 + $0x1f0] sm:$0xf0] }
 0x36a   :  { %3555 = vmatpush.bf16.msrb.mxu1 %v4798_v35  ;;  %3523 = vmatmul.bf16.vlgmr.msrb.gmra.mxu3 %v6221_v54  ;;  %v5604_v35 = vld [vmem:[#allocation11 + $0x228] sm:$0xf0] }
 0x36b   :  { %3580 = vmatpush.bf16.msra.mxu3 %v5274_v42  ;;  %3510 = vmatmul.bf16.vlgmr.msra.gmra.mxu2 %v6227_v61  ;;  %v4882_v40 = vor.u32 %v5604_v35, %v4881_v37  ;;  %v4853_v42 = vld [vmem:[#allocation11 + $0x1d8] sm:$0xf] }
 0x36c   :  { %3567 = vmatpush.bf16.msrb.mxu2 %v5050_v39  ;;  %v4630_v39 = vor.u32 %v5541_v33, %v4629_v31  ;;  %v4854_v46 = vor.u32 %v5597_v43, %v4853_v42 }
 0x36d   :  { %3535 = vmatpush.bf16.msrb.mxu0 %v5074_v62 }
 0x36e   :  { %3556 = vmatpush.bf16.msrb.mxu1 %v4770_v51  ;;  %v6264_v51 = vld [vmem:[#allocation13] sm:$0x7f] }
 0x36f   :  { %3581 = vmatpush.bf16.msra.mxu3 %v5246_v60  ;;  %v2327_v16 = vperm.slane %v6264_v51, 2  ;;  %v2328_v32 = vperm.slane %v6264_v51, 3 }
 0x370   :  { %3568 = vmatpush.bf16.msrb.mxu2 %v5022_v57  ;;  %3536 = vmatmul.bf16.vlgmr.msrb.gmra.mxu0 %v6223_v28  ;;  %v2325_v57 = vperm.slane %v6264_v51, 0 }
 0x371   :  { %3600 = vmatpush.bf16.msra.mxu0 %v5302_v4  ;;  %5308 = vmatmul.msk.bf16.vlgmr.msra.gmra.mxu1 %vm1354_vm0, %v6229_v50 }
 0x372   :  { %3557 = vmatpush.bf16.msrb.mxu1 %v4742_v5 }
 0x373   :  { %3582 = vmatpush.bf16.msra.mxu3 %v5218_v19 }
 0x374   :  { %3569 = vmatpush.bf16.msrb.mxu2 %v4994_v6 }
 0x376   :  { %3558 = vmatpush.bf16.msrb.mxu1 %v4714_v13  ;;  %v2326_v13 = vperm.slane %v6264_v51, 1 }
 0x377   :  { %3583 = vmatpush.bf16.msra.mxu3 %v5190_v17 }
 0x378   :  { %3570 = vmatpush.bf16.msrb.mxu2 %v4966_v14 }
 0x37a   :  { %3559 = vmatpush.bf16.msrb.mxu1 %v4686_v23 }
 0x37b   :  { %3584 = vmatpush.bf16.msra.mxu3 %v5162_v8 }
 0x37c   :  { %3571 = vmatpush.bf16.msrb.mxu2 %v4938_v24 }
 0x37d   :  { %v3264_v48 = vpop.f32.mrf.mxu0 }
 0x37e   :  { %3560 = vmatpush.bf16.msrb.mxu1 %v4658_v29  ;;  %v3277_v49 = vpop.f32.mrf.mxu1 }
 0x37f   :  { %3585 = vmatpush.bf16.msra.mxu3 %v5134_v34 }
 0x380   :  { %3572 = vmatpush.bf16.msrb.mxu2 %v4910_v30  ;;  %5309 = vmatmul.msk.bf16.vlgmr.msra.gmra.mxu0 %vm1354_vm0, %v6229_v50 }
 0x382   :  { %3561 = vmatpush.bf16.msrb.mxu1 %v4630_v39 }
 0x383   :  { %3586 = vmatpush.bf16.msra.mxu3 %v5106_v41 }
 0x384   :  { %3573 = vmatpush.bf16.msrb.mxu2 %v4882_v40 }
 0x385   :  { %3562 = vmatmul.bf16.vlgmr.msrb.gmra.mxu1 %v6227_v61  ;;  %v3266_v52 = vpop.f32.mrf.mxu0 }
 0x386   :  { %v3279_v55 = vpop.f32.mrf.mxu1 }
 0x387   :  { %3587 = vmatpush.bf16.msra.mxu3 %v5078_v47 }
 0x388   :  { %3574 = vmatpush.bf16.msrb.mxu2 %v4854_v46 }
 0x389   :  { %v3251_v50 = vpop.f32.mrf.mxu3 }
 0x38a   :  { %3588 = vmatmul.bf16.vlgmr.msra.gmra.mxu3 %v6223_v28  ;;  %v3252_v58 = vadd.f32 %v3251_v50, %v2325_v57  ;;  %v3290_v59 = vpop.f32.mrf.mxu2 }
 0x38b   :  { %3575 = vmatmul.bf16.vlgmr.msrb.gmra.mxu2 %v6221_v54 }
 0x38c   :  { %v3265_v60 = vadd.f32 %v3264_v48, %v3252_v58 }
 0x38d   :  { %v3329_v62 = vpop.f32.mrf.mxu0 }
 0x38e   :  { %v3278_v61 = vadd.f32 %v3277_v49, %v3265_v60  ;;  %v3342_v0 = vpop.f32.mrf.mxu1 }
 0x390   :  { %v3291_v1 = vadd.f32 %v3290_v59, %v3278_v61 }
 0x391   :  { %v3253_v2 = vpop.f32.mrf.mxu3 }
 0x392   :  { %v3292_v3 = vpop.f32.mrf.mxu2  ;;  %v3606_v37 = vsub.f32 0.0, %v3291_v1 }
 0x394   :  { %v3613_v40 = vmul.f32 1.442695, %v3606_v37 }
 0x395   :  { %v3331_v4 = vpop.f32.mrf.mxu0 }
 0x396   :  { %v3344_v54 = vpop.f32.mrf.mxu1 }
 0x399   :  { %v3316_v5 = vpop.f32.mrf.mxu3 }
 0x39a   :  { %v3303_v28 = vpop.f32.mrf.mxu2 }
 0x39b   :  { %v3304_v15 = vadd.f32 %v3303_v28, %v2326_v13  ;;  %v2330_v13 = vperm.slane %v6264_v51, 5 }
 0x39d   :  { %v3394_v6 = vpop.f32.mrf.mxu0  ;;  %v3317_v20 = vadd.f32 %v3316_v5, %v3304_v15 }
 0x39e   :  { %v3355_v53 = vpop.f32.mrf.mxu1 }
 0x39f   :  { %v3356_v56 = vadd.f32 %v3355_v53, %v2327_v16  ;;  %v3330_v24 = vadd.f32 %v3329_v62, %v3317_v20  ;;  %v2329_v20 = vperm.slane %v6264_v51, 4 }
 0x3a1   :  { %v3318_v7 = vpop.f32.mrf.mxu3  ;;  %v3343_v21 = vadd.f32 %v3342_v0, %v3330_v24 }
 0x3a2   :  { %v3305_v19 = vpop.f32.mrf.mxu2 }
 0x3a3   :  { %v3607_v63 = vsub.f32 0.0, %v3343_v21 }
 0x3a5   :  { %v3396_v9 = vpop.f32.mrf.mxu0  ;;  %v3615_v33 = vmul.f32 1.442695, %v3607_v63  ;;  %v2331_v63 = vperm.slane %v6264_v51, 6 }
 0x3a6   :  { %v3357_v10 = vpop.f32.mrf.mxu1 }
 0x3a7   :  { %5726 = vpow2.f32 %v3615_v33 }
 0x3a9   :  { %v3381_v11 = vpop.f32.mrf.mxu3 }
 0x3aa   :  { %v3368_v12 = vpop.f32.mrf.mxu2 }
 0x3ab   :  { %v3369_v23 = vadd.f32 %v3368_v12, %v3356_v56 }
 0x3ad   :  { %v3407_v14 = vpop.f32.mrf.mxu0  ;;  %v3382_v26 = vadd.f32 %v3381_v11, %v3369_v23  ;;  %v5727_v45 = vpop.eup %5726 }
 0x3ae   :  { %v3408_v34 = vadd.f32 %v3407_v14, %v2328_v32  ;;  %v3628_v49 = vadd.f32 1.0, %v5727_v45 }
 0x3af   :  { %v3395_v27 = vadd.f32 %v3394_v6, %v3382_v26 }
 0x3b1   :  { %v3383_v17 = vpop.f32.mrf.mxu3  ;;  %v3608_v30 = vsub.f32 0.0, %v3395_v27 }
 0x3b2   :  { %v3370_v18 = vpop.f32.mrf.mxu2 }
 0x3b3   :  { %v3617_v35 = vmul.f32 1.442695, %v3608_v30 }
 0x3b5   :  { %v3409_v22 = vpop.f32.mrf.mxu0  ;;  %5728 = vpow2.f32 %v3617_v35 }
 0x3b6   :  { %5730 = vpow2.f32 %v3613_v40 }
 0x3b9   :  { %v3446_v25 = vpop.f32.mrf.mxu3 }
 0x3bb   :  { %v5729_v48 = vpop.eup %5728 }
 0x3bc   :  { %v3629_v55 = vadd.f32 1.0, %v5729_v48  ;;  %v5731_v50 = vpop.eup %5730 }
 0x3bd   :  { %v3627_v59 = vadd.f32 1.0, %v5731_v50 }
 0x3be   :  { %v3420_v8 = vpop.f32.mrf.mxu1 }
 0x3bf   :  { %v3421_v36 = vadd.f32 %v3420_v8, %v3408_v34 }
 0x3c1   :  { %v3448_v29 = vpop.f32.mrf.mxu3 }
 0x3c6   :  { %v3422_v31 = vpop.f32.mrf.mxu1 }
 0x3ca   :  { %v3433_v38 = vpop.f32.mrf.mxu2 }
 0x3cb   :  { %v3434_v39 = vadd.f32 %v3433_v38, %v3421_v36 }
 0x3cd   :  { %v3447_v41 = vadd.f32 %v3446_v25, %v3434_v39  ;;  %v3459_v42 = vpop.f32.mrf.mxu3  ;;  %v3472_v43 = vpop.f32.mrf.mxu0 }
 0x3ce   :  { %v3460_v22 = vadd.f32 %v3459_v42, %v2329_v20 }
 0x3cf   :  { %v3609_v44 = vsub.f32 0.0, %v3447_v41 }
 0x3d0   :  { %v3473_v26 = vadd.f32 %v3472_v43, %v3460_v22 }
 0x3d1   :  { %v3619_v46 = vmul.f32 1.442695, %v3609_v44 }
 0x3d2   :  { %v3435_v47 = vpop.f32.mrf.mxu2 }
 0x3d3   :  { %5732 = vpow2.f32 %v3619_v46 }
 0x3d4   :  { %5734 = vrcp.f32 %v3628_v49 }
 0x3d5   :  { %v3461_v52 = vpop.f32.mrf.mxu3  ;;  %v3474_v57 = vpop.f32.mrf.mxu0  ;;  %5736 = vrcp.f32 %v3629_v55 }
 0x3d9   :  { %v5733_v58 = vpop.eup %5732 }
 0x3da   :  { %v3630_v60 = vadd.f32 1.0, %v5733_v58  ;;  %v3498_v62 = vpop.f32.mrf.mxu2  ;;  %v5735_v0 = vpop.eup %5734 }
 0x3db   :  { %v5737_v1 = vpop.eup %5736  ;;  %v3648_v2 = vrot.slane %v5735_v0, 6 }
 0x3dc   :  { %5738 = vrcp.f32 %v3630_v60  ;;  %v3649_v54 = vrot.slane %v5737_v1, 4 }
 0x3dd   :  { %5740 = vrcp.f32 %v3627_v59 }
 0x3de   :  { %v3485_v61 = vpop.f32.mrf.mxu1 }
 0x3df   :  { %v3486_v21 = vadd.f32 %v3485_v61, %v3473_v26 }
 0x3e1   :  { %v3499_v29 = vadd.f32 %v3498_v62, %v3486_v21 }
 0x3e2   :  { %v5739_v3 = vpop.eup %5738  ;;  %v3500_v4 = vpop.f32.mrf.mxu2 }
 0x3e3   :  { %v3650_v5 = vrot.slane %v5739_v3, 2  ;;  %v5741_v28 = vpop.eup %5740  ;;  %v3610_v34 = vsub.f32 0.0, %v3499_v29 }
 0x3e4   :  { %v3653_v53 = vsel %vm2050_vm2, %v5741_v28, %v3648_v2 }
 0x3e5   :  { %v3655_v7 = vsel %vm3654_vm4, %v3649_v54, %v3650_v5  ;;  %v3621_v39 = vmul.f32 1.442695, %v3610_v34 }
 0x3e6   :  { %v3487_v6 = vpop.f32.mrf.mxu1  ;;  %v3657_v19 = vsel %vm3656_vm5, %v3653_v53, %v3655_v7 }
 0x3e7   :  { %3662 = vst [vmem:[#allocation14] sm:$0xff] %v3657_v19 }
 0x3ed   :  { %v3537_v10 = vpop.f32.mrf.mxu0  ;;  %v3524_v11 = vpop.f32.mrf.mxu3 }
 0x3ee   :  { %v3511_v9 = vpop.f32.mrf.mxu2  ;;  %v3550_v12 = vpop.f32.mrf.mxu1 }
 0x3ef   :  { %v3512_v14 = vadd.f32 %v3511_v9, %v2330_v13 }
 0x3f1   :  { %v3525_v56 = vadd.f32 %v3524_v11, %v3512_v14 }
 0x3f3   :  { %v3538_v23 = vadd.f32 %v3537_v10, %v3525_v56 }
 0x3f5   :  { %v3539_v16 = vpop.f32.mrf.mxu0  ;;  %v3526_v17 = vpop.f32.mrf.mxu3  ;;  %v3551_v8 = vadd.f32 %v3550_v12, %v3538_v23 }
 0x3f6   :  { %v3513_v15 = vpop.f32.mrf.mxu2  ;;  %v3552_v18 = vpop.f32.mrf.mxu1 }
 0x3f7   :  { %v3611_v27 = vsub.f32 0.0, %v3551_v8 }
 0x3f9   :  { %v3623_v31 = vmul.f32 1.442695, %v3611_v27 }
 0x3fb   :  { %5742 = vpow2.f32 %v3623_v31 }
 0x3fc   :  { %5744 = vpow2.f32 %v3621_v39 }
 0x3fd   :  { %v3602_v24 = vpop.f32.mrf.mxu0 }
 0x401   :  { %v5743_v42 = vpop.eup %5742 }
 0x402   :  { %v3563_v25 = vpop.f32.mrf.mxu1  ;;  %v3632_v51 = vadd.f32 1.0, %v5743_v42  ;;  %v5745_v46 = vpop.eup %5744 }
 0x403   :  { %v3564_v33 = vadd.f32 %v3563_v25, %v2331_v63  ;;  %v3631_v48 = vadd.f32 1.0, %v5745_v46 }
 0x405   :  { %v3604_v32 = vpop.f32.mrf.mxu0 }
 0x40a   :  { %v3565_v30 = vpop.f32.mrf.mxu1 }
 0x40d   :  { %v3589_v36 = vpop.f32.mrf.mxu3 }
 0x40e   :  { %v3576_v37 = vpop.f32.mrf.mxu2 }
 0x40f   :  { %v3577_v35 = vadd.f32 %v3576_v37, %v3564_v33 }
 0x411   :  { %v3590_v38 = vadd.f32 %v3589_v36, %v3577_v35 }
 0x413   :  { %v3603_v40 = vadd.f32 %v3602_v24, %v3590_v38 }
 0x415   :  { %v3612_v41 = vsub.f32 0.0, %v3603_v40  ;;  %v3591_v45 = vpop.f32.mrf.mxu3 }
 0x416   :  { %v3578_v43 = vpop.f32.mrf.mxu2 }
 0x417   :  { %v3625_v44 = vmul.f32 1.442695, %v3612_v41 }
 0x419   :  { %5746 = vpow2.f32 %v3625_v44 }
 0x41a   :  { %5748 = vrcp.f32 %v3632_v51 }
 0x41f   :  { %v5747_v47 = vpop.eup %5746 }
 0x420   :  { %v3633_v49 = vadd.f32 1.0, %v5747_v47  ;;  %v5749_v52 = vpop.eup %5748 }
 0x421   :  { %v3651_v55 = vrot.slane %v5749_v52, 6 }
 0x422   :  { %5750 = vrcp.f32 %v3633_v49 }
 0x423   :  { %5752 = vrcp.f32 %v3631_v48 }
 0x428   :  { %v5751_v57 = vpop.eup %5750 }
 0x429   :  { %v5753_v50 = vpop.eup %5752  ;;  %v3652_v58 = vrot.slane %v5751_v57, 4 }
 0x42a   :  { %v3658_v59 = vsel %vm2050_vm2, %v5753_v50, %v3651_v55 }
 0x42b   :  { %v3659_v60 = vsel %vm3656_vm5, %v3658_v59, %v3652_v58 }
 0x42c   :  { %3667 = vst.msk [vmem:[#allocation14 + $0x8] sm:$0x3f] %vm3666_vm9, %v3659_v60 }
 0x42d   :  { %3680 = dma.vmem_to_hbm [thread:$0]  %s3676_s26, 224, %s3678_s14, [#allocation4]  }
 0x42e   :  { %5954 = dma.done.wait [#allocation4], 224  }
 0x42f   :  { %5955 = vsyncadd [#allocation4], 4294967072 }
 0x430   :  { %3689 = vsyncpa [#allocation3], 1 }
 0x431   :  { %3690 = vsyncpa [#allocation6], 1 }
 0x432   :  { %3691 = vsyncpa [#allocation9], 1 }
 0x433   :  { %3692 = vsyncpa [#allocation12], 1 }
 0x434   :  { %3693 = vsyncpa [#allocation4], 1 }

</bundles_post_ra>
